<compile_context>
chip_gen: v7x
topology: tpu7x:2x2x1
jax: 0.10.0
libtpu: 0.0.40
codegen_flags: <defaults>
</compile_context>

<pallas_src>
import jax
import jax.numpy as jnp
import numpy as np
from jax.experimental import pallas as pl
from jax.experimental.pallas import tpu as pltpu


def _fused_conv_kernel(f_ref, l_ref, wf_ref, wl_ref, b1_ref, w2_ref, b2_ref,
                       o_ref, pad_ref, x1_ref):
    """Grouped 3x3 conv (VPU) fused with dense 3x3 conv (MXU im2col).

    f_ref, l_ref  : (1, H, W, C)   unpadded NHWC inputs (resident across the slab axis)
    wf_ref, wl_ref: (9, C)         per-tap grouped-conv weights (feature / latent halves)
    b1_ref, b2_ref: (1, C)         biases
    w2_ref        : (9*C, C)       dense-conv weights, tap-major rows (im2col layout)
    o_ref         : (1, TH*W, C)   output row-slab, flattened (h, w) row-major
    pad_ref       : (H+2, W+2, C)  reusable zero-padded input staging buffer (VMEM scratch)
    x1_ref        : (H+2, W+2, C)  conv1 result with zero border, persists across slabs
    """
    t = pl.program_id(1)
    H, W, C = f_ref.shape[1], f_ref.shape[2], f_ref.shape[3]
    TH = o_ref.shape[1] // W

    # --------------- stage 1: grouped conv1, once per image (t == 0) ---------------
    @pl.when(t == 0)
    def _():
        # Zero once; the border stays zero while the interior is overwritten per input.
        pad_ref[...] = jnp.zeros_like(pad_ref)

        def accumulate(src_ref, w_ref, acc):
            pad_ref[pl.ds(1, H), pl.ds(1, W), :] = src_ref[0]
            xp = pad_ref[...].astype(jnp.float32)            # (H+2, W+2, C)
            for ky in range(3):
                for kx in range(3):
                    w_tap = w_ref[ky * 3 + kx, :].astype(jnp.float32)
                    acc = acc + xp[ky:ky + H, kx:kx + W, :] * w_tap
            return acc

        acc = jnp.zeros((H, W, C), jnp.float32)
        acc = accumulate(f_ref, wf_ref, acc)                 # group c: w1[c, 0] * feature[c]
        acc = accumulate(l_ref, wl_ref, acc)                 # group c: w1[c, 1] * latent[c]
        acc = acc + b1_ref[0, :].astype(jnp.float32)

        # conv1 output goes into the interior of the persistent padded scratch so that
        # stage 2 reads conv2's zero padding directly (no HBM round trip, no jnp.pad).
        # Cast to the activation dtype to match the PyTorch conv1 -> conv2 round trip.
        x1_ref[...] = jnp.zeros_like(x1_ref)
        x1_ref[pl.ds(1, H), pl.ds(1, W), :] = acc.astype(x1_ref.dtype)

    # --------------- stage 2: dense conv2 on a TH-row slab, every step ---------------
    r0 = t * TH
    if TH % 8 == 0:
        r0 = pl.multiple_of(r0, 8)
    slab = x1_ref[pl.ds(r0, TH + 2), :, :]                   # (TH+2, W+2, C) padded slab
    taps = [slab[ky:ky + TH, kx:kx + W, :].reshape(TH * W, C)
            for ky in range(3) for kx in range(3)]
    patches = jnp.concatenate(taps, axis=-1)                 # (TH*W, 9*C) im2col
    acc2 = jnp.dot(patches, w2_ref[...], preferred_element_type=jnp.float32)
    acc2 = acc2 + b2_ref[0, :].astype(jnp.float32)
    o_ref[0] = acc2.astype(o_ref.dtype)


def feature_map_approximator(feature_embedding, latent_embedding, params, *, tile_h=None):
    """feature_embedding / latent_embedding: (B, C, H, W), PyTorch NCHW convention.

    Returns the (H*W, B, C) sequence that feeds SS2D_1 in the original module.
    """
    w1, b1, w2, b2 = params["w1"], params["b1"], params["w2"], params["b2"]
    B, C, H, W = feature_embedding.shape
    x_dtype = feature_embedding.dtype

    # Row-slab height for conv2: bounds the im2col buffer and gives the pipeline
    # B * H/TH grid steps; keep it a multiple of 8 sublanes when possible.
    if tile_h is None:
        tile_h = 8 if H % 8 == 0 else H
    assert H % tile_h == 0, "tile_h must divide H"
    n_t = H // tile_h

    # Layout glue (cheap, one-time): NCHW -> NHWC so channels sit on the 128-lane axis.
    f = jnp.transpose(feature_embedding, (0, 2, 3, 1))
    l = jnp.transpose(latent_embedding, (0, 2, 3, 1))

    # conv1 weight (C, 2, 3, 3): stack(dim=2).view interleaves channels [f0, l0, f1, l1, ...]
    # so group c sees (feature[c], latent[c]) -> (w1[c, 0], w1[c, 1]).
    wf = jnp.transpose(w1[:, 0, :, :], (1, 2, 0)).reshape(9, C)
    wl = jnp.transpose(w1[:, 1, :, :], (1, 2, 0)).reshape(9, C)
    b1r = b1.reshape(1, C)
    # conv2 weight (Cout, Cin, 3, 3) -> (tap*Cin, Cout), tap-major, matching the im2col order.
    w2r = jnp.transpose(w2, (2, 3, 1, 0)).reshape(9 * C, C)
    b2r = b2.reshape(1, C)

    # VMEM budget (per grid step, incl. double buffering) -> scoped-VMEM request.
    itemsize = jnp.dtype(x_dtype).itemsize
    vmem_est = (
        2 * 2 * H * W * C * itemsize                    # f, l input blocks (x2 buffers)
        + 2 * (H + 2) * (W + 2) * C * itemsize          # pad + x1 VMEM scratch
        + 2 * (H + 2) * (W + 2) * C * 4                 # conv1 f32 slab + accumulator temporaries
        + 2 * 2 * tile_h * W * C * itemsize             # output blocks (x2 buffers)
        + 2 * tile_h * W * 9 * C * 4                    # im2col patches + f32 matmul accumulator
        + 2 * (9 * C * C + 32 * C) * itemsize           # weights / biases
    )
    # 32 MiB floor is safe on v5e/v6e/v7x; cap below v7x's 64 MiB physical VMEM.
    # (For production shapes on v6e the cap can be raised toward ~100 MiB.)
    vmem_limit = int(min(max(vmem_est * 3 // 2, 32 * 1024 * 1024), 48 * 1024 * 1024))

    x2 = pl.pallas_call(
        _fused_conv_kernel,
        out_shape=jax.ShapeDtypeStruct((B, H * W, C), x_dtype),
        grid=(B, n_t),
        in_specs=[
            pl.BlockSpec((1, H, W, C), lambda b, t: (b, 0, 0, 0)),   # feature (resident over t)
            pl.BlockSpec((1, H, W, C), lambda b, t: (b, 0, 0, 0)),   # latent  (resident over t)
            pl.BlockSpec((9, C), lambda b, t: (0, 0)),               # wf
            pl.BlockSpec((9, C), lambda b, t: (0, 0)),               # wl
            pl.BlockSpec((1, C), lambda b, t: (0, 0)),               # b1
            pl.BlockSpec((9 * C, C), lambda b, t: (0, 0)),           # w2 (im2col layout)
            pl.BlockSpec((1, C), lambda b, t: (0, 0)),               # b2
        ],
        out_specs=pl.BlockSpec((1, tile_h * W, C), lambda b, t: (b, t, 0)),
        scratch_shapes=[
            pltpu.VMEM((H + 2, W + 2, C), x_dtype),   # padded input staging buffer
            pltpu.VMEM((H + 2, W + 2, C), x_dtype),   # conv1 result with zero border
        ],
        compiler_params=pltpu.CompilerParams(
            dimension_semantics=("parallel", "arbitrary"),
            vmem_limit_bytes=vmem_limit,
        ),
    )(f, l, wf, wl, b1r, w2r, b2r)

    # .flatten(2).permute(2, 0, 1): (B, H*W, C) -> (H*W, B, C).  Kept as one cheap XLA
    # transpose: writing (H*W, B, C) directly from the kernel would need a size-1 output
    # block on the (second-minor) batch axis, which violates the (8, 128) block rule.
    x_seq = jnp.transpose(x2, (1, 0, 2))

    # TODO(synk): SS2D_1 (VSSBlock / selective scan) is not defined in the provided module
    # source, so the (H*W, B, C) sequence is returned without it.
    return x_seq


if __name__ == "__main__":
    # Scaled-down shapes consistent with the module: feature_dim=C, spatial HxW.
    B, C, H, W = 2, 8, 16, 16
    key = jax.random.PRNGKey(0)
    k = jax.random.split(key, 6)
    feature_embedding = jax.random.normal(k[0], (B, C, H, W), jnp.float32)
    latent_embedding = jax.random.normal(k[1], (B, C, H, W), jnp.float32)
    params = {
        "w1": 0.1 * jax.random.normal(k[2], (C, 2, 3, 3), jnp.float32),   # Conv2d(2C, C, 3, groups=C)
        "b1": 0.1 * jax.random.normal(k[3], (C,), jnp.float32),
        "w2": 0.1 * jax.random.normal(k[4], (C, C, 3, 3), jnp.float32),   # Conv2d(C, C, 3)
        "b2": 0.1 * jax.random.normal(k[5], (C,), jnp.float32),
    }

    out = jax.jit(lambda f, l: feature_map_approximator(f, l, params))(
        feature_embedding, latent_embedding)
    jax.block_until_ready(out)
    assert out.shape == (H * W, B, C)

    # Pure-JAX reference (XLA convs) for correctness of the Pallas path.
    combined = jnp.stack([feature_embedding, latent_embedding], axis=2).reshape(B, 2 * C, H, W)
    r1 = jax.lax.conv_general_dilated(
        combined, params["w1"], (1, 1), ((1, 1), (1, 1)),
        dimension_numbers=("NCHW", "OIHW", "NCHW"),
        feature_group_count=C) + params["b1"][None, :, None, None]
    r2 = jax.lax.conv_general_dilated(
        r1, params["w2"], (1, 1), ((1, 1), (1, 1)),
        dimension_numbers=("NCHW", "OIHW", "NCHW")) + params["b2"][None, :, None, None]
    ref = jnp.transpose(r2.reshape(B, C, H * W), (2, 0, 1))
    np.testing.assert_allclose(np.asarray(out), np.asarray(ref), rtol=2e-4, atol=2e-4)

    print("KERNEL_OK")
</pallas_src>

<mosaic_0001>
module attributes {stable_mosaic.version = 11 : i64} {
  func.func @_fused_conv_kernel(%arg0: i32, %arg1: i32, %arg2: memref<1x16x16x8xf32, #tpu.memory_space<vmem>>, %arg3: memref<1x16x16x8xf32, #tpu.memory_space<vmem>>, %arg4: memref<9x8xf32, #tpu.memory_space<vmem>>, %arg5: memref<9x8xf32, #tpu.memory_space<vmem>>, %arg6: memref<1x8xf32, #tpu.memory_space<vmem>>, %arg7: memref<72x8xf32, #tpu.memory_space<vmem>>, %arg8: memref<1x8xf32, #tpu.memory_space<vmem>>, %arg9: memref<1x128x8xf32, #tpu.memory_space<vmem>>, %arg10: memref<18x18x8xf32, #tpu.memory_space<vmem>>, %arg11: memref<18x18x8xf32, #tpu.memory_space<vmem>>) attributes {dimension_semantics = [#tpu.dimension_semantics<parallel>, #tpu.dimension_semantics<arbitrary>], iteration_bounds = array<i64: 2, 2>, scalar_prefetch = 0 : i64, scratch_operands = 2 : i64, tpu.core_type = #tpu.core_type<tc>, window_params = [{transform_indices = @transform_0, window_bounds = array<i64: 1, 16, 16, 8>}, {transform_indices = @transform_1, window_bounds = array<i64: 1, 16, 16, 8>}, {pipeline_mode = #tpu.pipeline_mode<synchronous>, transform_indices = @transform_2, window_bounds = array<i64: 9, 8>}, {pipeline_mode = #tpu.pipeline_mode<synchronous>, transform_indices = @transform_3, window_bounds = array<i64: 9, 8>}, {pipeline_mode = #tpu.pipeline_mode<synchronous>, transform_indices = @transform_4, window_bounds = array<i64: 1, 8>}, {pipeline_mode = #tpu.pipeline_mode<synchronous>, transform_indices = @transform_5, window_bounds = array<i64: 72, 8>}, {pipeline_mode = #tpu.pipeline_mode<synchronous>, transform_indices = @transform_6, window_bounds = array<i64: 1, 8>}, {transform_indices = @transform_7, window_bounds = array<i64: 1, 128, 8>}]} {
    %c0_i32 = arith.constant 0 : i32
    %0 = arith.cmpi eq, %arg1, %c0_i32 : i32
    %1 = arith.extui %0 : i1 to i32
    %c0_i32_0 = arith.constant 0 : i32
    %2 = arith.cmpi ne, %1, %c0_i32_0 : i32
    scf.if %2 {
      %cst_9 = arith.constant 0.000000e+00 : f32
      %36 = vector.broadcast %cst_9 : f32 to vector<18x18x8xf32>
      %c0_10 = arith.constant 0 : index
      %c0_11 = arith.constant 0 : index
      %c0_12 = arith.constant 0 : index
      %37 = vector.load %arg10[%c0_10, %c0_11, %c0_12] : memref<18x18x8xf32, #tpu.memory_space<vmem>>, vector<18x18x8xf32>
      tpu.vector_store %arg10[%c0_10, %c0_11, %c0_12], %36 {strides = array<i32>} : memref<18x18x8xf32, #tpu.memory_space<vmem>>, vector<18x18x8xf32>,
      %cst_13 = arith.constant 0.000000e+00 : f32
      %38 = vector.broadcast %cst_13 : f32 to vector<16x16x8xf32>
      %c0_14 = arith.constant 0 : index
      %c0_15 = arith.constant 0 : index
      %c0_16 = arith.constant 0 : index
      %c0_17 = arith.constant 0 : index
      %39 = vector.load %arg2[%c0_14, %c0_15, %c0_16, %c0_17] : memref<1x16x16x8xf32, #tpu.memory_space<vmem>>, vector<1x16x16x8xf32>
      %40 = vector.shape_cast %39 : vector<1x16x16x8xf32> to vector<16x16x8xf32>
      %c1 = arith.constant 1 : index
      %c1_18 = arith.constant 1 : index
      %c0_19 = arith.constant 0 : index
      %41 = vector.load %arg10[%c1, %c1_18, %c0_19] : memref<18x18x8xf32, #tpu.memory_space<vmem>>, vector<16x16x8xf32>
      tpu.vector_store %arg10[%c1, %c1_18, %c0_19], %40 {strides = array<i32>} : memref<18x18x8xf32, #tpu.memory_space<vmem>>, vector<16x16x8xf32>,
      %c0_20 = arith.constant 0 : index
      %c0_21 = arith.constant 0 : index
      %c0_22 = arith.constant 0 : index
      %42 = vector.load %arg10[%c0_20, %c0_21, %c0_22] : memref<18x18x8xf32, #tpu.memory_space<vmem>>, vector<18x18x8xf32>
      %c0_23 = arith.constant 0 : index
      %c0_24 = arith.constant 0 : index
      %43 = vector.load %arg4[%c0_23, %c0_24] : memref<9x8xf32, #tpu.memory_space<vmem>>, vector<1x8xf32>
      %44 = vector.shape_cast %43 : vector<1x8xf32> to vector<8xf32>
      %45 = vector.extract_strided_slice %42 {offsets = [0, 0, 0], sizes = [16, 16, 8], strides = [1, 1, 1]} : vector<18x18x8xf32> to vector<16x16x8xf32>
      %46 = vector.shape_cast %44 : vector<8xf32> to vector<1x1x8xf32>
      %47 = vector.broadcast %46 : vector<1x1x8xf32> to vector<16x16x8xf32>
      %48 = arith.mulf %45, %47 : vector<16x16x8xf32>
      %49 = arith.addf %38, %48 : vector<16x16x8xf32>
      %c1_25 = arith.constant 1 : index
      %c0_26 = arith.constant 0 : index
      %50 = vector.load %arg4[%c1_25, %c0_26] : memref<9x8xf32, #tpu.memory_space<vmem>>, vector<1x8xf32>
      %51 = vector.shape_cast %50 : vector<1x8xf32> to vector<8xf32>
      %52 = vector.extract_strided_slice %42 {offsets = [0, 1, 0], sizes = [16, 16, 8], strides = [1, 1, 1]} : vector<18x18x8xf32> to vector<16x16x8xf32>
      %53 = vector.shape_cast %51 : vector<8xf32> to vector<1x1x8xf32>
      %54 = vector.broadcast %53 : vector<1x1x8xf32> to vector<16x16x8xf32>
      %55 = arith.mulf %52, %54 : vector<16x16x8xf32>
      %56 = arith.addf %49, %55 : vector<16x16x8xf32>
      %c2 = arith.constant 2 : index
      %c0_27 = arith.constant 0 : index
      %57 = vector.load %arg4[%c2, %c0_27] : memref<9x8xf32, #tpu.memory_space<vmem>>, vector<1x8xf32>
      %58 = vector.shape_cast %57 : vector<1x8xf32> to vector<8xf32>
      %59 = vector.extract_strided_slice %42 {offsets = [0, 2, 0], sizes = [16, 16, 8], strides = [1, 1, 1]} : vector<18x18x8xf32> to vector<16x16x8xf32>
      %60 = vector.shape_cast %58 : vector<8xf32> to vector<1x1x8xf32>
      %61 = vector.broadcast %60 : vector<1x1x8xf32> to vector<16x16x8xf32>
      %62 = arith.mulf %59, %61 : vector<16x16x8xf32>
      %63 = arith.addf %56, %62 : vector<16x16x8xf32>
      %c3 = arith.constant 3 : index
      %c0_28 = arith.constant 0 : index
      %64 = vector.load %arg4[%c3, %c0_28] : memref<9x8xf32, #tpu.memory_space<vmem>>, vector<1x8xf32>
      %65 = vector.shape_cast %64 : vector<1x8xf32> to vector<8xf32>
      %66 = vector.extract_strided_slice %42 {offsets = [1, 0, 0], sizes = [16, 16, 8], strides = [1, 1, 1]} : vector<18x18x8xf32> to vector<16x16x8xf32>
      %67 = vector.shape_cast %65 : vector<8xf32> to vector<1x1x8xf32>
      %68 = vector.broadcast %67 : vector<1x1x8xf32> to vector<16x16x8xf32>
      %69 = arith.mulf %66, %68 : vector<16x16x8xf32>
      %70 = arith.addf %63, %69 : vector<16x16x8xf32>
      %c4 = arith.constant 4 : index
      %c0_29 = arith.constant 0 : index
      %71 = vector.load %arg4[%c4, %c0_29] : memref<9x8xf32, #tpu.memory_space<vmem>>, vector<1x8xf32>
      %72 = vector.shape_cast %71 : vector<1x8xf32> to vector<8xf32>
      %73 = vector.extract_strided_slice %42 {offsets = [1, 1, 0], sizes = [16, 16, 8], strides = [1, 1, 1]} : vector<18x18x8xf32> to vector<16x16x8xf32>
      %74 = vector.shape_cast %72 : vector<8xf32> to vector<1x1x8xf32>
      %75 = vector.broadcast %74 : vector<1x1x8xf32> to vector<16x16x8xf32>
      %76 = arith.mulf %73, %75 : vector<16x16x8xf32>
      %77 = arith.addf %70, %76 : vector<16x16x8xf32>
      %c5 = arith.constant 5 : index
      %c0_30 = arith.constant 0 : index
      %78 = vector.load %arg4[%c5, %c0_30] : memref<9x8xf32, #tpu.memory_space<vmem>>, vector<1x8xf32>
      %79 = vector.shape_cast %78 : vector<1x8xf32> to vector<8xf32>
      %80 = vector.extract_strided_slice %42 {offsets = [1, 2, 0], sizes = [16, 16, 8], strides = [1, 1, 1]} : vector<18x18x8xf32> to vector<16x16x8xf32>
      %81 = vector.shape_cast %79 : vector<8xf32> to vector<1x1x8xf32>
      %82 = vector.broadcast %81 : vector<1x1x8xf32> to vector<16x16x8xf32>
      %83 = arith.mulf %80, %82 : vector<16x16x8xf32>
      %84 = arith.addf %77, %83 : vector<16x16x8xf32>
      %c6 = arith.constant 6 : index
      %c0_31 = arith.constant 0 : index
      %85 = vector.load %arg4[%c6, %c0_31] : memref<9x8xf32, #tpu.memory_space<vmem>>, vector<1x8xf32>
      %86 = vector.shape_cast %85 : vector<1x8xf32> to vector<8xf32>
      %87 = vector.extract_strided_slice %42 {offsets = [2, 0, 0], sizes = [16, 16, 8], strides = [1, 1, 1]} : vector<18x18x8xf32> to vector<16x16x8xf32>
      %88 = vector.shape_cast %86 : vector<8xf32> to vector<1x1x8xf32>
      %89 = vector.broadcast %88 : vector<1x1x8xf32> to vector<16x16x8xf32>
      %90 = arith.mulf %87, %89 : vector<16x16x8xf32>
      %91 = arith.addf %84, %90 : vector<16x16x8xf32>
      %c7 = arith.constant 7 : index
      %c0_32 = arith.constant 0 : index
      %92 = vector.load %arg4[%c7, %c0_32] : memref<9x8xf32, #tpu.memory_space<vmem>>, vector<1x8xf32>
      %93 = vector.shape_cast %92 : vector<1x8xf32> to vector<8xf32>
      %94 = vector.extract_strided_slice %42 {offsets = [2, 1, 0], sizes = [16, 16, 8], strides = [1, 1, 1]} : vector<18x18x8xf32> to vector<16x16x8xf32>
      %95 = vector.shape_cast %93 : vector<8xf32> to vector<1x1x8xf32>
      %96 = vector.broadcast %95 : vector<1x1x8xf32> to vector<16x16x8xf32>
      %97 = arith.mulf %94, %96 : vector<16x16x8xf32>
      %98 = arith.addf %91, %97 : vector<16x16x8xf32>
      %c8 = arith.constant 8 : index
      %c0_33 = arith.constant 0 : index
      %99 = vector.load %arg4[%c8, %c0_33] : memref<9x8xf32, #tpu.memory_space<vmem>>, vector<1x8xf32>
      %100 = vector.shape_cast %99 : vector<1x8xf32> to vector<8xf32>
      %101 = vector.extract_strided_slice %42 {offsets = [2, 2, 0], sizes = [16, 16, 8], strides = [1, 1, 1]} : vector<18x18x8xf32> to vector<16x16x8xf32>
      %102 = vector.shape_cast %100 : vector<8xf32> to vector<1x1x8xf32>
      %103 = vector.broadcast %102 : vector<1x1x8xf32> to vector<16x16x8xf32>
      %104 = arith.mulf %101, %103 : vector<16x16x8xf32>
      %105 = arith.addf %98, %104 : vector<16x16x8xf32>
      %c0_34 = arith.constant 0 : index
      %c0_35 = arith.constant 0 : index
      %c0_36 = arith.constant 0 : index
      %c0_37 = arith.constant 0 : index
      %106 = vector.load %arg3[%c0_34, %c0_35, %c0_36, %c0_37] : memref<1x16x16x8xf32, #tpu.memory_space<vmem>>, vector<1x16x16x8xf32>
      %107 = vector.shape_cast %106 : vector<1x16x16x8xf32> to vector<16x16x8xf32>
      %c1_38 = arith.constant 1 : index
      %c1_39 = arith.constant 1 : index
      %c0_40 = arith.constant 0 : index
      %108 = vector.load %arg10[%c1_38, %c1_39, %c0_40] : memref<18x18x8xf32, #tpu.memory_space<vmem>>, vector<16x16x8xf32>
      tpu.vector_store %arg10[%c1_38, %c1_39, %c0_40], %107 {strides = array<i32>} : memref<18x18x8xf32, #tpu.memory_space<vmem>>, vector<16x16x8xf32>,
      %c0_41 = arith.constant 0 : index
      %c0_42 = arith.constant 0 : index
      %c0_43 = arith.constant 0 : index
      %109 = vector.load %arg10[%c0_41, %c0_42, %c0_43] : memref<18x18x8xf32, #tpu.memory_space<vmem>>, vector<18x18x8xf32>
      %c0_44 = arith.constant 0 : index
      %c0_45 = arith.constant 0 : index
      %110 = vector.load %arg5[%c0_44, %c0_45] : memref<9x8xf32, #tpu.memory_space<vmem>>, vector<1x8xf32>
      %111 = vector.shape_cast %110 : vector<1x8xf32> to vector<8xf32>
      %112 = vector.extract_strided_slice %109 {offsets = [0, 0, 0], sizes = [16, 16, 8], strides = [1, 1, 1]} : vector<18x18x8xf32> to vector<16x16x8xf32>
      %113 = vector.shape_cast %111 : vector<8xf32> to vector<1x1x8xf32>
      %114 = vector.broadcast %113 : vector<1x1x8xf32> to vector<16x16x8xf32>
      %115 = arith.mulf %112, %114 : vector<16x16x8xf32>
      %116 = arith.addf %105, %115 : vector<16x16x8xf32>
      %c1_46 = arith.constant 1 : index
      %c0_47 = arith.constant 0 : index
      %117 = vector.load %arg5[%c1_46, %c0_47] : memref<9x8xf32, #tpu.memory_space<vmem>>, vector<1x8xf32>
      %118 = vector.shape_cast %117 : vector<1x8xf32> to vector<8xf32>
      %119 = vector.extract_strided_slice %109 {offsets = [0, 1, 0], sizes = [16, 16, 8], strides = [1, 1, 1]} : vector<18x18x8xf32> to vector<16x16x8xf32>
      %120 = vector.shape_cast %118 : vector<8xf32> to vector<1x1x8xf32>
      %121 = vector.broadcast %120 : vector<1x1x8xf32> to vector<16x16x8xf32>
      %122 = arith.mulf %119, %121 : vector<16x16x8xf32>
      %123 = arith.addf %116, %122 : vector<16x16x8xf32>
      %c2_48 = arith.constant 2 : index
      %c0_49 = arith.constant 0 : index
      %124 = vector.load %arg5[%c2_48, %c0_49] : memref<9x8xf32, #tpu.memory_space<vmem>>, vector<1x8xf32>
      %125 = vector.shape_cast %124 : vector<1x8xf32> to vector<8xf32>
      %126 = vector.extract_strided_slice %109 {offsets = [0, 2, 0], sizes = [16, 16, 8], strides = [1, 1, 1]} : vector<18x18x8xf32> to vector<16x16x8xf32>
      %127 = vector.shape_cast %125 : vector<8xf32> to vector<1x1x8xf32>
      %128 = vector.broadcast %127 : vector<1x1x8xf32> to vector<16x16x8xf32>
      %129 = arith.mulf %126, %128 : vector<16x16x8xf32>
      %130 = arith.addf %123, %129 : vector<16x16x8xf32>
      %c3_50 = arith.constant 3 : index
      %c0_51 = arith.constant 0 : index
      %131 = vector.load %arg5[%c3_50, %c0_51] : memref<9x8xf32, #tpu.memory_space<vmem>>, vector<1x8xf32>
      %132 = vector.shape_cast %131 : vector<1x8xf32> to vector<8xf32>
      %133 = vector.extract_strided_slice %109 {offsets = [1, 0, 0], sizes = [16, 16, 8], strides = [1, 1, 1]} : vector<18x18x8xf32> to vector<16x16x8xf32>
      %134 = vector.shape_cast %132 : vector<8xf32> to vector<1x1x8xf32>
      %135 = vector.broadcast %134 : vector<1x1x8xf32> to vector<16x16x8xf32>
      %136 = arith.mulf %133, %135 : vector<16x16x8xf32>
      %137 = arith.addf %130, %136 : vector<16x16x8xf32>
      %c4_52 = arith.constant 4 : index
      %c0_53 = arith.constant 0 : index
      %138 = vector.load %arg5[%c4_52, %c0_53] : memref<9x8xf32, #tpu.memory_space<vmem>>, vector<1x8xf32>
      %139 = vector.shape_cast %138 : vector<1x8xf32> to vector<8xf32>
      %140 = vector.extract_strided_slice %109 {offsets = [1, 1, 0], sizes = [16, 16, 8], strides = [1, 1, 1]} : vector<18x18x8xf32> to vector<16x16x8xf32>
      %141 = vector.shape_cast %139 : vector<8xf32> to vector<1x1x8xf32>
      %142 = vector.broadcast %141 : vector<1x1x8xf32> to vector<16x16x8xf32>
      %143 = arith.mulf %140, %142 : vector<16x16x8xf32>
      %144 = arith.addf %137, %143 : vector<16x16x8xf32>
      %c5_54 = arith.constant 5 : index
      %c0_55 = arith.constant 0 : index
      %145 = vector.load %arg5[%c5_54, %c0_55] : memref<9x8xf32, #tpu.memory_space<vmem>>, vector<1x8xf32>
      %146 = vector.shape_cast %145 : vector<1x8xf32> to vector<8xf32>
      %147 = vector.extract_strided_slice %109 {offsets = [1, 2, 0], sizes = [16, 16, 8], strides = [1, 1, 1]} : vector<18x18x8xf32> to vector<16x16x8xf32>
      %148 = vector.shape_cast %146 : vector<8xf32> to vector<1x1x8xf32>
      %149 = vector.broadcast %148 : vector<1x1x8xf32> to vector<16x16x8xf32>
      %150 = arith.mulf %147, %149 : vector<16x16x8xf32>
      %151 = arith.addf %144, %150 : vector<16x16x8xf32>
      %c6_56 = arith.constant 6 : index
      %c0_57 = arith.constant 0 : index
      %152 = vector.load %arg5[%c6_56, %c0_57] : memref<9x8xf32, #tpu.memory_space<vmem>>, vector<1x8xf32>
      %153 = vector.shape_cast %152 : vector<1x8xf32> to vector<8xf32>
      %154 = vector.extract_strided_slice %109 {offsets = [2, 0, 0], sizes = [16, 16, 8], strides = [1, 1, 1]} : vector<18x18x8xf32> to vector<16x16x8xf32>
      %155 = vector.shape_cast %153 : vector<8xf32> to vector<1x1x8xf32>
      %156 = vector.broadcast %155 : vector<1x1x8xf32> to vector<16x16x8xf32>
      %157 = arith.mulf %154, %156 : vector<16x16x8xf32>
      %158 = arith.addf %151, %157 : vector<16x16x8xf32>
      %c7_58 = arith.constant 7 : index
      %c0_59 = arith.constant 0 : index
      %159 = vector.load %arg5[%c7_58, %c0_59] : memref<9x8xf32, #tpu.memory_space<vmem>>, vector<1x8xf32>
      %160 = vector.shape_cast %159 : vector<1x8xf32> to vector<8xf32>
      %161 = vector.extract_strided_slice %109 {offsets = [2, 1, 0], sizes = [16, 16, 8], strides = [1, 1, 1]} : vector<18x18x8xf32> to vector<16x16x8xf32>
      %162 = vector.shape_cast %160 : vector<8xf32> to vector<1x1x8xf32>
      %163 = vector.broadcast %162 : vector<1x1x8xf32> to vector<16x16x8xf32>
      %164 = arith.mulf %161, %163 : vector<16x16x8xf32>
      %165 = arith.addf %158, %164 : vector<16x16x8xf32>
      %c8_60 = arith.constant 8 : index
      %c0_61 = arith.constant 0 : index
      %166 = vector.load %arg5[%c8_60, %c0_61] : memref<9x8xf32, #tpu.memory_space<vmem>>, vector<1x8xf32>
      %167 = vector.shape_cast %166 : vector<1x8xf32> to vector<8xf32>
      %168 = vector.extract_strided_slice %109 {offsets = [2, 2, 0], sizes = [16, 16, 8], strides = [1, 1, 1]} : vector<18x18x8xf32> to vector<16x16x8xf32>
      %169 = vector.shape_cast %167 : vector<8xf32> to vector<1x1x8xf32>
      %170 = vector.broadcast %169 : vector<1x1x8xf32> to vector<16x16x8xf32>
      %171 = arith.mulf %168, %170 : vector<16x16x8xf32>
      %172 = arith.addf %165, %171 : vector<16x16x8xf32>
      %c0_62 = arith.constant 0 : index
      %c0_63 = arith.constant 0 : index
      %173 = vector.load %arg6[%c0_62, %c0_63] : memref<1x8xf32, #tpu.memory_space<vmem>>, vector<1x8xf32>
      %174 = vector.shape_cast %173 : vector<1x8xf32> to vector<8xf32>
      %175 = vector.shape_cast %174 : vector<8xf32> to vector<1x1x8xf32>
      %176 = vector.broadcast %175 : vector<1x1x8xf32> to vector<16x16x8xf32>
      %177 = arith.addf %172, %176 : vector<16x16x8xf32>
      %cst_64 = arith.constant 0.000000e+00 : f32
      %178 = vector.broadcast %cst_64 : f32 to vector<18x18x8xf32>
      %c0_65 = arith.constant 0 : index
      %c0_66 = arith.constant 0 : index
      %c0_67 = arith.constant 0 : index
      %179 = vector.load %arg11[%c0_65, %c0_66, %c0_67] : memref<18x18x8xf32, #tpu.memory_space<vmem>>, vector<18x18x8xf32>
      tpu.vector_store %arg11[%c0_65, %c0_66, %c0_67], %178 {strides = array<i32>} : memref<18x18x8xf32, #tpu.memory_space<vmem>>, vector<18x18x8xf32>,
      %c1_68 = arith.constant 1 : index
      %c1_69 = arith.constant 1 : index
      %c0_70 = arith.constant 0 : index
      %180 = vector.load %arg11[%c1_68, %c1_69, %c0_70] : memref<18x18x8xf32, #tpu.memory_space<vmem>>, vector<16x16x8xf32>
      tpu.vector_store %arg11[%c1_68, %c1_69, %c0_70], %177 {strides = array<i32>} : memref<18x18x8xf32, #tpu.memory_space<vmem>>, vector<16x16x8xf32>,
    } else {
    }
    %c8_i32 = arith.constant 8 : i32
    %3 = arith.muli %arg1, %c8_i32 : i32
    %4 = tpu.assume_multiple %3, 8 : i32
    %5 = arith.index_cast %4 : i32 to index
    %c0 = arith.constant 0 : index
    %c0_1 = arith.constant 0 : index
    %6 = vector.load %arg11[%5, %c0, %c0_1] : memref<18x18x8xf32, #tpu.memory_space<vmem>>, vector<10x18x8xf32>
    %7 = vector.extract_strided_slice %6 {offsets = [0, 0, 0], sizes = [8, 16, 8], strides = [1, 1, 1]} : vector<10x18x8xf32> to vector<8x16x8xf32>
    %8 = vector.shape_cast %7 : vector<8x16x8xf32> to vector<128x8xf32>
    %9 = vector.extract_strided_slice %6 {offsets = [0, 1, 0], sizes = [8, 16, 8], strides = [1, 1, 1]} : vector<10x18x8xf32> to vector<8x16x8xf32>
    %10 = vector.shape_cast %9 : vector<8x16x8xf32> to vector<128x8xf32>
    %11 = vector.extract_strided_slice %6 {offsets = [0, 2, 0], sizes = [8, 16, 8], strides = [1, 1, 1]} : vector<10x18x8xf32> to vector<8x16x8xf32>
    %12 = vector.shape_cast %11 : vector<8x16x8xf32> to vector<128x8xf32>
    %13 = vector.extract_strided_slice %6 {offsets = [1, 0, 0], sizes = [8, 16, 8], strides = [1, 1, 1]} : vector<10x18x8xf32> to vector<8x16x8xf32>
    %14 = vector.shape_cast %13 : vector<8x16x8xf32> to vector<128x8xf32>
    %15 = vector.extract_strided_slice %6 {offsets = [1, 1, 0], sizes = [8, 16, 8], strides = [1, 1, 1]} : vector<10x18x8xf32> to vector<8x16x8xf32>
    %16 = vector.shape_cast %15 : vector<8x16x8xf32> to vector<128x8xf32>
    %17 = vector.extract_strided_slice %6 {offsets = [1, 2, 0], sizes = [8, 16, 8], strides = [1, 1, 1]} : vector<10x18x8xf32> to vector<8x16x8xf32>
    %18 = vector.shape_cast %17 : vector<8x16x8xf32> to vector<128x8xf32>
    %19 = vector.extract_strided_slice %6 {offsets = [2, 0, 0], sizes = [8, 16, 8], strides = [1, 1, 1]} : vector<10x18x8xf32> to vector<8x16x8xf32>
    %20 = vector.shape_cast %19 : vector<8x16x8xf32> to vector<128x8xf32>
    %21 = vector.extract_strided_slice %6 {offsets = [2, 1, 0], sizes = [8, 16, 8], strides = [1, 1, 1]} : vector<10x18x8xf32> to vector<8x16x8xf32>
    %22 = vector.shape_cast %21 : vector<8x16x8xf32> to vector<128x8xf32>
    %23 = vector.extract_strided_slice %6 {offsets = [2, 2, 0], sizes = [8, 16, 8], strides = [1, 1, 1]} : vector<10x18x8xf32> to vector<8x16x8xf32>
    %24 = vector.shape_cast %23 : vector<8x16x8xf32> to vector<128x8xf32>
    %25 = tpu.concatenate %8, %10, %12, %14, %16, %18, %20, %22, %24 in 1 : vector<128x8xf32>, vector<128x8xf32>, vector<128x8xf32>, vector<128x8xf32>, vector<128x8xf32>, vector<128x8xf32>, vector<128x8xf32>, vector<128x8xf32>, vector<128x8xf32> -> vector<128x72xf32>
    %c0_2 = arith.constant 0 : index
    %c0_3 = arith.constant 0 : index
    %26 = vector.load %arg7[%c0_2, %c0_3] : memref<72x8xf32, #tpu.memory_space<vmem>>, vector<72x8xf32>
    %cst = arith.constant dense<0.000000e+00> : vector<128x8xf32>
    %27 = tpu.matmul %25, %26, %cst {dimension_numbers = #tpu.dot_dimension_numbers<[1], [0], [0], [1], [0, 0, 1, 1], [], []>} : vector<128x72xf32>, vector<72x8xf32>, vector<128x8xf32> -> vector<128x8xf32>
    %c0_4 = arith.constant 0 : index
    %c0_5 = arith.constant 0 : index
    %28 = vector.load %arg8[%c0_4, %c0_5] : memref<1x8xf32, #tpu.memory_space<vmem>>, vector<1x8xf32>
    %29 = vector.shape_cast %28 : vector<1x8xf32> to vector<8xf32>
    %30 = vector.shape_cast %29 : vector<8xf32> to vector<1x8xf32>
    %31 = vector.broadcast %30 : vector<1x8xf32> to vector<128x8xf32>
    %32 = arith.addf %27, %31 : vector<128x8xf32>
    %c0_6 = arith.constant 0 : index
    %c0_7 = arith.constant 0 : index
    %c0_8 = arith.constant 0 : index
    %33 = vector.load %arg9[%c0_6, %c0_7, %c0_8] : memref<1x128x8xf32, #tpu.memory_space<vmem>>, vector<1x128x8xf32>
    %34 = vector.shape_cast %33 : vector<1x128x8xf32> to vector<128x8xf32>
    %35 = vector.shape_cast %32 : vector<128x8xf32> to vector<1x128x8xf32>
    tpu.vector_store %arg9[%c0_6, %c0_7, %c0_8], %35 {strides = array<i32>} : memref<1x128x8xf32, #tpu.memory_space<vmem>>, vector<1x128x8xf32>,
    return
  }
  func.func @transform_0(%arg0: i32, %arg1: i32) -> (i32, i32, i32, i32) {
    %c0_i32 = arith.constant 0 : i32
    %c0_i32_0 = arith.constant 0 : i32
    %c0_i32_1 = arith.constant 0 : i32
    %c0_i32_2 = arith.constant 0 : i32
    return %arg0, %c0_i32, %c0_i32_0, %c0_i32_1 : i32, i32, i32, i32
  }
  func.func @transform_1(%arg0: i32, %arg1: i32) -> (i32, i32, i32, i32) {
    %c0_i32 = arith.constant 0 : i32
    %c0_i32_0 = arith.constant 0 : i32
    %c0_i32_1 = arith.constant 0 : i32
    %c0_i32_2 = arith.constant 0 : i32
    return %arg0, %c0_i32, %c0_i32_0, %c0_i32_1 : i32, i32, i32, i32
  }
  func.func @transform_2(%arg0: i32, %arg1: i32) -> (i32, i32) {
    %c0_i32 = arith.constant 0 : i32
    %c0_i32_0 = arith.constant 0 : i32
    %c0_i32_1 = arith.constant 0 : i32
    return %c0_i32, %c0_i32_0 : i32, i32
  }
  func.func @transform_3(%arg0: i32, %arg1: i32) -> (i32, i32) {
    %c0_i32 = arith.constant 0 : i32
    %c0_i32_0 = arith.constant 0 : i32
    %c0_i32_1 = arith.constant 0 : i32
    return %c0_i32, %c0_i32_0 : i32, i32
  }
  func.func @transform_4(%arg0: i32, %arg1: i32) -> (i32, i32) {
    %c0_i32 = arith.constant 0 : i32
    %c0_i32_0 = arith.constant 0 : i32
    %c0_i32_1 = arith.constant 0 : i32
    return %c0_i32, %c0_i32_0 : i32, i32
  }
  func.func @transform_5(%arg0: i32, %arg1: i32) -> (i32, i32) {
    %c0_i32 = arith.constant 0 : i32
    %c0_i32_0 = arith.constant 0 : i32
    %c0_i32_1 = arith.constant 0 : i32
    return %c0_i32, %c0_i32_0 : i32, i32
  }
  func.func @transform_6(%arg0: i32, %arg1: i32) -> (i32, i32) {
    %c0_i32 = arith.constant 0 : i32
    %c0_i32_0 = arith.constant 0 : i32
    %c0_i32_1 = arith.constant 0 : i32
    return %c0_i32, %c0_i32_0 : i32, i32
  }
  func.func @transform_7(%arg0: i32, %arg1: i32) -> (i32, i32, i32) {
    %c0_i32 = arith.constant 0 : i32
    %c0_i32_0 = arith.constant 0 : i32
    return %arg0, %arg1, %c0_i32 : i32, i32, i32
  }
}

</mosaic_0001>

<bundles_post_ra>
// kernel: _lambda_.1
= control target key start
LH: loop header
LB: loop body
LE: loop exit
PB: predicated region body
PF: predicated region fallthrough
CT: control target
= control target key end

     0   :  { %s5456_s24 = smov 0   ;;  %s5458_s25 = smov 0   ;;  %s10024_s0 = inlined_call_operand.vmem [shape: f32[2,16,16,8], index: 0, kind: input, shape index: {}]   ;;  %s10025_s1 = inlined_call_operand.vmem [shape: f32[2,16,16,8], index: 1, kind: input, shape index: {}]   ;;  %s10026_s2 = inlined_call_operand.vmem [shape: f32[9,8], index: 2, kind: input, shape index: {}]   ;;  %s10027_s3 = inlined_call_operand.vmem [shape: f32[9,8], index: 3, kind: input, shape index: {}]   ;;  %s10028_s4 = inlined_call_operand.vmem [shape: f32[1,8], index: 4, kind: input, shape index: {}]   ;;  %s10029_s5 = inlined_call_operand.vmem [shape: f32[72,8], index: 5, kind: input, shape index: {}]   ;;  %s10030_s6 = inlined_call_operand.vmem [shape: f32[1,8], index: 6, kind: input, shape index: {}]   ;;  %s10031_s7 = inlined_call_operand.vmem [shape: f32[2,256,8], index: 7, kind: output, shape index: {}]  }
   0x1   :  { %s5460_s26 = smov 0   ;;  %s5462_s27 = smov 0  }
   0x2   :  { %s5464_s28 = smov 0  }
   0x3 LB: > { %s26_s29 = sadd.s32 1, %s5397_s26  ;;  %s29_s30 = sadd.s32 1, %s5401_s27  ;;  %s5405_s28 = sphi %s5464_s28, %s17_s28   ;;  %s5401_s27 = sphi %s5462_s27, %s10546_s27   ;;  %s5397_s26 = sphi %s5460_s26, %s10545_s26   ;;  %s5393_s25 = sphi %s5458_s25, %s10544_s25   ;;  %s5389_s24 = sphi %s5456_s24, %s10543_s24  }
   0x4   : > { %p27_p0 = scmp.ge.s32.totalorder %s26_s29, 2  ;;  %p5114_p1 = scmp.ge.s32.totalorder %s5405_s28, 1 }
   0x5   : > { %p261_p2 = scmp.lt.s32.totalorder %s5405_s28, 5 }
   0x6   : > { %s10548_s29 = smov (%p27_p0, %s26_s29), 0  ;;  %s10550_s30 = smov (!%p27_p0, %s29_s30), %s5401_s27 }
   0x7   : > { %p262_p3 = pnand %p5114_p1, %p261_p2  ;;  %p31_p4 = scmp.ge.s32.totalorder %s10550_s30, 2 }
   0x9   : > { %s10552_s30 = smov (%p31_p4, %s10550_s30), 0  ;;  %265 = sbr.rel (%p262_p3) target bundleno = 1296 (0x510), region = 48 }
  0x10   : > { %p302_p5 = scmp.lt.s32.totalorder %s5393_s25, 1  ;;  %s5119_s8 = sshll.u32 %s5389_s24, 4 }
  0x11   : > { %p315_p6 = scmp.lt.s32.totalorder %s5119_s8, 31  ;;  %p5122_p7 = scmp.ne.s32.totalorder %s5389_s24, 0 }
  0x12   : > { %s10554_s25 = smov (!%p302_p5, %s5393_s25), 1 }
  0x13   : > { %s10556_s8 = smov (!%p315_p6, %s5119_s8), 31  ;;  %s5163_s9 = sshll.u32 %s10554_s25, 8 }
  0x14   : > { %s5120_s10 = sshll.u32 %s10554_s25, 5  ;;  %s5492_s13 = scalar_lea.vmem %s10024_s0, %s5163_s9 }
  0x15   : > { %s5497_s16 = scalar_lea.vmem %s10025_s1, %s5163_s9  ;;  %s318_s17 = sadd.s32 %s5120_s10, %s10556_s8 }
  0x16   : > { %s5121_s18 = sshll.u32 %s318_s17, 3  ;;  %325 = sbr.rel (%p5122_p7) target bundleno = 701 (0x2bd), region = 52 }
  0x17   : > { %s5502_s21 = scalar_lea.vmem %s10031_s7, %s5121_s18 }
  0x1d   : > { %vm326_vm0 = vcmask 64512   ;;  %v5407_v0 = vmov 0.0   ;;  %vm329_vm1 = vcmask 58368   ;;  %v382_v1 = vld [vmem:[%s5492_s13] sm:$0xff]  ;;  %v383_v2 = vld [vmem:[%s5492_s13 + $0x8] sm:$0xff]  ;;  %v384_v3 = vld [vmem:[%s5492_s13 + $0x10] sm:$0xff] }
  0x1e   : > { %327 = vst.msk [vmem:[#allocation2] sm:$0xff] %vm326_vm0, %v5407_v0  ;;  %328 = vst.msk [vmem:[#allocation2 + $0x8] sm:$0xff] %vm326_vm0, %v5407_v0  ;;  %v385_v4 = vld [vmem:[%s5492_s13 + $0x18] sm:$0xff]  ;;  %v386_v5 = vld [vmem:[%s5492_s13 + $0x20] sm:$0xff]  ;;  %vm671_vm2 = vcmask 1046528   ;;  %vm917_vm3 = vcmask 1045504  }
  0x1f   : > { %331 = vst.msk [vmem:[#allocation2 + $0x18] sm:$0xff] %vm326_vm0, %v5407_v0  ;;  %332 = vst.msk [vmem:[#allocation2 + $0x20] sm:$0xff] %vm326_vm0, %v5407_v0  ;;  %v387_v6 = vld [vmem:[%s5492_s13 + $0x28] sm:$0xff]  ;;  %v388_v7 = vld [vmem:[%s5492_s13 + $0x30] sm:$0xff] }
  0x20   : > { %334 = vst.msk [vmem:[#allocation2 + $0x30] sm:$0xff] %vm326_vm0, %v5407_v0  ;;  %335 = vst.msk [vmem:[#allocation2 + $0x38] sm:$0xff] %vm326_vm0, %v5407_v0  ;;  %v389_v8 = vld [vmem:[%s5492_s13 + $0x38] sm:$0xff]  ;;  %v390_v9 = vld [vmem:[%s5492_s13 + $0x40] sm:$0xff] }
  0x21   : > { %337 = vst.msk [vmem:[#allocation2 + $0x48] sm:$0xff] %vm326_vm0, %v5407_v0  ;;  %338 = vst.msk [vmem:[#allocation2 + $0x50] sm:$0xff] %vm326_vm0, %v5407_v0  ;;  %v5739_v10 = vld [vmem:[%s10026_s2 + $0x1] ss:$0 sm:$0xff]  ;;  %v5744_v11 = vld [vmem:[%s10026_s2 + $0x2] ss:$0 sm:$0xff] }
  0x22   : > { %340 = vst.msk [vmem:[#allocation2 + $0x60] sm:$0xff] %vm326_vm0, %v5407_v0  ;;  %341 = vst.msk [vmem:[#allocation2 + $0x68] sm:$0xff] %vm326_vm0, %v5407_v0  ;;  %v391_v12 = vld [vmem:[%s5492_s13 + $0x48] sm:$0xff]  ;;  %v392_v13 = vld [vmem:[%s5492_s13 + $0x50] sm:$0xff] }
  0x23   : > { %343 = vst.msk [vmem:[#allocation2 + $0x78] sm:$0xff] %vm326_vm0, %v5407_v0  ;;  %344 = vst.msk [vmem:[#allocation2 + $0x80] sm:$0xff] %vm326_vm0, %v5407_v0  ;;  %v393_v14 = vld [vmem:[%s5492_s13 + $0x58] sm:$0xff]  ;;  %v394_v15 = vld [vmem:[%s5492_s13 + $0x60] sm:$0xff] }
  0x24   : > { %346 = vst.msk [vmem:[#allocation2 + $0x90] sm:$0xff] %vm326_vm0, %v5407_v0  ;;  %347 = vst.msk [vmem:[#allocation2 + $0x98] sm:$0xff] %vm326_vm0, %v5407_v0  ;;  %v395_v16 = vld [vmem:[%s5492_s13 + $0x68] sm:$0xff]  ;;  %v396_v17 = vld [vmem:[%s5492_s13 + $0x70] sm:$0xff] }
  0x25   : > { %349 = vst.msk [vmem:[#allocation2 + $0xa8] sm:$0xff] %vm326_vm0, %v5407_v0  ;;  %350 = vst.msk [vmem:[#allocation2 + $0xb0] sm:$0xff] %vm326_vm0, %v5407_v0  ;;  %v397_v18 = vld [vmem:[%s5492_s13 + $0x78] sm:$0xff]  ;;  %v398_v19 = vld [vmem:[%s5492_s13 + $0x80] sm:$0xff] }
  0x26   : > { %352 = vst.msk [vmem:[#allocation2 + $0xc0] sm:$0xff] %vm326_vm0, %v5407_v0  ;;  %353 = vst.msk [vmem:[#allocation2 + $0xc8] sm:$0xff] %vm326_vm0, %v5407_v0  ;;  %v399_v20 = vld [vmem:[%s5492_s13 + $0x88] sm:$0xff]  ;;  %v400_v21 = vld [vmem:[%s5492_s13 + $0x90] sm:$0xff] }
  0x27   : > { %355 = vst.msk [vmem:[#allocation2 + $0xd8] sm:$0xff] %vm326_vm0, %v5407_v0  ;;  %356 = vst.msk [vmem:[#allocation2 + $0xe0] sm:$0xff] %vm326_vm0, %v5407_v0  ;;  %v401_v22 = vld [vmem:[%s5492_s13 + $0x98] sm:$0xff]  ;;  %v402_v23 = vld [vmem:[%s5492_s13 + $0xa0] sm:$0xff] }
  0x28   : > { %358 = vst.msk [vmem:[#allocation2 + $0xf0] sm:$0xff] %vm326_vm0, %v5407_v0  ;;  %359 = vst.msk [vmem:[#allocation2 + $0xf8] sm:$0xff] %vm326_vm0, %v5407_v0  ;;  %v447_v24 = vld [vmem:[#allocation2] sm:$0xff]  ;;  %v448_v25 = vld [vmem:[#allocation2 + $0x8] sm:$0xff] }
  0x29   : > { %361 = vst.msk [vmem:[#allocation2 + $0x108] sm:$0xff] %vm326_vm0, %v5407_v0  ;;  %362 = vst.msk [vmem:[#allocation2 + $0x110] sm:$0xff] %vm326_vm0, %v5407_v0  ;;  %v575_v26 = vmul.f32 %v5739_v10, %v447_v24  ;;  %v821_v27 = vmul.f32 %v5744_v11, %v447_v24  ;;  %v5776_v28 = vmul.f32 %v5739_v10, %v448_v25  ;;  %v403_v30 = vld [vmem:[%s5492_s13 + $0xa8] sm:$0xff]  ;;  %v404_v32 = vld [vmem:[%s5492_s13 + $0xb0] sm:$0xff] }
  0x2a   : > { %364 = vst.msk [vmem:[#allocation2 + $0x120] sm:$0xff] %vm326_vm0, %v5407_v0  ;;  %365 = vst.msk [vmem:[#allocation2 + $0x128] sm:$0xff] %vm326_vm0, %v5407_v0  ;;  %v5779_v29 = vmul.f32 %v5744_v11, %v448_v25  ;;  %v405_v33 = vld [vmem:[%s5492_s13 + $0xb8] sm:$0xff]  ;;  %v406_v36 = vld [vmem:[%s5492_s13 + $0xc0] sm:$0xff] }
  0x2b   : > { %367 = vst.msk [vmem:[#allocation2 + $0x138] sm:$0xff] %vm326_vm0, %v5407_v0  ;;  %368 = vst.msk [vmem:[#allocation2 + $0x140] sm:$0xff] %vm326_vm0, %v5407_v0  ;;  %v672_v34 = vrot.slane %v575_v26, 1  ;;  %v673_v35 = vrot.slane %v5776_v28, 1  ;;  %v407_v37 = vld [vmem:[%s5492_s13 + $0xc8] sm:$0xff]  ;;  %v408_v38 = vld [vmem:[%s5492_s13 + $0xd0] sm:$0xff] }
  0x2c   : > { %370 = vst.msk [vmem:[#allocation2 + $0x150] sm:$0xff] %vm326_vm0, %v5407_v0  ;;  %371 = vst.msk [vmem:[#allocation2 + $0x158] sm:$0xff] %vm326_vm0, %v5407_v0  ;;  %v918_v39 = vrot.slane %v821_v27, 2  ;;  %v409_v40 = vld [vmem:[%s5492_s13 + $0xd8] sm:$0xff]  ;;  %v410_v41 = vld [vmem:[%s5492_s13 + $0xe0] sm:$0xff]  ;;  %v919_v43 = vrot.slane %v5779_v29, 2 }
  0x2d   : > { %373 = vst.msk [vmem:[#allocation2 + $0x168] sm:$0xff] %vm326_vm0, %v5407_v0  ;;  %374 = vst.msk [vmem:[#allocation2 + $0x170] sm:$0xff] %vm326_vm0, %v5407_v0  ;;  %v411_v42 = vld [vmem:[%s5492_s13 + $0xe8] sm:$0xff]  ;;  %v412_v44 = vld [vmem:[%s5492_s13 + $0xf0] sm:$0xff]  ;;  %v674_v50 = vsel %vm671_vm2, %v672_v34, %v673_v35 }
  0x2e   : > { %376 = vst.msk [vmem:[#allocation2 + $0x180] sm:$0xff] %vm326_vm0, %v5407_v0  ;;  %377 = vst.msk [vmem:[#allocation2 + $0x188] sm:$0xff] %vm326_vm0, %v5407_v0  ;;  %v413_v45 = vld [vmem:[%s5492_s13 + $0xf8] sm:$0xff]  ;;  %v5812_v48 = vld [vmem:[%s10026_s2] ss:$0 sm:$0xff]  ;;  %v920_v55 = vsel %vm917_vm3, %v918_v39, %v919_v43 }
  0x2f   : > { %379 = vst.msk [vmem:[#allocation2 + $0x198] sm:$0xff] %vm326_vm0, %v5407_v0  ;;  %380 = vst.msk [vmem:[#allocation2 + $0x1a0] sm:$0xff] %vm326_vm0, %v5407_v0  ;;  %v5822_v52 = vld [vmem:[%s10026_s2 + $0x3] ss:$0 sm:$0xff]  ;;  %v506_v53 = vmul.f32 %v5812_v48, %v447_v24  ;;  %v5832_v56 = vld [vmem:[%s10026_s2 + $0x4] ss:$0 sm:$0xff] }
  0x30   : > { %4014 = vst.msk [vmem:[#allocation3] sm:$0xff] %vm326_vm0, %v5407_v0  ;;  %4015 = vst.msk [vmem:[#allocation3 + $0x8] sm:$0xff] %vm326_vm0, %v5407_v0  ;;  %v5837_v57 = vld [vmem:[%s10026_s2 + $0x5] ss:$0 sm:$0xff]  ;;  %v2187_v29 = vld [vmem:[%s5497_s16 + $0x38] sm:$0xff] }
  0x31   : > { %4017 = vst.msk [vmem:[#allocation3 + $0x18] sm:$0xff] %vm326_vm0, %v5407_v0  ;;  %4018 = vst.msk [vmem:[#allocation3 + $0x20] sm:$0xff] %vm326_vm0, %v5407_v0  ;;  %v2180_v58 = vld [vmem:[%s5497_s16] sm:$0xff] }
  0x32   : > { %4020 = vst.msk [vmem:[#allocation3 + $0x30] sm:$0xff] %vm326_vm0, %v5407_v0  ;;  %4021 = vst.msk [vmem:[#allocation3 + $0x38] sm:$0xff] %vm326_vm0, %v5407_v0  ;;  %v2184_v27 = vld [vmem:[%s5497_s16 + $0x20] sm:$0xff] }
  0x33   : > { %4023 = vst.msk [vmem:[#allocation3 + $0x48] sm:$0xff] %vm326_vm0, %v5407_v0  ;;  %4024 = vst.msk [vmem:[#allocation3 + $0x50] sm:$0xff] %vm326_vm0, %v5407_v0 }
  0x34   : > { %4026 = vst.msk [vmem:[#allocation3 + $0x60] sm:$0xff] %vm326_vm0, %v5407_v0  ;;  %4027 = vst.msk [vmem:[#allocation3 + $0x68] sm:$0xff] %vm326_vm0, %v5407_v0 }
  0x35   : > { %4029 = vst.msk [vmem:[#allocation3 + $0x78] sm:$0xff] %vm326_vm0, %v5407_v0  ;;  %4030 = vst.msk [vmem:[#allocation3 + $0x80] sm:$0xff] %vm326_vm0, %v5407_v0 }
  0x36   : > { %4032 = vst.msk [vmem:[#allocation3 + $0x90] sm:$0xff] %vm326_vm0, %v5407_v0  ;;  %4033 = vst.msk [vmem:[#allocation3 + $0x98] sm:$0xff] %vm326_vm0, %v5407_v0 }
  0x37   : > { %4035 = vst.msk [vmem:[#allocation3 + $0xa8] sm:$0xff] %vm326_vm0, %v5407_v0  ;;  %4036 = vst.msk [vmem:[#allocation3 + $0xb0] sm:$0xff] %vm326_vm0, %v5407_v0 }
  0x38   : > { %4038 = vst.msk [vmem:[#allocation3 + $0xc0] sm:$0xff] %vm326_vm0, %v5407_v0  ;;  %4039 = vst.msk [vmem:[#allocation3 + $0xc8] sm:$0xff] %vm326_vm0, %v5407_v0 }
  0x39   : > { %4041 = vst.msk [vmem:[#allocation3 + $0xd8] sm:$0xff] %vm326_vm0, %v5407_v0  ;;  %4042 = vst.msk [vmem:[#allocation3 + $0xe0] sm:$0xff] %vm326_vm0, %v5407_v0 }
  0x3a   : > { %4044 = vst.msk [vmem:[#allocation3 + $0xf0] sm:$0xff] %vm326_vm0, %v5407_v0  ;;  %4045 = vst.msk [vmem:[#allocation3 + $0xf8] sm:$0xff] %vm326_vm0, %v5407_v0 }
  0x3b   : > { %4047 = vst.msk [vmem:[#allocation3 + $0x108] sm:$0xff] %vm326_vm0, %v5407_v0  ;;  %4048 = vst.msk [vmem:[#allocation3 + $0x110] sm:$0xff] %vm326_vm0, %v5407_v0 }
  0x3c   : > { %4050 = vst.msk [vmem:[#allocation3 + $0x120] sm:$0xff] %vm326_vm0, %v5407_v0  ;;  %4051 = vst.msk [vmem:[#allocation3 + $0x128] sm:$0xff] %vm326_vm0, %v5407_v0 }
  0x3d   : > { %4053 = vst.msk [vmem:[#allocation3 + $0x138] sm:$0xff] %vm326_vm0, %v5407_v0  ;;  %4054 = vst.msk [vmem:[#allocation3 + $0x140] sm:$0xff] %vm326_vm0, %v5407_v0 }
  0x3e   : > { %4056 = vst.msk [vmem:[#allocation3 + $0x150] sm:$0xff] %vm326_vm0, %v5407_v0  ;;  %4057 = vst.msk [vmem:[#allocation3 + $0x158] sm:$0xff] %vm326_vm0, %v5407_v0 }
  0x3f   : > { %4059 = vst.msk [vmem:[#allocation3 + $0x168] sm:$0xff] %vm326_vm0, %v5407_v0  ;;  %4060 = vst.msk [vmem:[#allocation3 + $0x170] sm:$0xff] %vm326_vm0, %v5407_v0 }
  0x40   : > { %4062 = vst.msk [vmem:[#allocation3 + $0x180] sm:$0xff] %vm326_vm0, %v5407_v0  ;;  %4063 = vst.msk [vmem:[#allocation3 + $0x188] sm:$0xff] %vm326_vm0, %v5407_v0 }
  0x41   : > { %4065 = vst.msk [vmem:[#allocation3 + $0x198] sm:$0xff] %vm326_vm0, %v5407_v0  ;;  %4066 = vst.msk [vmem:[#allocation3 + $0x1a0] sm:$0xff] %vm326_vm0, %v5407_v0 }
  0x42   : > { %330 = vst.msk [vmem:[#allocation2 + $0x10] sm:$0x3] %vm329_vm1, %v5407_v0  ;;  %333 = vst.msk [vmem:[#allocation2 + $0x28] sm:$0x3] %vm329_vm1, %v5407_v0 }
  0x43   : > { %336 = vst.msk [vmem:[#allocation2 + $0x40] sm:$0x3] %vm329_vm1, %v5407_v0  ;;  %339 = vst.msk [vmem:[#allocation2 + $0x58] sm:$0x3] %vm329_vm1, %v5407_v0 }
  0x44   : > { %342 = vst.msk [vmem:[#allocation2 + $0x70] sm:$0x3] %vm329_vm1, %v5407_v0  ;;  %345 = vst.msk [vmem:[#allocation2 + $0x88] sm:$0x3] %vm329_vm1, %v5407_v0 }
  0x45   : > { %348 = vst.msk [vmem:[#allocation2 + $0xa0] sm:$0x3] %vm329_vm1, %v5407_v0  ;;  %351 = vst.msk [vmem:[#allocation2 + $0xb8] sm:$0x3] %vm329_vm1, %v5407_v0 }
  0x46   : > { %354 = vst.msk [vmem:[#allocation2 + $0xd0] sm:$0x3] %vm329_vm1, %v5407_v0  ;;  %357 = vst.msk [vmem:[#allocation2 + $0xe8] sm:$0x3] %vm329_vm1, %v5407_v0 }
  0x47   : > { %360 = vst.msk [vmem:[#allocation2 + $0x100] sm:$0x3] %vm329_vm1, %v5407_v0  ;;  %363 = vst.msk [vmem:[#allocation2 + $0x118] sm:$0x3] %vm329_vm1, %v5407_v0 }
  0x48   : > { %366 = vst.msk [vmem:[#allocation2 + $0x130] sm:$0x3] %vm329_vm1, %v5407_v0  ;;  %369 = vst.msk [vmem:[#allocation2 + $0x148] sm:$0x3] %vm329_vm1, %v5407_v0 }
  0x49   : > { %372 = vst.msk [vmem:[#allocation2 + $0x160] sm:$0x3] %vm329_vm1, %v5407_v0  ;;  %375 = vst.msk [vmem:[#allocation2 + $0x178] sm:$0x3] %vm329_vm1, %v5407_v0  ;;  %v449_v63 = vld [vmem:[#allocation2 + $0x10] sm:$0x3] }
  0x4a   : > { %378 = vst.msk [vmem:[#allocation2 + $0x190] sm:$0x3] %vm329_vm1, %v5407_v0  ;;  %381 = vst.msk [vmem:[#allocation2 + $0x1a8] sm:$0x3] %vm329_vm1, %v5407_v0 }
  0x4b   : > { %4016 = vst.msk [vmem:[#allocation3 + $0x10] sm:$0x3] %vm329_vm1, %v5407_v0  ;;  %4019 = vst.msk [vmem:[#allocation3 + $0x28] sm:$0x3] %vm329_vm1, %v5407_v0 }
  0x4c   : > { %4022 = vst.msk [vmem:[#allocation3 + $0x40] sm:$0x3] %vm329_vm1, %v5407_v0  ;;  %4025 = vst.msk [vmem:[#allocation3 + $0x58] sm:$0x3] %vm329_vm1, %v5407_v0 }
  0x4d   : > { %4028 = vst.msk [vmem:[#allocation3 + $0x70] sm:$0x3] %vm329_vm1, %v5407_v0  ;;  %4031 = vst.msk [vmem:[#allocation3 + $0x88] sm:$0x3] %vm329_vm1, %v5407_v0 }
  0x4e   : > { %4034 = vst.msk [vmem:[#allocation3 + $0xa0] sm:$0x3] %vm329_vm1, %v5407_v0  ;;  %4037 = vst.msk [vmem:[#allocation3 + $0xb8] sm:$0x3] %vm329_vm1, %v5407_v0 }
  0x4f   : > { %4040 = vst.msk [vmem:[#allocation3 + $0xd0] sm:$0x3] %vm329_vm1, %v5407_v0  ;;  %4043 = vst.msk [vmem:[#allocation3 + $0xe8] sm:$0x3] %vm329_vm1, %v5407_v0 }
  0x50   : > { %4046 = vst.msk [vmem:[#allocation3 + $0x100] sm:$0x3] %vm329_vm1, %v5407_v0  ;;  %4049 = vst.msk [vmem:[#allocation3 + $0x118] sm:$0x3] %vm329_vm1, %v5407_v0 }
  0x51   : > { %4052 = vst.msk [vmem:[#allocation3 + $0x130] sm:$0x3] %vm329_vm1, %v5407_v0  ;;  %4055 = vst.msk [vmem:[#allocation3 + $0x148] sm:$0x3] %vm329_vm1, %v5407_v0 }
  0x52   : > { %4058 = vst.msk [vmem:[#allocation3 + $0x160] sm:$0x3] %vm329_vm1, %v5407_v0  ;;  %4061 = vst.msk [vmem:[#allocation3 + $0x178] sm:$0x3] %vm329_vm1, %v5407_v0 }
  0x53   : > { %4064 = vst.msk [vmem:[#allocation3 + $0x190] sm:$0x3] %vm329_vm1, %v5407_v0  ;;  %4067 = vst.msk [vmem:[#allocation3 + $0x1a8] sm:$0x3] %vm329_vm1, %v5407_v0 }
  0x54   : > { %415 = vst.msk [vmem:[#allocation2 + $0x19] sm:$0xff] %vm326_vm0, %v382_v1  ;;  %417 = vst.msk [vmem:[#allocation2 + $0x31] sm:$0xff] %vm326_vm0, %v384_v3  ;;  %v507_v1 = vmul.f32 %v5812_v48, %v448_v25  ;;  %v784_v3 = vadd.f32 %v674_v50, %v506_v53 }
  0x55   : > { %416 = vst.msk [vmem:[#allocation2 + $0x21] sm:$0xff] %vm326_vm0, %v383_v2  ;;  %418 = vst.msk [vmem:[#allocation2 + $0x39] sm:$0xff] %vm326_vm0, %v385_v4  ;;  %v577_v4 = vmul.f32 %v5739_v10, %v449_v63 }
  0x56   : > { %419 = vst.msk [vmem:[#allocation2 + $0x49] sm:$0xff] %vm326_vm0, %v386_v5  ;;  %420 = vst.msk [vmem:[#allocation2 + $0x51] sm:$0xff] %vm326_vm0, %v387_v6  ;;  %v2181_v6 = vld [vmem:[%s5497_s16 + $0x8] sm:$0xff] }
  0x57   : > { %421 = vst.msk [vmem:[#allocation2 + $0x61] sm:$0xff] %vm326_vm0, %v388_v7  ;;  %422 = vst.msk [vmem:[#allocation2 + $0x69] sm:$0xff] %vm326_vm0, %v389_v8 }
  0x58   : > { %423 = vst.msk [vmem:[#allocation2 + $0x79] sm:$0xff] %vm326_vm0, %v390_v9  ;;  %424 = vst.msk [vmem:[#allocation2 + $0x81] sm:$0xff] %vm326_vm0, %v391_v12 }
  0x59   : > { %425 = vst.msk [vmem:[#allocation2 + $0x91] sm:$0xff] %vm326_vm0, %v392_v13  ;;  %426 = vst.msk [vmem:[#allocation2 + $0x99] sm:$0xff] %vm326_vm0, %v393_v14  ;;  %v823_v13 = vmul.f32 %v5744_v11, %v449_v63  ;;  %v2182_v14 = vld [vmem:[%s5497_s16 + $0x10] sm:$0xff]  ;;  %v2188_v63 = vld [vmem:[%s5497_s16 + $0x40] sm:$0xff] }
  0x5a   : > { %427 = vst.msk [vmem:[#allocation2 + $0xa9] sm:$0xff] %vm326_vm0, %v394_v15  ;;  %428 = vst.msk [vmem:[#allocation2 + $0xb1] sm:$0xff] %vm326_vm0, %v395_v16  ;;  %v2183_v16 = vld [vmem:[%s5497_s16 + $0x18] sm:$0xff] }
  0x5b   : > { %429 = vst.msk [vmem:[#allocation2 + $0xc1] sm:$0xff] %vm326_vm0, %v396_v17  ;;  %430 = vst.msk [vmem:[#allocation2 + $0xc9] sm:$0xff] %vm326_vm0, %v397_v18  ;;  %v450_v46 = vld [vmem:[#allocation2 + $0x18] sm:$0xff]  ;;  %v5861_v7 = vld [vmem:[#allocation2 + $0x30] sm:$0xff]  ;;  %v675_v18 = vrot.slane %v577_v4, 1  ;;  %v921_v24 = vrot.slane %v823_v13, 2 }
  0x5c   : > { %431 = vst.msk [vmem:[#allocation2 + $0xd9] sm:$0xff] %vm326_vm0, %v398_v19  ;;  %432 = vst.msk [vmem:[#allocation2 + $0xe1] sm:$0xff] %vm326_vm0, %v399_v20  ;;  %v5782_v31 = vld [vmem:[#allocation2 + $0x38] sm:$0xff]  ;;  %v5807_v47 = vld [vmem:[#allocation2 + $0x20] sm:$0xff]  ;;  %v578_v49 = vmul.f32 %v5739_v10, %v450_v46  ;;  %v824_v51 = vmul.f32 %v5744_v11, %v450_v46  ;;  %v508_v54 = vmul.f32 %v5812_v48, %v450_v46 }
  0x5d   : > { %433 = vst.msk [vmem:[#allocation2 + $0xf1] sm:$0xff] %vm326_vm0, %v400_v21  ;;  %434 = vst.msk [vmem:[#allocation2 + $0xf9] sm:$0xff] %vm326_vm0, %v401_v22  ;;  %v5842_v59 = vmul.f32 %v5739_v10, %v5782_v31  ;;  %v5845_v60 = vmul.f32 %v5822_v52, %v450_v46  ;;  %v5848_v61 = vmul.f32 %v5832_v56, %v450_v46  ;;  %v5854_v0 = vld [vmem:[#allocation2 + $0x28] sm:$0x3]  ;;  %v5870_v15 = vld [vmem:[#allocation2 + $0x40] sm:$0x3] }
  0x5e   : > { %435 = vst.msk [vmem:[#allocation2 + $0x109] sm:$0xff] %vm326_vm0, %v402_v23  ;;  %10173 = vst [vmem:[#allocation4_spill] sm:$0xff] %v5782_v31  ;;  %v5851_v62 = vmul.f32 %v5837_v57, %v450_v46  ;;  %v677_v2 = vrot.slane %v578_v49, 1  ;;  %v579_v5 = vmul.f32 %v5739_v10, %v5807_v47  ;;  %v923_v8 = vrot.slane %v824_v51, 2  ;;  %v5881_v25 = vld [vmem:[#allocation2 + $0x48] sm:$0xff]  ;;  %v5883_v26 = vld [vmem:[#allocation2 + $0x50] sm:$0xff] }
  0x5f   : > { %436 = vst.msk [vmem:[#allocation2 + $0x111] sm:$0xff] %vm326_vm0, %v403_v30  ;;  %437 = vst.msk [vmem:[#allocation2 + $0x121] sm:$0xff] %vm326_vm0, %v404_v32  ;;  %v509_v9 = vmul.f32 %v5812_v48, %v5807_v47  ;;  %v580_v12 = vmul.f32 %v5739_v10, %v5854_v0  ;;  %v1232_v17 = vrot.slane %v5848_v61, 1  ;;  %v825_v20 = vmul.f32 %v5744_v11, %v5807_v47  ;;  %v5913_v51 = vld [vmem:[#allocation2 + $0x80] sm:$0xff] }
  0x60   : > { %438 = vst.msk [vmem:[#allocation2 + $0x129] sm:$0xff] %vm326_vm0, %v405_v33  ;;  %439 = vst.msk [vmem:[#allocation2 + $0x139] sm:$0xff] %vm326_vm0, %v406_v36  ;;  %v678_v19 = vrot.slane %v579_v5, 1  ;;  %v1477_v21 = vrot.slane %v5851_v62, 2  ;;  %v826_v23 = vmul.f32 %v5744_v11, %v5854_v0  ;;  %v1030_v30 = vadd.f32 %v920_v55, %v784_v3  ;;  %v5891_v36 = vld [vmem:[#allocation2 + $0x58] sm:$0x3] }
  0x61   : > { %440 = vst.msk [vmem:[#allocation2 + $0x141] sm:$0xff] %vm326_vm0, %v407_v37  ;;  %441 = vst.msk [vmem:[#allocation2 + $0x151] sm:$0xff] %vm326_vm0, %v408_v38  ;;  %v680_v22 = vrot.slane %v580_v12, 1  ;;  %v676_v32 = vsel %vm671_vm2, %v673_v35, %v675_v18  ;;  %v924_v34 = vrot.slane %v825_v20, 2  ;;  %v2185_v37 = vld [vmem:[%s5497_s16 + $0x28] sm:$0xff]  ;;  %v5894_v38 = vld [vmem:[#allocation2 + $0x60] sm:$0xff]  ;;  %v922_v28 = vsel %vm917_vm3, %v919_v43, %v921_v24 }
  0x62   : > { %442 = vst.msk [vmem:[#allocation2 + $0x159] sm:$0xff] %vm326_vm0, %v409_v40  ;;  %443 = vst.msk [vmem:[#allocation2 + $0x169] sm:$0xff] %vm326_vm0, %v410_v41  ;;  %v679_v33 = vsel %vm671_vm2, %v677_v2, %v678_v19  ;;  %v785_v40 = vadd.f32 %v676_v32, %v507_v1  ;;  %v5901_v35 = vld [vmem:[#allocation2 + $0x68] sm:$0xff]  ;;  %v926_v49 = vrot.slane %v826_v23, 2  ;;  %v1068_v50 = vmul.f32 %v5822_v52, %v5807_v47  ;;  %v5911_v43 = vld [vmem:[#allocation2 + $0x78] sm:$0xff] }
  0x63   : > { %444 = vst.msk [vmem:[#allocation2 + $0x171] sm:$0xff] %vm326_vm0, %v411_v42  ;;  %445 = vst.msk [vmem:[#allocation2 + $0x181] sm:$0xff] %vm326_vm0, %v412_v44  ;;  %v681_v39 = vsel %vm671_vm2, %v678_v19, %v680_v22  ;;  %v786_v41 = vadd.f32 %v679_v33, %v508_v54  ;;  %v2186_v42 = vld [vmem:[%s5497_s16 + $0x30] sm:$0xff]  ;;  %v925_v46 = vsel %vm917_vm3, %v923_v8, %v924_v34  ;;  %v5923_v1 = vld [vmem:[#allocation2 + $0x88] sm:$0x3]  ;;  %v683_v19 = vrot.slane %v5842_v59, 1 }
  0x64   : > { %446 = vst.msk [vmem:[#allocation2 + $0x189] sm:$0xff] %vm326_vm0, %v413_v45  ;;  %2212 = vst.msk [vmem:[#allocation2 + $0x19] sm:$0xff] %vm326_vm0, %v2180_v58  ;;  %v5904_v44 = vld [vmem:[#allocation2 + $0x70] sm:$0x3]  ;;  %v787_v45 = vadd.f32 %v681_v39, %v509_v9  ;;  %v1031_v53 = vadd.f32 %v922_v28, %v785_v40  ;;  %v1137_v55 = vmul.f32 %v5832_v56, %v5807_v47  ;;  %v2189_v2 = vld [vmem:[%s5497_s16 + $0x48] sm:$0xff] }
  0x65   : > { %10174 = vst [vmem:[#allocation5_spill] sm:$0xff] %v5861_v7  ;;  %2213 = vst.msk [vmem:[#allocation2 + $0x21] sm:$0xff] %vm326_vm0, %v2181_v6  ;;  %v5915_v54 = vadd.f32 %v925_v46, %v786_v41  ;;  %v1138_v58 = vmul.f32 %v5832_v56, %v5854_v0  ;;  %v1099_v3 = vadd.f32 %v5845_v60, %v1030_v30  ;;  %v5934_v8 = vld [vmem:[#allocation2 + $0x90] sm:$0xff]  ;;  %v5936_v9 = vld [vmem:[#allocation2 + $0x98] sm:$0xff] }
  0x66   : > { %2214 = vst.msk [vmem:[#allocation2 + $0x31] sm:$0xff] %vm326_vm0, %v2182_v14  ;;  %2215 = vst.msk [vmem:[#allocation2 + $0x39] sm:$0xff] %vm326_vm0, %v2183_v16  ;;  %v927_v4 = vsel %vm917_vm3, %v924_v34, %v926_v49  ;;  %v1382_v5 = vmul.f32 %v5837_v57, %v5807_v47  ;;  %v1383_v6 = vmul.f32 %v5837_v57, %v5854_v0  ;;  %v2190_v12 = vld [vmem:[%s5497_s16 + $0x50] sm:$0xff]  ;;  %v1233_v14 = vrot.slane %v1137_v55, 1  ;;  %v5940_v47 = vld [vmem:[#allocation2 + $0xa0] sm:$0x3] }
  0x67   : > { %10175 = vst [vmem:[#allocation6_spill] sm:$0xff] %v5881_v25  ;;  %10176 = vst [vmem:[#allocation7_spill] sm:$0xff] %v5883_v26  ;;  %v1033_v13 = vadd.f32 %v927_v4, %v787_v45  ;;  %v1100_v60 = vadd.f32 %v1068_v50, %v1031_v53  ;;  %v1235_v16 = vrot.slane %v1138_v58, 1  ;;  %v5945_v20 = vmul.f32 %v5744_v11, %v5782_v31  ;;  %v2191_v22 = vld [vmem:[%s5497_s16 + $0x58] sm:$0xff]  ;;  %v5948_v23 = vld [vmem:[#allocation2 + $0xa8] sm:$0xff] }
  0x68   : > { %2216 = vst.msk [vmem:[#allocation2 + $0x49] sm:$0xff] %vm326_vm0, %v2184_v27  ;;  %10177 = vst [vmem:[#allocation8_spill] sm:$0xff] %v5894_v38  ;;  %v1478_v0 = vrot.slane %v1382_v5, 2  ;;  %v1480_v18 = vrot.slane %v1383_v6, 2  ;;  %v5950_v24 = vld [vmem:[#allocation2 + $0xb0] sm:$0xff]  ;;  %v1070_v27 = vmul.f32 %v5822_v52, %v5782_v31  ;;  %v1234_v30 = vsel %vm671_vm2, %v1232_v17, %v1233_v14  ;;  %v2192_v33 = vld [vmem:[%s5497_s16 + $0x60] sm:$0xff] }
  0x69   : > { %2217 = vst.msk [vmem:[#allocation2 + $0x51] sm:$0xff] %vm326_vm0, %v2185_v37  ;;  %10178 = vst [vmem:[#allocation9_spill] sm:$0xff] %v5901_v35  ;;  %v1236_v32 = vsel %vm671_vm2, %v1233_v14, %v1235_v16  ;;  %v581_v59 = vmul.f32 %v5739_v10, %v5861_v7  ;;  %v5962_v34 = vld [vmem:[#allocation2 + $0xb8] sm:$0x3]  ;;  %v1344_v37 = vadd.f32 %v1234_v30, %v1099_v3  ;;  %v2193_v17 = vld [vmem:[%s5497_s16 + $0x68] sm:$0xff]  ;;  %v929_v5 = vrot.slane %v5945_v20, 2 }
  0x6a   : > { %2218 = vst.msk [vmem:[#allocation2 + $0x61] sm:$0xff] %vm326_vm0, %v2186_v42  ;;  %10179 = vst [vmem:[#allocation10_spill] sm:$0xff] %v5911_v43  ;;  %v1345_v39 = vadd.f32 %v1236_v32, %v1100_v60  ;;  %v1479_v40 = vsel %vm917_vm3, %v1477_v21, %v1478_v0  ;;  %v1481_v61 = vsel %vm917_vm3, %v1478_v0, %v1480_v18  ;;  %v5970_v41 = vld [vmem:[#allocation2 + $0xc0] sm:$0xff]  ;;  %v5979_v21 = vld [vmem:[#allocation2 + $0xc8] sm:$0xff] }
  0x6b   : > { %10180 = vst [vmem:[#allocation11_spill] sm:$0xff] %v5913_v51  ;;  %10181 = vst [vmem:[#allocation12_spill] sm:$0xff] %v5915_v54  ;;  %v583_v28 = vmul.f32 %v5739_v10, %v5870_v15  ;;  %v682_v42 = vrot.slane %v581_v59, 1  ;;  %v827_v45 = vmul.f32 %v5744_v11, %v5861_v7  ;;  %v829_v62 = vmul.f32 %v5744_v11, %v5870_v15  ;;  %v2194_v46 = vld [vmem:[%s5497_s16 + $0x70] sm:$0xff]  ;;  %v2195_v58 = vld [vmem:[%s5497_s16 + $0x78] sm:$0xff] }
  0x6c   : > { %2219 = vst.msk [vmem:[#allocation2 + $0x69] sm:$0xff] %vm326_vm0, %v2187_v29  ;;  %2220 = vst.msk [vmem:[#allocation2 + $0x79] sm:$0xff] %vm326_vm0, %v2188_v63  ;;  %v5982_v49 = vadd.f32 %v1479_v40, %v1344_v37  ;;  %v1590_v50 = vadd.f32 %v1481_v61, %v1345_v39  ;;  %v5986_v29 = vmul.f32 %v5832_v56, %v5782_v31  ;;  %v5991_v55 = vld [vmem:[#allocation2 + $0xd0] sm:$0x3]  ;;  %v6000_v6 = vld [vmem:[#allocation2 + $0xd8] sm:$0xff] }
  0x6d   : > { %2221 = vst.msk [vmem:[#allocation2 + $0x81] sm:$0xff] %vm326_vm0, %v2189_v2  ;;  %10182 = vst [vmem:[#allocation13_spill] sm:$0xff] %v5934_v8  ;;  %v1141_v53 = vmul.f32 %v5832_v56, %v5870_v15  ;;  %v1102_v63 = vadd.f32 %v1070_v27, %v1033_v13  ;;  %v5129_v2 = vld [vmem:[%s10026_s2 + $0x6] ss:$0 sm:$0xff]  ;;  %v684_v3 = vsel %vm671_vm2, %v682_v42, %v683_v19  ;;  %v685_v4 = vrot.slane %v583_v28, 1  ;;  %v2197_v59 = vld [vmem:[%s5497_s16 + $0x88] sm:$0xff] }
  0x6e   : > { %10183 = vst [vmem:[#allocation14_spill] sm:$0xff] %v5936_v9  ;;  %2222 = vst.msk [vmem:[#allocation2 + $0x91] sm:$0xff] %vm326_vm0, %v2190_v12  ;;  %v510_v12 = vmul.f32 %v5812_v48, %v5861_v7  ;;  %v511_v13 = vmul.f32 %v5812_v48, %v5782_v31  ;;  %v10032_v60 = vrot.slane %v5986_v29, 1  ;;  %v6010_v16 = vld [vmem:[%s10026_s2 + $0x7] ss:$0 sm:$0xff]  ;;  %v931_v27 = vrot.slane %v829_v62, 2 }
  0x6f   : > { %10184 = vst [vmem:[#allocation15_spill] sm:$0xff] %v5948_v23  ;;  %10185 = vst [vmem:[#allocation16_spill] sm:$0xff] %v5950_v24  ;;  %v1240_v14 = vrot.slane %v1141_v53, 1  ;;  %v6012_v0 = vld [vmem:[#allocation2 + $0xe0] sm:$0xff]  ;;  %v686_v20 = vsel %vm671_vm2, %v683_v19, %v685_v4  ;;  %v6018_v30 = vmul.f32 %v5837_v57, %v5782_v31  ;;  %v6021_v32 = vld [vmem:[#allocation2 + $0xe8] sm:$0x3]  ;;  %v1386_v61 = vmul.f32 %v5837_v57, %v5870_v15 }
  0x70   : > { %2223 = vst.msk [vmem:[#allocation2 + $0x99] sm:$0xff] %vm326_vm0, %v2191_v22  ;;  %2224 = vst.msk [vmem:[#allocation2 + $0xa9] sm:$0xff] %vm326_vm0, %v2192_v33  ;;  %v2196_v18 = vld [vmem:[%s5497_s16 + $0x80] sm:$0xff]  ;;  %v928_v22 = vrot.slane %v827_v45, 2  ;;  %v6024_v33 = vld [vmem:[#allocation2 + $0xf0] sm:$0xff]  ;;  %v788_v39 = vadd.f32 %v684_v3, %v510_v12  ;;  %v789_v40 = vadd.f32 %v686_v20, %v511_v13  ;;  %v1627_v45 = vmul.f32 %v5129_v2, %v5782_v31 }
  0x71   : > { %10186 = vst [vmem:[#allocation17_spill] sm:$0xff] %v5970_v41  ;;  %2225 = vst.msk [vmem:[#allocation2 + $0xb1] sm:$0xff] %vm326_vm0, %v2193_v17  ;;  %v498_v37 = vld [vmem:[#allocation2 + $0x198] sm:$0xff]  ;;  %v1241_v19 = vsel %vm671_vm2, %v10032_v60, %v1240_v14  ;;  %v2198_v28 = vld [vmem:[%s5497_s16 + $0x90] sm:$0xff]  ;;  %v6039_v53 = vmul.f32 %v6010_v16, %v5782_v31  ;;  %v1485_v12 = vrot.slane %v1386_v61, 2  ;;  %v6047_v13 = vmul.f32 %v6010_v16, %v5870_v15 }
  0x72   : > { %10187 = vst [vmem:[#allocation18_spill] sm:$0xff] %v5979_v21  ;;  %10188 = vst [vmem:[#allocation19_spill] sm:$0xff] %v5982_v49  ;;  %v6032_v17 = vld [vmem:[#allocation2 + $0xf8] sm:$0xff]  ;;  %v499_v42 = vld [vmem:[#allocation2 + $0x1a0] sm:$0xff]  ;;  %v1347_v62 = vadd.f32 %v1241_v19, %v1102_v63  ;;  %v6054_v14 = vadd.f32 %v1627_v45, %v1590_v50  ;;  %v932_v20 = vsel %vm917_vm3, %v929_v5, %v931_v27 }
  0x73   : > { %10189 = vst [vmem:[#allocation20_spill] sm:$0xff] %v5986_v29  ;;  %2226 = vst.msk [vmem:[#allocation2 + $0xc1] sm:$0xff] %vm326_vm0, %v2194_v46  ;;  %v10033_v46 = vrot.slane %v6018_v30, 2  ;;  %v2199_v3 = vld [vmem:[%s5497_s16 + $0x98] sm:$0xff]  ;;  %v500_v4 = vld [vmem:[#allocation2 + $0x1a8] sm:$0x3]  ;;  %v6081_v60 = vmul.f32 %v6010_v16, %v499_v42  ;;  %v584_v42 = vmul.f32 %v5739_v10, %v5881_v25 }
  0x74   : > { %2227 = vst.msk [vmem:[#allocation2 + $0xc9] sm:$0xff] %vm326_vm0, %v2195_v58  ;;  %10190 = vst [vmem:[#allocation21_spill] sm:$0xff] %v6000_v6  ;;  %v6042_v58 = vld [vmem:[#allocation2 + $0x100] sm:$0x3]  ;;  %v6050_v63 = vld [vmem:[#allocation2 + $0x108] sm:$0xff] }
  0x75   : > { %10191 = vst [vmem:[#allocation22_spill] sm:$0xff] %v6012_v0  ;;  %10192 = vst [vmem:[#allocation23_spill] sm:$0xff] %v6018_v30  ;;  %v6052_v2 = vld [vmem:[#allocation2 + $0x110] sm:$0xff]  ;;  %v2200_v19 = vld [vmem:[%s5497_s16 + $0xa0] sm:$0xff]  ;;  %v1486_v50 = vsel %vm917_vm3, %v10033_v46, %v1485_v12  ;;  %v832_v46 = vmul.f32 %v5744_v11, %v5891_v36  ;;  %v6121_v30 = vmul.f32 %v5832_v56, %v5883_v26 }
  0x76   : > { %2228 = vst.msk [vmem:[#allocation2 + $0xd9] sm:$0xff] %vm326_vm0, %v2196_v18  ;;  %10193 = vst [vmem:[#allocation24_spill] sm:$0xff] %v6024_v33  ;;  %v930_v18 = vsel %vm917_vm3, %v928_v22, %v929_v5  ;;  %v6064_v61 = vld [vmem:[#allocation2 + $0x118] sm:$0x3]  ;;  %v6072_v22 = vmul.f32 %v6010_v16, %v498_v37  ;;  %v2201_v5 = vld [vmem:[%s5497_s16 + $0xa8] sm:$0xff]  ;;  %v6078_v45 = vadd.f32 %v1486_v50, %v1347_v62 }
  0x77   : > { %2229 = vst.msk [vmem:[#allocation2 + $0xe1] sm:$0xff] %vm326_vm0, %v2197_v59  ;;  %10194 = vst [vmem:[#allocation25_spill] sm:$0xff] %v6032_v17  ;;  %v6061_v59 = vld [vmem:[%s10026_s2 + $0x8] ss:$0 sm:$0xff]  ;;  %v6076_v27 = vld [vmem:[#allocation2 + $0x120] sm:$0xff] }
  0x78   : > { %10195 = vst [vmem:[#allocation26_spill] sm:$0xff] %v6039_v53  ;;  %2230 = vst.msk [vmem:[#allocation2 + $0xf1] sm:$0xff] %vm326_vm0, %v2198_v28  ;;  %v6066_v28 = vadd.f32 %v930_v18, %v788_v39  ;;  %v6084_v39 = vmul.f32 %v6010_v16, %v500_v4  ;;  %v6088_v37 = vld [vmem:[#allocation2 + $0x128] sm:$0xff]  ;;  %v2202_v12 = vld [vmem:[%s5497_s16 + $0xb0] sm:$0xff]  ;;  %v6096_v62 = vmul.f32 %v6061_v59, %v5870_v15 }
  0x79   : > { %2231 = vst.msk [vmem:[#allocation2 + $0xf9] sm:$0xff] %vm326_vm0, %v2199_v3  ;;  %10196 = vst [vmem:[#allocation27_spill] sm:$0xff] %v6050_v63  ;;  %v1035_v3 = vadd.f32 %v932_v20, %v789_v40  ;;  %v6091_v18 = vld [vmem:[#allocation2 + $0x130] sm:$0x3]  ;;  %v1794_v20 = vrot.slane %v6047_v13, 1  ;;  %v585_v4 = vmul.f32 %v5739_v10, %v5883_v26  ;;  %v6104_v50 = vld [vmem:[#allocation2 + $0x138] sm:$0xff]  ;;  %v830_v13 = vmul.f32 %v5744_v11, %v5881_v25 }
  0x7a   : > { %10197 = vst [vmem:[#allocation28_spill] sm:$0xff] %v6052_v2  ;;  %10198 = vst [vmem:[#allocation29_spill] sm:$0xff] %v6054_v14  ;;  %v831_v15 = vmul.f32 %v5744_v11, %v5883_v26  ;;  %v6115_v40 = vld [vmem:[#allocation2 + $0x140] sm:$0xff]  ;;  %v6124_v29 = vld [vmem:[#allocation2 + $0x148] sm:$0x3] }
  0x7b   : > { %10199 = vst [vmem:[#allocation30_spill] sm:$0xff] %v6066_v28  ;;  %10200 = vst [vmem:[#allocation31_spill] sm:$0xff] %v6072_v22  ;;  %v687_v28 = vrot.slane %v584_v42, 1  ;;  %v2205_v54 = vld [vmem:[%s5497_s16 + $0xc8] sm:$0xff]  ;;  %v933_v31 = vrot.slane %v830_v13, 2  ;;  %v1072_v42 = vmul.f32 %v5822_v52, %v5883_v26  ;;  %v1144_v22 = vmul.f32 %v5832_v56, %v5891_v36 }
  0x7c   : > { %2232 = vst.msk [vmem:[#allocation2 + $0x109] sm:$0xff] %vm326_vm0, %v2200_v19  ;;  %10201 = vst [vmem:[#allocation32_spill] sm:$0xff] %v6076_v27  ;;  %v2203_v19 = vld [vmem:[%s5497_s16 + $0xb8] sm:$0xff]  ;;  %v6142_v13 = vld [vmem:[#allocation2 + $0x160] sm:$0x3] }
  0x7d   : > { %10202 = vst [vmem:[#allocation33_spill] sm:$0xff] %v6078_v45  ;;  %10203 = vst [vmem:[#allocation34_spill] sm:$0xff] %v6081_v60  ;;  %v688_v45 = vrot.slane %v585_v4, 1  ;;  %v6132_v4 = vld [vmem:[#allocation2 + $0x150] sm:$0xff]  ;;  %v1245_v49 = vrot.slane %v1144_v22, 1  ;;  %v6180_v22 = vld [vmem:[#allocation2 + $0x180] sm:$0xff] }
  0x7e   : > { %10204 = vst [vmem:[#allocation35_spill] sm:$0xff] %v6084_v39  ;;  %2233 = vst.msk [vmem:[#allocation2 + $0x111] sm:$0xff] %vm326_vm0, %v2201_v5  ;;  %v586_v5 = vmul.f32 %v5739_v10, %v5891_v36  ;;  %v513_v39 = vmul.f32 %v5812_v48, %v5883_v26  ;;  %v6182_v60 = vld [vmem:[#allocation2 + $0x188] sm:$0xff] }
  0x7f   : > { %10205 = vst [vmem:[#allocation36_spill] sm:$0xff] %v6088_v37  ;;  %10206 = vst [vmem:[#allocation37_spill] sm:$0xff] %v6096_v62  ;;  %v689_v7 = vsel %vm671_vm2, %v687_v28, %v688_v45  ;;  %v10217_v28 = vrot.slane %v6039_v53, 1 }
  0x80   : > { %2234 = vst.msk [vmem:[#allocation2 + $0x121] sm:$0xff] %vm326_vm0, %v2202_v12  ;;  %10207 = vst [vmem:[#allocation38_spill] sm:$0xff] %v6104_v50  ;;  %v2204_v12 = vld [vmem:[%s5497_s16 + $0xc0] sm:$0xff]  ;;  %v690_v14 = vrot.slane %v586_v5, 1  ;;  %v2206_v5 = vld [vmem:[%s5497_s16 + $0xd0] sm:$0xff] }
  0x81   : > { %2235 = vst.msk [vmem:[#allocation2 + $0x129] sm:$0xff] %vm326_vm0, %v2203_v19  ;;  %10208 = vst [vmem:[#allocation39_spill] sm:$0xff] %v6115_v40  ;;  %v512_v19 = vmul.f32 %v5812_v48, %v5881_v25  ;;  %v6139_v25 = vld [vmem:[#allocation2 + $0x158] sm:$0xff]  ;;  %v6148_v40 = vld [vmem:[#allocation2 + $0x168] sm:$0xff] }
  0x82   : > { %10209 = vst [vmem:[#allocation40_spill] sm:$0xff] %v6121_v30  ;;  %2236 = vst.msk [vmem:[#allocation2 + $0x139] sm:$0xff] %vm326_vm0, %v2204_v12  ;;  %v934_v12 = vrot.slane %v831_v15, 2  ;;  %v2207_v15 = vld [vmem:[%s5497_s16 + $0xd8] sm:$0xff] }
  0x83   : > { %10210 = vst [vmem:[#allocation41_spill] sm:$0xff] %v6124_v29  ;;  %2237 = vst.msk [vmem:[#allocation2 + $0x141] sm:$0xff] %vm326_vm0, %v2205_v54  ;;  %v691_v54 = vsel %vm671_vm2, %v688_v45, %v690_v14  ;;  %v1104_v29 = vadd.f32 %v1072_v42, %v1035_v3  ;;  %v6157_v14 = vld [vmem:[#allocation2 + $0x170] sm:$0xff]  ;;  %v6163_v3 = vsel %vm671_vm2, %v10217_v28, %v1794_v20  ;;  %v6172_v42 = vld [vmem:[#allocation2 + $0x178] sm:$0x3] }
  0x84   : > { %10211 = vst [vmem:[#allocation42_spill] sm:$0xff] %v6132_v4  ;;  %10212 = vst [vmem:[#allocation43_spill] sm:$0xff] %v6139_v25  ;;  %v936_v4 = vrot.slane %v832_v46, 2  ;;  %v791_v50 = vadd.f32 %v691_v54, %v513_v39  ;;  %v6152_v25 = vmul.f32 %v5837_v57, %v5883_v26  ;;  %v2208_v46 = vld [vmem:[%s5497_s16 + $0xe0] sm:$0xff]  ;;  %v6169_v39 = vmul.f32 %v6010_v16, %v5883_v26 }
  0x85   : > { %10213 = vst [vmem:[#allocation44_spill] sm:$0xff] %v6142_v13  ;;  %2238 = vst.msk [vmem:[#allocation2 + $0x151] sm:$0xff] %vm326_vm0, %v2206_v5  ;;  %v1389_v13 = vmul.f32 %v5837_v57, %v5891_v36  ;;  %v2209_v5 = vld [vmem:[%s5497_s16 + $0xe8] sm:$0xff]  ;;  %v790_v54 = vadd.f32 %v689_v7, %v512_v19  ;;  %v935_v26 = vsel %vm917_vm3, %v933_v31, %v934_v12  ;;  %v2210_v19 = vld [vmem:[%s5497_s16 + $0xf0] sm:$0xff] }
  0x86   : > { %10214 = vst [vmem:[#allocation45_spill] sm:$0xff] %v6148_v40  ;;  %10215 = vst [vmem:[#allocation46_spill] sm:$0xff] %v6152_v25  ;;  %v10054_v28 = vrot.slane %v6152_v25, 2  ;;  %v1700_v7 = vmul.f32 %v6010_v16, %v5891_v36  ;;  %v6225_v25 = vld [vmem:[#allocation2 + $0x190] sm:$0x3] }
  0x87   : > { %2239 = vst.msk [vmem:[#allocation2 + $0x159] sm:$0xff] %vm326_vm0, %v2207_v15  ;;  %10216 = vst [vmem:[#allocation47_spill] sm:$0xff] %v6157_v14  ;;  %v10219_v15 = vrot.slane %v6121_v30, 1  ;;  %v1490_v45 = vrot.slane %v1389_v13, 2  ;;  %v6194_v13 = vmul.f32 %v6061_v59, %v5891_v36  ;;  %v833_v36 = vmul.f32 %v5744_v11, %v5894_v38 }
  0x88   : > { %10218 = vst [vmem:[#allocation48_spill] sm:$0xff] %v6163_v3  ;;  %2240 = vst.msk [vmem:[#allocation2 + $0x169] sm:$0xff] %vm326_vm0, %v2208_v46  ;;  %v937_v46 = vsel %vm917_vm3, %v934_v12, %v936_v4  ;;  %v589_v4 = vmul.f32 %v5739_v10, %v5904_v44  ;;  %v514_v3 = vmul.f32 %v5812_v48, %v5894_v38 }
  0x89   : > { %v1246_v20 = vsel %vm671_vm2, %v10219_v15, %v1245_v49  ;;  %2241 = vst.msk [vmem:[#allocation2 + $0x171] sm:$0xff] %vm326_vm0, %v2209_v5  ;;  %10220 = vst [vmem:[#allocation49_spill] sm:$0xff] %v6180_v22  ;;  %v1037_v30 = vadd.f32 %v937_v46, %v791_v50  ;;  %v1491_v49 = vsel %vm917_vm3, %v10054_v28, %v1490_v45  ;;  %v938_v53 = vrot.slane %v833_v36, 2 }
  0x8a   : > { %10221 = vst [vmem:[#allocation50_spill] sm:$0xff] %v6182_v60  ;;  %v1349_v62 = vadd.f32 %v1246_v20, %v1104_v29  ;;  %v587_v5 = vmul.f32 %v5739_v10, %v5894_v38  ;;  %2242 = vst.msk [vmem:[#allocation2 + $0x181] sm:$0xff] %vm326_vm0, %v2210_v19  ;;  %v588_v50 = vmul.f32 %v5739_v10, %v5901_v35  ;;  %v695_v46 = vrot.slane %v589_v4, 1 }
  0x8b   : > { %v834_v45 = vmul.f32 %v5744_v11, %v5901_v35  ;;  %v835_v15 = vmul.f32 %v5744_v11, %v5904_v44  ;;  %v6214_v19 = vmul.f32 %v5832_v56, %v5901_v35  ;;  %v1074_v28 = vmul.f32 %v5822_v52, %v5901_v35 }
  0x8c   : > { %v6199_v31 = vadd.f32 %v1491_v49, %v1349_v62  ;;  %v692_v12 = vrot.slane %v587_v5, 1  ;;  %v1799_v62 = vrot.slane %v1700_v7, 1  ;;  %v693_v20 = vrot.slane %v588_v50, 1 }
  0x8d   : > { %10223 = vst [vmem:[#allocation52_spill] sm:$0xff] %v6214_v19  ;;  %v515_v49 = vmul.f32 %v5812_v48, %v5901_v35  ;;  %v939_v5 = vrot.slane %v834_v45, 2  ;;  %v1147_v29 = vmul.f32 %v5832_v56, %v5904_v44  ;;  %v941_v50 = vrot.slane %v835_v15, 2  ;;  %v2211_v15 = vld [vmem:[%s5497_s16 + $0xf8] sm:$0xff] }
  0x8e   : > { %10222 = vst [vmem:[#allocation51_spill] sm:$0xff] %v6199_v31  ;;  %v694_v31 = vsel %vm671_vm2, %v692_v12, %v693_v20  ;;  %v696_v7 = vsel %vm671_vm2, %v693_v20, %v695_v46  ;;  %v10062_v4 = vrot.slane %v6214_v19, 1  ;;  %v1106_v60 = vadd.f32 %v1074_v28, %v1037_v30  ;;  %2243 = vst.msk [vmem:[#allocation2 + $0x189] sm:$0xff] %vm326_vm0, %v2211_v15 }
  0x8f   : > { %v793_v45 = vadd.f32 %v696_v7, %v515_v49  ;;  %v6229_v22 = vadd.f32 %v935_v26, %v790_v54  ;;  %v1250_v40 = vrot.slane %v1147_v29, 1  ;;  %v6233_v14 = vmul.f32 %v5837_v57, %v5901_v35 }
  0x90   : > { %v1392_v12 = vmul.f32 %v5837_v57, %v5904_v44  ;;  %v10226_v20 = vrot.slane %v6169_v39, 1  ;;  %v792_v36 = vadd.f32 %v694_v31, %v514_v3  ;;  %v6246_v26 = vmul.f32 %v6010_v16, %v5901_v35 }
  0x91   : > { %10224 = vst [vmem:[#allocation53_spill] sm:$0xff] %v6229_v22  ;;  %10225 = vst [vmem:[#allocation54_spill] sm:$0xff] %v6233_v14  ;;  %v942_v30 = vsel %vm917_vm3, %v939_v5, %v941_v50  ;;  %v1251_v54 = vsel %vm671_vm2, %v10062_v4, %v1250_v40  ;;  %v10061_v28 = vrot.slane %v6233_v14, 2  ;;  %v1703_v3 = vmul.f32 %v6010_v16, %v5904_v44 }
  0x92   : > { %v6241_v46 = vsel %vm671_vm2, %v10226_v20, %v1799_v62  ;;  %v1495_v29 = vrot.slane %v1392_v12, 2  ;;  %v940_v62 = vsel %vm917_vm3, %v938_v53, %v939_v5  ;;  %v1039_v7 = vadd.f32 %v942_v30, %v793_v45 }
  0x93   : > { %v1351_v20 = vadd.f32 %v1251_v54, %v1106_v60  ;;  %v6262_v50 = vmul.f32 %v6061_v59, %v5904_v44  ;;  %v590_v40 = vmul.f32 %v5739_v10, %v5911_v43  ;;  %v591_v12 = vmul.f32 %v5739_v10, %v5913_v51 }
  0x94   : > { %v1496_v31 = vsel %vm917_vm3, %v10061_v28, %v1495_v29  ;;  %v592_v5 = vmul.f32 %v5739_v10, %v5923_v1  ;;  %v836_v45 = vmul.f32 %v5744_v11, %v5911_v43  ;;  %v837_v44 = vmul.f32 %v5744_v11, %v5913_v51 }
  0x95   : > { %v6268_v53 = vadd.f32 %v1496_v31, %v1351_v20  ;;  %v697_v15 = vrot.slane %v590_v40, 1  ;;  %v698_v30 = vrot.slane %v591_v12, 1  ;;  %v838_v54 = vmul.f32 %v5744_v11, %v5923_v1 }
  0x96   : > { %v1804_v29 = vrot.slane %v1703_v3, 1  ;;  %v700_v28 = vrot.slane %v592_v5, 1  ;;  %v1076_v20 = vmul.f32 %v5822_v52, %v5913_v51  ;;  %v6283_v31 = vmul.f32 %v5832_v56, %v5913_v51 }
  0x97   : > { %10227 = vst [vmem:[#allocation55_spill] sm:$0xff] %v6268_v53  ;;  %v517_v4 = vmul.f32 %v5812_v48, %v5913_v51  ;;  %v699_v40 = vsel %vm671_vm2, %v697_v15, %v698_v30  ;;  %v944_v12 = vrot.slane %v837_v44, 2  ;;  %v1150_v49 = vmul.f32 %v5832_v56, %v5923_v1 }
  0x98   : > { %10228 = vst [vmem:[#allocation56_spill] sm:$0xff] %v6283_v31  ;;  %v701_v60 = vsel %vm671_vm2, %v698_v30, %v700_v28  ;;  %v946_v3 = vrot.slane %v838_v54, 2  ;;  %v1108_v5 = vadd.f32 %v1076_v20, %v1039_v7  ;;  %v10070_v53 = vrot.slane %v6283_v31, 1 }
  0x99   : > { %v516_v14 = vmul.f32 %v5812_v48, %v5911_v43  ;;  %v795_v19 = vadd.f32 %v701_v60, %v517_v4  ;;  %v943_v22 = vrot.slane %v836_v45, 2  ;;  %v1255_v35 = vrot.slane %v1150_v49, 1 }
  0x9a   : > { %v6294_v38 = vadd.f32 %v940_v62, %v792_v36  ;;  %v6299_v44 = vmul.f32 %v5837_v57, %v5913_v51  ;;  %v1395_v28 = vmul.f32 %v5837_v57, %v5923_v1  ;;  %v10231_v7 = vrot.slane %v6246_v26, 1 }
  0x9b   : > { %v794_v54 = vadd.f32 %v699_v40, %v516_v14  ;;  %v1256_v4 = vsel %vm671_vm2, %v10070_v53, %v1255_v35  ;;  %v6313_v49 = vmul.f32 %v6010_v16, %v5913_v51  ;;  %v947_v36 = vsel %vm917_vm3, %v944_v12, %v946_v3 }
  0x9c   : > { %10229 = vst [vmem:[#allocation57_spill] sm:$0xff] %v6294_v38  ;;  %10230 = vst [vmem:[#allocation58_spill] sm:$0xff] %v6299_v44  ;;  %v6306_v30 = vsel %vm671_vm2, %v10231_v7, %v1804_v29  ;;  %v1353_v62 = vadd.f32 %v1256_v4, %v1108_v5  ;;  %v10069_v60 = vrot.slane %v6299_v44, 2  ;;  %v1500_v45 = vrot.slane %v1395_v28, 2 }
  0x9d   : > { %v945_v20 = vsel %vm917_vm3, %v943_v22, %v944_v12  ;;  %v1041_v15 = vadd.f32 %v947_v36, %v795_v19  ;;  %v1706_v14 = vmul.f32 %v6010_v16, %v5923_v1  ;;  %v6322_v29 = vmul.f32 %v6061_v59, %v5923_v1 }
  0x9e   : > { %v1501_v35 = vsel %vm917_vm3, %v10069_v60, %v1500_v45  ;;  %v593_v40 = vmul.f32 %v5739_v10, %v5934_v8  ;;  %v594_v3 = vmul.f32 %v5739_v10, %v5936_v9  ;;  %v595_v22 = vmul.f32 %v5739_v10, %v5940_v47 }
  0x9f   : > { %10232 = vst [vmem:[#allocation59_spill] sm:$0xff] %v6322_v29  ;;  %v6333_v19 = vadd.f32 %v1501_v35, %v1353_v62  ;;  %v839_v1 = vmul.f32 %v5744_v11, %v5934_v8  ;;  %v840_v5 = vmul.f32 %v5744_v11, %v5936_v9  ;;  %v841_v36 = vmul.f32 %v5744_v11, %v5940_v47 }
  0xa0   : > { %v702_v28 = vrot.slane %v593_v40, 1  ;;  %v703_v7 = vrot.slane %v594_v3, 1  ;;  %v705_v4 = vrot.slane %v595_v22, 1  ;;  %v1809_v45 = vrot.slane %v1706_v14, 1 }
  0xa1   : > { %10233 = vst [vmem:[#allocation60_spill] sm:$0xff] %v6333_v19  ;;  %v518_v60 = vmul.f32 %v5812_v48, %v5934_v8  ;;  %v1078_v62 = vmul.f32 %v5822_v52, %v5936_v9  ;;  %v6348_v35 = vmul.f32 %v5832_v56, %v5936_v9  ;;  %v519_v53 = vmul.f32 %v5812_v48, %v5936_v9 }
  0xa2   : > { %v706_v40 = vsel %vm671_vm2, %v703_v7, %v705_v4  ;;  %v948_v3 = vrot.slane %v839_v1, 2  ;;  %v1153_v22 = vmul.f32 %v5832_v56, %v5940_v47  ;;  %v704_v14 = vsel %vm671_vm2, %v702_v28, %v703_v7 }
  0xa3   : > { %10234 = vst [vmem:[#allocation61_spill] sm:$0xff] %v6348_v35  ;;  %v949_v12 = vrot.slane %v840_v5, 2  ;;  %v951_v19 = vrot.slane %v841_v36, 2  ;;  %v1110_v44 = vadd.f32 %v1078_v62, %v1041_v15  ;;  %v797_v31 = vadd.f32 %v706_v40, %v519_v53 }
  0xa4   : > { %v10080_v8 = vrot.slane %v6348_v35, 1  ;;  %v1260_v38 = vrot.slane %v1153_v22, 1  ;;  %v6359_v51 = vmul.f32 %v5837_v57, %v5936_v9  ;;  %v6361_v43 = vadd.f32 %v945_v20, %v794_v54 }
  0xa5   : > { %v10237_v1 = vrot.slane %v6313_v49, 1  ;;  %v1398_v15 = vmul.f32 %v5837_v57, %v5940_v47  ;;  %v796_v53 = vadd.f32 %v704_v14, %v518_v60  ;;  %v6377_v54 = vmul.f32 %v6010_v16, %v5936_v9 }
  0xa6   : > { %10235 = vst [vmem:[#allocation62_spill] sm:$0xff] %v6359_v51  ;;  %10236 = vst [vmem:[#allocation63_spill] sm:$0xff] %v6361_v43  ;;  %v1261_v5 = vsel %vm671_vm2, %v10080_v8, %v1260_v38  ;;  %v10079_v7 = vrot.slane %v6359_v51, 2  ;;  %v950_v20 = vsel %vm917_vm3, %v948_v3, %v949_v12  ;;  %v952_v36 = vsel %vm917_vm3, %v949_v12, %v951_v19 }
  0xa7   : > { %v6366_v4 = vsel %vm671_vm2, %v10237_v1, %v1809_v45  ;;  %v1355_v45 = vadd.f32 %v1261_v5, %v1110_v44  ;;  %v1505_v62 = vrot.slane %v1398_v15, 2  ;;  %v1043_v40 = vadd.f32 %v952_v36, %v797_v31 }
  0xa8   : > { %10238 = vst [vmem:[#allocation64_spill] sm:$0xff] %v6366_v4  ;;  %v1709_v60 = vmul.f32 %v6010_v16, %v5940_v47  ;;  %v6385_v22 = vmul.f32 %v6061_v59, %v5940_v47  ;;  %v596_v38 = vmul.f32 %v5739_v10, %v5948_v23  ;;  %v597_v19 = vmul.f32 %v5739_v10, %v5950_v24 }
  0xa9   : > { %v1506_v14 = vsel %vm917_vm3, %v10079_v7, %v1505_v62  ;;  %v598_v31 = vmul.f32 %v5739_v10, %v5962_v34  ;;  %v842_v44 = vmul.f32 %v5744_v11, %v5948_v23  ;;  %v843_v1 = vmul.f32 %v5744_v11, %v5950_v24 }
  0xaa   : > { %10239 = vst [vmem:[#allocation65_spill] sm:$0xff] %v6385_v22  ;;  %v6398_v12 = vadd.f32 %v1506_v14, %v1355_v45  ;;  %v707_v3 = vrot.slane %v596_v38, 1  ;;  %v520_v15 = vmul.f32 %v5812_v48, %v5948_v23  ;;  %v708_v5 = vrot.slane %v597_v19, 1 }
  0xab   : > { %v710_v36 = vrot.slane %v598_v31, 1  ;;  %v844_v62 = vmul.f32 %v5744_v11, %v5962_v34  ;;  %v1814_v7 = vrot.slane %v1709_v60, 1  ;;  %v1080_v8 = vmul.f32 %v5822_v52, %v5950_v24 }
  0xac   : > { %10240 = vst [vmem:[#allocation66_spill] sm:$0xff] %v6398_v12  ;;  %v6411_v45 = vmul.f32 %v5832_v56, %v5950_v24  ;;  %v1156_v38 = vmul.f32 %v5832_v56, %v5962_v34  ;;  %v521_v14 = vmul.f32 %v5812_v48, %v5950_v24  ;;  %v953_v31 = vrot.slane %v842_v44, 2 }
  0xad   : > { %v711_v19 = vsel %vm671_vm2, %v708_v5, %v710_v36  ;;  %v6420_v28 = vmul.f32 %v5837_v57, %v5950_v24  ;;  %v709_v60 = vsel %vm671_vm2, %v707_v3, %v708_v5  ;;  %v954_v47 = vrot.slane %v843_v1, 2 }
  0xae   : > { %10241 = vst [vmem:[#allocation67_spill] sm:$0xff] %v6411_v45  ;;  %v956_v12 = vrot.slane %v844_v62, 2  ;;  %v1112_v51 = vadd.f32 %v1080_v8, %v1043_v40  ;;  %v799_v35 = vadd.f32 %v711_v19, %v521_v14  ;;  %v10089_v23 = vrot.slane %v6411_v45, 1 }
  0xaf   : > { %10242 = vst [vmem:[#allocation68_spill] sm:$0xff] %v6420_v28  ;;  %v1265_v43 = vrot.slane %v1156_v38, 1  ;;  %v1401_v9 = vmul.f32 %v5837_v57, %v5962_v34  ;;  %v6426_v29 = vadd.f32 %v950_v20, %v796_v53  ;;  %v10244_v44 = vrot.slane %v6377_v54, 1 }
  0xb0   : > { %v10088_v3 = vrot.slane %v6420_v28, 2  ;;  %v798_v1 = vadd.f32 %v709_v60, %v520_v15  ;;  %v6440_v5 = vmul.f32 %v6010_v16, %v5950_v24  ;;  %v955_v53 = vsel %vm917_vm3, %v953_v31, %v954_v47  ;;  %v6469_v31 = vld [vmem:[%s10026_s2 + $0x2] ss:$0 sm:$0xff] }
  0xb1   : > { %10243 = vst [vmem:[#allocation69_spill] sm:$0xff] %v6426_v29  ;;  %v6431_v36 = vsel %vm671_vm2, %v10244_v44, %v1814_v7  ;;  %v1266_v8 = vsel %vm671_vm2, %v10089_v23, %v1265_v43  ;;  %v1510_v40 = vrot.slane %v1401_v9, 2  ;;  %v957_v20 = vsel %vm917_vm3, %v954_v47, %v956_v12 }
  0xb2   : > { %10245 = vst [vmem:[#allocation70_spill] sm:$0xff] %v6440_v5  ;;  %v1357_v7 = vadd.f32 %v1266_v8, %v1112_v51  ;;  %v1712_v62 = vmul.f32 %v6010_v16, %v5962_v34  ;;  %v1045_v38 = vadd.f32 %v957_v20, %v799_v35  ;;  %v6451_v43 = vmul.f32 %v6061_v59, %v5962_v34 }
  0xb3   : > { %v1511_v15 = vsel %vm917_vm3, %v10088_v3, %v1510_v40  ;;  %v599_v9 = vmul.f32 %v5739_v10, %v5970_v41  ;;  %v600_v51 = vmul.f32 %v5739_v10, %v5979_v21  ;;  %v601_v12 = vmul.f32 %v5739_v10, %v5991_v55 }
  0xb4   : > { %10246 = vst [vmem:[#allocation71_spill] sm:$0xff] %v6451_v43  ;;  %v6455_v14 = vadd.f32 %v1511_v15, %v1357_v7  ;;  %v845_v35 = vmul.f32 %v5744_v11, %v5970_v41  ;;  %v846_v34 = vmul.f32 %v5744_v11, %v5979_v21  ;;  %v847_v60 = vmul.f32 %v6469_v31, %v5991_v55 }
  0xb5   : > { %v712_v19 = vrot.slane %v599_v9, 1  ;;  %v1819_v44 = vrot.slane %v1712_v62, 1  ;;  %v523_v10 = vmul.f32 %v5812_v48, %v5979_v21  ;;  %v713_v8 = vrot.slane %v600_v51, 1 }
  0xb6   : > { %10247 = vst [vmem:[#allocation72_spill] sm:$0xff] %v6455_v14  ;;  %v715_v40 = vrot.slane %v601_v12, 1  ;;  %v958_v20 = vrot.slane %v845_v35, 2  ;;  %v1082_v7 = vmul.f32 %v5822_v52, %v5979_v21  ;;  %v6479_v11 = vmul.f32 %v5832_v56, %v5979_v21 }
  0xb7   : > { %v1159_v15 = vmul.f32 %v5832_v56, %v5991_v55  ;;  %v959_v3 = vrot.slane %v846_v34, 2  ;;  %v961_v62 = vrot.slane %v847_v60, 2  ;;  %v6486_v23 = vmul.f32 %v5837_v57, %v5979_v21 }
  0xb8   : > { %10248 = vst [vmem:[#allocation73_spill] sm:$0xff] %v6479_v11  ;;  %v716_v9 = vsel %vm671_vm2, %v713_v8, %v715_v40  ;;  %v6488_v51 = vadd.f32 %v955_v53, %v798_v1  ;;  %v522_v12 = vmul.f32 %v5812_v48, %v5970_v41  ;;  %v714_v35 = vsel %vm671_vm2, %v712_v19, %v713_v8 }
  0xb9   : > { %10249 = vst [vmem:[#allocation74_spill] sm:$0xff] %v6486_v23  ;;  %v801_v4 = vadd.f32 %v716_v9, %v523_v10  ;;  %v1114_v47 = vadd.f32 %v1082_v7, %v1045_v38  ;;  %v10091_v14 = vrot.slane %v6479_v11, 1  ;;  %v1270_v28 = vrot.slane %v1159_v15, 1 }
  0xba   : > { %10250 = vst [vmem:[#allocation75_spill] sm:$0xff] %v6488_v51  ;;  %v1404_v34 = vmul.f32 %v5837_v57, %v5991_v55  ;;  %v10251_v60 = vrot.slane %v6440_v5, 1  ;;  %v6504_v53 = vmul.f32 %v6010_v16, %v5979_v21  ;;  %v1715_v38 = vmul.f32 %v6010_v16, %v5991_v55 }
  0xbb   : > { %v800_v19 = vadd.f32 %v714_v35, %v522_v12  ;;  %v960_v10 = vsel %vm917_vm3, %v958_v20, %v959_v3  ;;  %v962_v8 = vsel %vm917_vm3, %v959_v3, %v961_v62  ;;  %v524_v12 = vmul.f32 %v5812_v48, %v6000_v6  ;;  %v6523_v3 = vld [vmem:[%s10026_s2 + $0x1] ss:$0 sm:$0xff] }
  0xbc   : > { %v6499_v40 = vsel %vm671_vm2, %v10251_v60, %v1819_v44  ;;  %10253 = vst [vmem:[#allocation77_spill] sm:$0xff] %v6504_v53  ;;  %v1047_v15 = vadd.f32 %v962_v8, %v801_v4  ;;  %v1271_v44 = vsel %vm671_vm2, %v10091_v14, %v1270_v28  ;;  %v1515_v9 = vrot.slane %v1404_v34, 2 }
  0xbd   : > { %10252 = vst [vmem:[#allocation76_spill] sm:$0xff] %v6499_v40  ;;  %v6516_v60 = vmul.f32 %v6061_v59, %v5991_v55  ;;  %v1359_v1 = vadd.f32 %v1271_v44, %v1114_v47  ;;  %v602_v4 = vmul.f32 %v6523_v3, %v6000_v6  ;;  %v603_v28 = vmul.f32 %v6523_v3, %v6012_v0  ;;  %v10349_v40 = vld [vmem:[#allocation6_spill] sm:$0xff] }
  0xbe   : > { %v1824_v62 = vrot.slane %v1715_v38, 1  ;;  %v604_v55 = vmul.f32 %v6523_v3, %v6021_v32  ;;  %v848_v47 = vmul.f32 %v6469_v31, %v6000_v6  ;;  %v849_v8 = vmul.f32 %v6469_v31, %v6012_v0 }
  0xbf   : > { %10254 = vst [vmem:[#allocation78_spill] sm:$0xff] %v6516_v60  ;;  %v717_v35 = vrot.slane %v602_v4, 1  ;;  %v718_v34 = vrot.slane %v603_v28, 1  ;;  %v850_v44 = vmul.f32 %v6469_v31, %v6021_v32  ;;  %v525_v14 = vmul.f32 %v5812_v48, %v6012_v0 }
  0xc0   : > { %v720_v7 = vrot.slane %v604_v55, 1  ;;  %v963_v20 = vrot.slane %v848_v47, 2  ;;  %v6542_v38 = vmul.f32 %v5832_v56, %v6012_v0  ;;  %v964_v6 = vrot.slane %v849_v8, 2 }
  0xc1   : > { %v719_v11 = vsel %vm671_vm2, %v717_v35, %v718_v34  ;;  %v1084_v4 = vmul.f32 %v5822_v52, %v6012_v0  ;;  %v1162_v28 = vmul.f32 %v5832_v56, %v6021_v32  ;;  %v966_v21 = vrot.slane %v850_v44, 2 }
  0xc2   : > { %10255 = vst [vmem:[#allocation79_spill] sm:$0xff] %v6542_v38  ;;  %v721_v51 = vsel %vm671_vm2, %v718_v34, %v720_v7  ;;  %v802_v45 = vadd.f32 %v719_v11, %v524_v12  ;;  %v10100_v48 = vrot.slane %v6542_v38, 1  ;;  %v6551_v55 = vadd.f32 %v960_v10, %v800_v19 }
  0xc3   : > { %v803_v47 = vadd.f32 %v721_v51, %v525_v14  ;;  %v1116_v41 = vadd.f32 %v1084_v4, %v1047_v15  ;;  %v1275_v29 = vrot.slane %v1162_v28, 1  ;;  %v10257_v35 = vrot.slane %v6486_v23, 2 }
  0xc4   : > { %10256 = vst [vmem:[#allocation80_spill] sm:$0xff] %v6551_v55  ;;  %v6559_v56 = vmul.f32 %v5837_v57, %v6012_v0  ;;  %v1407_v11 = vmul.f32 %v5837_v57, %v6021_v32  ;;  %v965_v19 = vsel %vm917_vm3, %v963_v20, %v964_v6  ;;  %v6568_v14 = vmul.f32 %v6010_v16, %v6012_v0  ;;  %v6637_v55 = vld [vmem:[%s10026_s2 + $0x5] ss:$0 sm:$0xff]  ;;  %v10345_v0 = vld [vmem:[#allocation37_spill] sm:$0xff] }
  0xc5   : > { %v1516_v8 = vsel %vm917_vm3, %v10257_v35, %v1515_v9  ;;  %v1718_v51 = vmul.f32 %v6010_v16, %v6021_v32  ;;  %v10261_v10 = vrot.slane %v6504_v53, 1  ;;  %v967_v9 = vsel %vm917_vm3, %v964_v6, %v966_v21  ;;  %v7218_v53 = vld [vmem:[#allocation2 + $0x28] sm:$0x3] }
  0xc6   : > { %10258 = vst [vmem:[#allocation81_spill] sm:$0xff] %v6559_v56  ;;  %v6563_v7 = vadd.f32 %v1516_v8, %v1359_v1  ;;  %10260 = vst [vmem:[#allocation83_spill] sm:$0xff] %v6568_v14  ;;  %v6578_v12 = vadd.f32 %v965_v19, %v802_v45  ;;  %v1276_v57 = vsel %vm671_vm2, %v10100_v48, %v1275_v29  ;;  %v10105_v34 = vrot.slane %v6559_v56, 2 }
  0xc7   : > { %v6575_v15 = vsel %vm671_vm2, %v10261_v10, %v1824_v62  ;;  %v1049_v1 = vadd.f32 %v967_v9, %v803_v47  ;;  %v1361_v20 = vadd.f32 %v1276_v57, %v1116_v41  ;;  %v6586_v44 = vmul.f32 %v6061_v59, %v6021_v32  ;;  %v6613_v9 = vld [vmem:[%s10026_s2 + $0x4] ss:$0 sm:$0xff] }
  0xc8   : > { %10259 = vst [vmem:[#allocation82_spill] sm:$0xff] %v6563_v7  ;;  %10262 = vst [vmem:[#allocation84_spill] sm:$0xff] %v6575_v15  ;;  %v1520_v4 = vrot.slane %v1407_v11, 2  ;;  %v605_v62 = vmul.f32 %v6523_v3, %v6024_v33  ;;  %v606_v21 = vmul.f32 %v6523_v3, %v6032_v17  ;;  %v607_v6 = vmul.f32 %v6523_v3, %v6042_v58  ;;  %v6604_v11 = vld [vmem:[%s10026_s2] ss:$0 sm:$0xff] }
  0xc9   : > { %10263 = vst [vmem:[#allocation85_spill] sm:$0xff] %v6578_v12  ;;  %10264 = vst [vmem:[#allocation86_spill] sm:$0xff] %v6586_v44  ;;  %v1829_v45 = vrot.slane %v1718_v51, 1  ;;  %v851_v41 = vmul.f32 %v6469_v31, %v6024_v33  ;;  %v852_v32 = vmul.f32 %v6469_v31, %v6032_v17  ;;  %v853_v8 = vmul.f32 %v6469_v31, %v6042_v58 }
  0xca   : > { %v722_v28 = vrot.slane %v605_v62, 1  ;;  %v723_v47 = vrot.slane %v606_v21, 1  ;;  %v725_v35 = vrot.slane %v607_v6, 1  ;;  %v526_v19 = vmul.f32 %v6604_v11, %v6024_v33  ;;  %v6623_v6 = vld [vmem:[%s10026_s2 + $0x3] ss:$0 sm:$0xff] }
  0xcb   : > { %v527_v51 = vmul.f32 %v6604_v11, %v6032_v17  ;;  %v969_v10 = vrot.slane %v852_v32, 2  ;;  %v6617_v57 = vmul.f32 %v6613_v9, %v6032_v17  ;;  %v971_v21 = vrot.slane %v853_v8, 2 }
  0xcc   : > { %v726_v62 = vsel %vm671_vm2, %v723_v47, %v725_v35  ;;  %v1086_v32 = vmul.f32 %v6623_v6, %v6032_v17  ;;  %v1165_v48 = vmul.f32 %v6613_v9, %v6042_v58  ;;  %v1521_v52 = vsel %vm917_vm3, %v10105_v34, %v1520_v4 }
  0xcd   : > { %10265 = vst [vmem:[#allocation87_spill] sm:$0xff] %v6617_v57  ;;  %v724_v29 = vsel %vm671_vm2, %v722_v28, %v723_v47  ;;  %v805_v12 = vadd.f32 %v726_v62, %v527_v51  ;;  %v968_v35 = vrot.slane %v851_v41, 2  ;;  %v10106_v38 = vrot.slane %v6617_v57, 1 }
  0xce   : > { %v1118_v8 = vadd.f32 %v1086_v32, %v1049_v1  ;;  %v1280_v33 = vrot.slane %v1165_v48, 1  ;;  %v6641_v7 = vmul.f32 %v6637_v55, %v6032_v17  ;;  %v6643_v56 = vadd.f32 %v1521_v52, %v1361_v20 }
  0xcf   : > { %v1410_v41 = vmul.f32 %v6637_v55, %v6042_v58  ;;  %v6650_v1 = vmul.f32 %v6010_v16, %v6032_v17  ;;  %v10269_v48 = vrot.slane %v6568_v14, 1  ;;  %v804_v47 = vadd.f32 %v724_v29, %v526_v19 }
  0xd0   : > { %10266 = vst [vmem:[#allocation88_spill] sm:$0xff] %v6641_v7  ;;  %10267 = vst [vmem:[#allocation89_spill] sm:$0xff] %v6643_v56  ;;  %v972_v51 = vsel %vm917_vm3, %v969_v10, %v971_v21  ;;  %v1721_v52 = vmul.f32 %v6010_v16, %v6042_v58  ;;  %v970_v20 = vsel %vm917_vm3, %v968_v35, %v969_v10  ;;  %v10346_v60 = vrot.slane %v10345_v0, 2 }
  0xd1   : > { %10268 = vst [vmem:[#allocation90_spill] sm:$0xff] %v6650_v1  ;;  %v6655_v28 = vsel %vm671_vm2, %v10269_v48, %v1829_v45  ;;  %v1051_v62 = vadd.f32 %v972_v51, %v805_v12  ;;  %v1281_v32 = vsel %vm671_vm2, %v10106_v38, %v1280_v33  ;;  %v1525_v56 = vrot.slane %v1410_v41, 2 }
  0xd2   : > { %10270 = vst [vmem:[#allocation91_spill] sm:$0xff] %v6655_v28  ;;  %v1363_v4 = vadd.f32 %v1281_v32, %v1118_v8  ;;  %v6667_v45 = vmul.f32 %v6061_v59, %v6042_v58  ;;  %v608_v29 = vmul.f32 %v6523_v3, %v6050_v63  ;;  %v609_v12 = vmul.f32 %v6523_v3, %v6052_v2 }
  0xd3   : > { %v610_v10 = vmul.f32 %v6523_v3, %v6064_v61  ;;  %v854_v33 = vmul.f32 %v6469_v31, %v6050_v63  ;;  %v1834_v21 = vrot.slane %v1721_v52, 1  ;;  %v528_v35 = vmul.f32 %v6604_v11, %v6050_v63 }
  0xd4   : > { %10271 = vst [vmem:[#allocation92_spill] sm:$0xff] %v6667_v45  ;;  %v727_v58 = vrot.slane %v608_v29, 1  ;;  %v855_v8 = vmul.f32 %v6469_v31, %v6052_v2  ;;  %v529_v41 = vmul.f32 %v6604_v11, %v6052_v2  ;;  %v728_v48 = vrot.slane %v609_v12, 1 }
  0xd5   : > { %v730_v51 = vrot.slane %v610_v10, 1  ;;  %v856_v32 = vmul.f32 %v6469_v31, %v6064_v61  ;;  %v973_v38 = vrot.slane %v854_v33, 2  ;;  %v6688_v52 = vmul.f32 %v6613_v9, %v6052_v2 }
  0xd6   : > { %v974_v19 = vrot.slane %v855_v8, 2  ;;  %v1168_v29 = vmul.f32 %v6613_v9, %v6064_v61  ;;  %v729_v34 = vsel %vm671_vm2, %v727_v58, %v728_v48  ;;  %v1088_v12 = vmul.f32 %v6623_v6, %v6052_v2 }
  0xd7   : > { %10272 = vst [vmem:[#allocation93_spill] sm:$0xff] %v6688_v52  ;;  %v731_v57 = vsel %vm671_vm2, %v728_v48, %v730_v51  ;;  %v976_v63 = vrot.slane %v856_v32, 2  ;;  %v6696_v10 = vadd.f32 %v970_v20, %v804_v47  ;;  %v806_v17 = vadd.f32 %v729_v34, %v528_v35 }
  0xd8   : > { %v807_v33 = vadd.f32 %v731_v57, %v529_v41  ;;  %v6700_v8 = vmul.f32 %v6637_v55, %v6052_v2  ;;  %v1120_v44 = vadd.f32 %v1088_v12, %v1051_v62  ;;  %v10114_v28 = vrot.slane %v6688_v52, 1 }
  0xd9   : > { %10273 = vst [vmem:[#allocation94_spill] sm:$0xff] %v6696_v10  ;;  %v1285_v14 = vrot.slane %v1168_v29, 1  ;;  %v1413_v58 = vmul.f32 %v6637_v55, %v6064_v61  ;;  %v10275_v48 = vrot.slane %v6641_v7, 2  ;;  %v975_v34 = vsel %vm917_vm3, %v973_v38, %v974_v19 }
  0xda   : > { %10274 = vst [vmem:[#allocation95_spill] sm:$0xff] %v6700_v8  ;;  %v6712_v57 = vmul.f32 %v6010_v16, %v6052_v2  ;;  %v10278_v62 = vrot.slane %v6650_v1, 1  ;;  %v977_v41 = vsel %vm917_vm3, %v974_v19, %v976_v63  ;;  %v6722_v32 = vadd.f32 %v975_v34, %v806_v17 }
  0xdb   : > { %v1526_v51 = vsel %vm917_vm3, %v10275_v48, %v1525_v56  ;;  %v1053_v56 = vadd.f32 %v977_v41, %v807_v33  ;;  %v1286_v38 = vsel %vm671_vm2, %v10114_v28, %v1285_v14  ;;  %v1530_v48 = vrot.slane %v1413_v58, 2 }
  0xdc   : > { %10276 = vst [vmem:[#allocation96_spill] sm:$0xff] %v6712_v57  ;;  %v6714_v20 = vadd.f32 %v1526_v51, %v1363_v4  ;;  %v6719_v35 = vsel %vm671_vm2, %v10278_v62, %v1834_v21  ;;  %10280 = vst [vmem:[#allocation99_spill] sm:$0xff] %v6722_v32  ;;  %v1724_v4 = vmul.f32 %v6010_v16, %v6064_v61 }
  0xdd   : > { %10279 = vst [vmem:[#allocation98_spill] sm:$0xff] %v6719_v35  ;;  %v1365_v12 = vadd.f32 %v1286_v38, %v1120_v44  ;;  %v6732_v21 = vmul.f32 %v6061_v59, %v6064_v61  ;;  %v611_v17 = vmul.f32 %v6523_v3, %v6076_v27  ;;  %v612_v19 = vmul.f32 %v6523_v3, %v6088_v37 }
  0xde   : > { %10277 = vst [vmem:[#allocation97_spill] sm:$0xff] %v6714_v20  ;;  %v613_v14 = vmul.f32 %v6523_v3, %v6091_v18  ;;  %v857_v33 = vmul.f32 %v6469_v31, %v6076_v27  ;;  %v530_v44 = vmul.f32 %v6604_v11, %v6076_v27  ;;  %v858_v61 = vmul.f32 %v6469_v31, %v6088_v37 }
  0xdf   : > { %10281 = vst [vmem:[#allocation100_spill] sm:$0xff] %v6732_v21  ;;  %v732_v58 = vrot.slane %v611_v17, 1  ;;  %v859_v51 = vmul.f32 %v6469_v31, %v6091_v18  ;;  %v1839_v34 = vrot.slane %v1724_v4, 1  ;;  %v531_v62 = vmul.f32 %v6604_v11, %v6088_v37 }
  0xe0   : > { %v733_v41 = vrot.slane %v612_v19, 1  ;;  %v735_v38 = vrot.slane %v613_v14, 1  ;;  %v978_v28 = vrot.slane %v857_v33, 2  ;;  %v979_v47 = vrot.slane %v858_v61, 2 }
  0xe1   : > { %v6753_v63 = vmul.f32 %v6613_v9, %v6088_v37  ;;  %v1171_v17 = vmul.f32 %v6613_v9, %v6091_v18  ;;  %v981_v52 = vrot.slane %v859_v51, 2  ;;  %v6761_v4 = vmul.f32 %v6637_v55, %v6088_v37 }
  0xe2   : > { %v734_v29 = vsel %vm671_vm2, %v732_v58, %v733_v41  ;;  %v736_v32 = vsel %vm671_vm2, %v733_v41, %v735_v38  ;;  %v10284_v19 = vrot.slane %v6700_v8, 2  ;;  %v1090_v27 = vmul.f32 %v6623_v6, %v6088_v37 }
  0xe3   : > { %10282 = vst [vmem:[#allocation101_spill] sm:$0xff] %v6753_v63  ;;  %10283 = vst [vmem:[#allocation102_spill] sm:$0xff] %v6761_v4  ;;  %v808_v33 = vadd.f32 %v734_v29, %v530_v44  ;;  %v809_v61 = vadd.f32 %v736_v32, %v531_v62  ;;  %v10119_v58 = vrot.slane %v6753_v63, 1  ;;  %v1290_v20 = vrot.slane %v1171_v17, 1 }
  0xe4   : > { %v1531_v14 = vsel %vm917_vm3, %v10284_v19, %v1530_v48  ;;  %v1416_v51 = vmul.f32 %v6637_v55, %v6091_v18  ;;  %v980_v38 = vsel %vm917_vm3, %v978_v28, %v979_v47  ;;  %v1122_v8 = vadd.f32 %v1090_v27, %v1053_v56 }
  0xe5   : > { %v6772_v41 = vadd.f32 %v1531_v14, %v1365_v12  ;;  %v6777_v29 = vmul.f32 %v6010_v16, %v6088_v37  ;;  %v10287_v32 = vrot.slane %v6712_v57, 1  ;;  %v982_v44 = vsel %vm917_vm3, %v979_v47, %v981_v52  ;;  %v6794_v16 = vld [vmem:[%s10026_s2 + $0x7] ss:$0 sm:$0xff]  ;;  %v10291_v47 = vld [vmem:[#allocation38_spill] sm:$0xff] }
  0xe6   : > { %v6785_v62 = vadd.f32 %v980_v38, %v808_v33  ;;  %v1055_v12 = vadd.f32 %v982_v44, %v809_v61  ;;  %v1291_v27 = vsel %vm671_vm2, %v10119_v58, %v1290_v20  ;;  %v1535_v28 = vrot.slane %v1416_v51, 2  ;;  %v10292_v20 = vld [vmem:[#allocation39_spill] sm:$0xff]  ;;  %v10293_v51 = vld [vmem:[#allocation41_spill] sm:$0xff] }
  0xe7   : > { %10285 = vst [vmem:[#allocation103_spill] sm:$0xff] %v6772_v41  ;;  %10286 = vst [vmem:[#allocation104_spill] sm:$0xff] %v6777_v29  ;;  %v6782_v48 = vsel %vm671_vm2, %v10287_v32, %v1839_v34  ;;  %v1727_v56 = vmul.f32 %v6794_v16, %v6091_v18  ;;  %v6800_v52 = vmul.f32 %v6061_v59, %v6091_v18 }
  0xe8   : > { %10288 = vst [vmem:[#allocation105_spill] sm:$0xff] %v6782_v48  ;;  %10289 = vst [vmem:[#allocation106_spill] sm:$0xff] %v6785_v62  ;;  %v532_v34 = vmul.f32 %v6604_v11, %v10291_v47  ;;  %v614_v19 = vmul.f32 %v6523_v3, %v10291_v47  ;;  %v615_v14 = vmul.f32 %v6523_v3, %v10292_v20 }
  0xe9   : > { %10290 = vst [vmem:[#allocation107_spill] sm:$0xff] %v6800_v52  ;;  %v1367_v33 = vadd.f32 %v1291_v27, %v1122_v8  ;;  %v616_v38 = vmul.f32 %v6523_v3, %v10293_v51  ;;  %v860_v32 = vmul.f32 %v6469_v31, %v10291_v47  ;;  %v861_v44 = vmul.f32 %v6469_v31, %v10292_v20 }
  0xea   : > { %v737_v59 = vrot.slane %v614_v19, 1  ;;  %v738_v18 = vrot.slane %v615_v14, 1  ;;  %v862_v58 = vmul.f32 %v6469_v31, %v10293_v51  ;;  %v533_v10 = vmul.f32 %v6604_v11, %v10292_v20 }
  0xeb   : > { %v740_v8 = vrot.slane %v616_v38, 1  ;;  %v983_v27 = vrot.slane %v860_v32, 2  ;;  %v6821_v61 = vmul.f32 %v6613_v9, %v10292_v20  ;;  %v984_v62 = vrot.slane %v861_v44, 2 }
  0xec   : > { %v739_v17 = vsel %vm671_vm2, %v737_v59, %v738_v18  ;;  %v986_v19 = vrot.slane %v862_v58, 2  ;;  %v1174_v14 = vmul.f32 %v6613_v9, %v10293_v51  ;;  %v1844_v63 = vrot.slane %v1727_v56, 1 }
  0xed   : > { %10294 = vst [vmem:[#allocation41_spill] sm:$0xff] %v6821_v61  ;;  %v741_v47 = vsel %vm671_vm2, %v738_v18, %v740_v8  ;;  %v810_v41 = vadd.f32 %v739_v17, %v532_v34  ;;  %v1092_v37 = vmul.f32 %v6623_v6, %v10292_v20  ;;  %v10295_v38 = vrot.slane %v6761_v4, 2 }
  0xee   : > { %v811_v21 = vadd.f32 %v741_v47, %v533_v10  ;;  %v10125_v48 = vrot.slane %v6821_v61, 1  ;;  %v1295_v59 = vrot.slane %v1174_v14, 1  ;;  %v6836_v56 = vmul.f32 %v6637_v55, %v10292_v20 }
  0xef   : > { %v1536_v32 = vsel %vm917_vm3, %v10295_v38, %v1535_v28  ;;  %v1124_v44 = vadd.f32 %v1092_v37, %v1055_v12  ;;  %v1419_v17 = vmul.f32 %v6637_v55, %v10293_v51  ;;  %v985_v34 = vsel %vm917_vm3, %v983_v27, %v984_v62  ;;  %v6863_v27 = vld [vmem:[%s10026_s2 + $0x8] ss:$0 sm:$0xff] }
  0xf0   : > { %10296 = vst [vmem:[#allocation108_spill] sm:$0xff] %v6836_v56  ;;  %v987_v18 = vsel %vm917_vm3, %v984_v62, %v986_v19  ;;  %v6844_v10 = vmul.f32 %v6794_v16, %v10292_v20  ;;  %v1730_v28 = vmul.f32 %v6794_v16, %v10293_v51  ;;  %v6848_v47 = vadd.f32 %v1536_v32, %v1367_v33  ;;  %v10303_v19 = vld [vmem:[#allocation43_spill] sm:$0xff] }
  0xf1   : > { %v10299_v37 = vrot.slane %v6777_v29, 1  ;;  %v6855_v8 = vadd.f32 %v985_v34, %v810_v41  ;;  %v1057_v14 = vadd.f32 %v987_v18, %v811_v21  ;;  %v1296_v62 = vsel %vm671_vm2, %v10125_v48, %v1295_v59  ;;  %v10304_v41 = vld [vmem:[#allocation44_spill] sm:$0xff] }
  0xf2   : > { %10297 = vst [vmem:[#allocation109_spill] sm:$0xff] %v6844_v10  ;;  %10298 = vst [vmem:[#allocation110_spill] sm:$0xff] %v6848_v47  ;;  %v6867_v33 = vmul.f32 %v6863_v27, %v10293_v51  ;;  %v619_v21 = vmul.f32 %v6523_v3, %v10304_v41  ;;  %v1369_v38 = vadd.f32 %v1296_v62, %v1124_v44  ;;  %v1540_v59 = vrot.slane %v1419_v17, 2 }
  0xf3   : > { %v6853_v12 = vsel %vm671_vm2, %v10299_v37, %v1844_v63  ;;  %10301 = vst [vmem:[#allocation112_spill] sm:$0xff] %v6855_v8  ;;  %v6871_v63 = vmul.f32 %v6523_v3, %v10303_v19  ;;  %v6878_v34 = vmul.f32 %v6613_v9, %v10303_v19  ;;  %v1849_v37 = vrot.slane %v1730_v28, 1 }
  0xf4   : > { %10300 = vst [vmem:[#allocation111_spill] sm:$0xff] %v6853_v12  ;;  %10302 = vst [vmem:[#allocation113_spill] sm:$0xff] %v6867_v33  ;;  %v6883_v51 = vmul.f32 %v6469_v31, %v10304_v41  ;;  %v1094_v48 = vmul.f32 %v6623_v6, %v10303_v19  ;;  %v745_v44 = vrot.slane %v619_v21, 1  ;;  %v1177_v17 = vmul.f32 %v6613_v9, %v10304_v41 }
  0xf5   : > { %10305 = vst [vmem:[#allocation44_spill] sm:$0xff] %v6878_v34  ;;  %v743_v58 = vrot.slane %v6871_v63, 1  ;;  %v6893_v18 = vmul.f32 %v6637_v55, %v10303_v19  ;;  %v1422_v28 = vmul.f32 %v6637_v55, %v10304_v41  ;;  %v6899_v8 = vmul.f32 %v6794_v16, %v10303_v19 }
  0xf6   : > { %v1126_v32 = vadd.f32 %v1094_v48, %v1057_v14  ;;  %v1300_v61 = vrot.slane %v1177_v17, 1  ;;  %v1733_v63 = vmul.f32 %v6794_v16, %v10304_v41  ;;  %v6905_v21 = vmul.f32 %v6863_v27, %v10304_v41  ;;  %v10314_v41 = vld [vmem:[#allocation47_spill] sm:$0xff] }
  0xf7   : > { %10306 = vst [vmem:[#allocation114_spill] sm:$0xff] %v6893_v18  ;;  %10307 = vst [vmem:[#allocation115_spill] sm:$0xff] %v6899_v8  ;;  %v6909_v48 = vmul.f32 %v6523_v3, %v6172_v42  ;;  %v1545_v62 = vrot.slane %v1422_v28, 2  ;;  %v6915_v4 = vmul.f32 %v6469_v31, %v6172_v42  ;;  %v10309_v17 = vrot.slane %v6836_v56, 2 }
  0xf8   : > { %10308 = vst [vmem:[#allocation116_spill] sm:$0xff] %v6905_v21  ;;  %v10310_v52 = vrot.slane %v6878_v34, 1  ;;  %v1854_v29 = vrot.slane %v1733_v63, 1  ;;  %v10312_v28 = vrot.slane %v6844_v10, 1  ;;  %v6933_v56 = vsel %vm671_vm2, %v743_v58, %v745_v44 }
  0xf9   : > { %v1541_v20 = vsel %vm917_vm3, %v10309_v17, %v1540_v59  ;;  %v6958_v63 = vmul.f32 %v6637_v55, %v6172_v42  ;;  %v10322_v59 = vld [vmem:[#allocation45_spill] sm:$0xff]  ;;  %v867_v21 = vmul.f32 %v6469_v31, %v10314_v41  ;;  %v1698_v5 = vmul.f32 %v6794_v16, %v10349_v40 }
  0xfa   : > { %v1301_v12 = vsel %vm671_vm2, %v10310_v52, %v1300_v61  ;;  %v6924_v57 = vadd.f32 %v1541_v20, %v1369_v38  ;;  %v6929_v47 = vsel %vm671_vm2, %v10312_v28, %v1849_v37  ;;  %v6939_v52 = vmul.f32 %v6794_v16, %v10314_v41 }
  0xfb   : > { %10313 = vst [vmem:[#allocation118_spill] sm:$0xff] %v6929_v47  ;;  %v1371_v7 = vadd.f32 %v1301_v12, %v1126_v32  ;;  %v10316_v20 = vrot.slane %v6893_v18, 2  ;;  %v10317_v38 = vrot.slane %v6899_v8, 1  ;;  %v6952_v32 = vmul.f32 %v6613_v9, %v6172_v42 }
  0xfc   : > { %10311 = vst [vmem:[#allocation117_spill] sm:$0xff] %v6924_v57  ;;  %10315 = vst [vmem:[#allocation119_spill] sm:$0xff] %v6939_v52  ;;  %v6964_v28 = vmul.f32 %v6863_v27, %v6172_v42  ;;  %v866_v17 = vmul.f32 %v6469_v31, %v10322_v59  ;;  %v994_v47 = vrot.slane %v867_v21, 2 }
  0xfd   : > { %v1546_v61 = vsel %vm917_vm3, %v10316_v20, %v1545_v62  ;;  %v6947_v37 = vsel %vm671_vm2, %v10317_v38, %v1854_v29  ;;  %v1736_v62 = vmul.f32 %v6794_v16, %v6172_v42  ;;  %v10321_v29 = vld [vmem:[#allocation42_spill] sm:$0xff]  ;;  %v864_v42 = vmul.f32 %v6469_v31, %v10303_v19 }
  0xfe   : > { %10318 = vst [vmem:[#allocation120_spill] sm:$0xff] %v6947_v37  ;;  %v6954_v44 = vadd.f32 %v1546_v61, %v1371_v7  ;;  %10320 = vst [vmem:[#allocation122_spill] sm:$0xff] %v6964_v28  ;;  %v534_v20 = vmul.f32 %v6604_v11, %v10321_v29  ;;  %v617_v38 = vmul.f32 %v6523_v3, %v10321_v29  ;;  %v993_v57 = vrot.slane %v866_v17, 2 }
  0xff   : > { %v620_v7 = vmul.f32 %v6523_v3, %v10322_v59  ;;  %v621_v61 = vmul.f32 %v6523_v3, %v10314_v41  ;;  %v863_v14 = vmul.f32 %v6469_v31, %v10321_v29  ;;  %v536_v3 = vmul.f32 %v6604_v11, %v10322_v59 }
 0x100   : > { %10319 = vst [vmem:[#allocation121_spill] sm:$0xff] %v6954_v44  ;;  %v742_v44 = vrot.slane %v617_v38, 1  ;;  %v989_v12 = vrot.slane %v864_v42, 2  ;;  %v1859_v8 = vrot.slane %v1736_v62, 1  ;;  %v995_v31 = vsel %vm917_vm3, %v993_v57, %v994_v47 }
 0x101   : > { %v747_v18 = vrot.slane %v620_v7, 1  ;;  %v748_v34 = vrot.slane %v621_v61, 1  ;;  %v988_v37 = vrot.slane %v863_v14, 2  ;;  %v1178_v7 = vmul.f32 %v6613_v9, %v10322_v59  ;;  %v10323_v61 = vld [vmem:[#allocation49_spill] sm:$0xff] }
 0x102   : > { %v744_v29 = vsel %vm671_vm2, %v742_v44, %v743_v58  ;;  %v1179_v14 = vmul.f32 %v6613_v9, %v10314_v41  ;;  %v1181_v17 = vmul.f32 %v6613_v9, %v10323_v61  ;;  %v1423_v58 = vmul.f32 %v6637_v55, %v10322_v59 }
 0x103   : > { %v749_v33 = vsel %vm671_vm2, %v747_v18, %v748_v34  ;;  %v812_v10 = vadd.f32 %v744_v29, %v534_v20  ;;  %v990_v38 = vsel %vm917_vm3, %v988_v37, %v989_v12  ;;  %v1424_v37 = vmul.f32 %v6637_v55, %v10314_v41 }
 0x104   : > { %v814_v2 = vadd.f32 %v749_v33, %v536_v3  ;;  %v1095_v33 = vmul.f32 %v6623_v6, %v10322_v59  ;;  %v1097_v57 = vmul.f32 %v6623_v6, %v10323_v61  ;;  %v1302_v44 = vrot.slane %v1178_v7, 1 }
 0x105   : > { %v1058_v18 = vadd.f32 %v990_v38, %v812_v10  ;;  %v1303_v62 = vrot.slane %v1179_v14, 1  ;;  %v1426_v29 = vmul.f32 %v6637_v55, %v10323_v61  ;;  %v1305_v20 = vrot.slane %v6952_v32, 1  ;;  %v7016_v14 = vld [vmem:[%s10026_s2 + $0x6] ss:$0 sm:$0xff] }
 0x106   : > { %v1060_v21 = vadd.f32 %v995_v31, %v814_v2  ;;  %v1550_v42 = vrot.slane %v6958_v63, 2  ;;  %v10324_v3 = vrot.slane %v6939_v52, 1  ;;  %v1307_v59 = vrot.slane %v1181_v17, 1 }
 0x107   : > { %v1127_v10 = vadd.f32 %v1095_v33, %v1058_v18  ;;  %v1547_v45 = vrot.slane %v1423_v58, 2  ;;  %v1548_v7 = vrot.slane %v1424_v37, 2  ;;  %v1654_v32 = vmul.f32 %v7016_v14, %v10323_v61 }
 0x108   : > { %v7011_v38 = vsel %vm671_vm2, %v10324_v3, %v1859_v8  ;;  %v1129_v31 = vadd.f32 %v1097_v57, %v1060_v21  ;;  %v535_v63 = vmul.f32 %v6604_v11, %v10303_v19  ;;  %v537_v18 = vmul.f32 %v6604_v11, %v10314_v41  ;;  %v10344_v19 = vld [vmem:[#allocation48_spill] sm:$0xff] }
 0x109   : > { %10325 = vst [vmem:[#allocation49_spill] sm:$0xff] %v7011_v38  ;;  %v1304_v8 = vsel %vm671_vm2, %v1302_v44, %v1303_v62  ;;  %v1552_v21 = vrot.slane %v1426_v29, 2  ;;  %v1737_v17 = vmul.f32 %v6794_v16, %v10323_v61  ;;  %v10326_v58 = vrot.slane %v6909_v48, 1  ;;  %v10329_v38 = vld [vmem:[#allocation50_spill] sm:$0xff] }
 0x10a   : > { %v1372_v37 = vadd.f32 %v1304_v8, %v1127_v10  ;;  %v7032_v57 = vmul.f32 %v6863_v27, %v10323_v61  ;;  %v813_v3 = vadd.f32 %v6933_v56, %v535_v63  ;;  %v10327_v11 = vrot.slane %v6883_v51, 2 }
 0x10b   : > { %v751_v33 = vsel %vm671_vm2, %v748_v34, %v10326_v58  ;;  %v10328_v29 = vrot.slane %v6915_v4, 2  ;;  %v1182_v48 = vmul.f32 %v6613_v9, %v10329_v38  ;;  %v1183_v34 = vmul.f32 %v6613_v9, %v6225_v25 }
 0x10c   : > { %v815_v2 = vadd.f32 %v751_v33, %v537_v18  ;;  %v992_v44 = vsel %vm917_vm3, %v989_v12, %v10327_v11  ;;  %v1096_v56 = vmul.f32 %v6623_v6, %v10314_v41  ;;  %v1098_v51 = vmul.f32 %v6623_v6, %v10329_v38  ;;  %v10343_v41 = vld [vmem:[#allocation29_spill] sm:$0xff] }
 0x10d   : > { %v997_v28 = vsel %vm917_vm3, %v994_v47, %v10328_v29  ;;  %v1059_v10 = vadd.f32 %v992_v44, %v813_v3  ;;  %v1549_v12 = vsel %vm917_vm3, %v1547_v45, %v1548_v7  ;;  %v1308_v63 = vrot.slane %v1182_v48, 1 }
 0x10e   : > { %v1061_v61 = vadd.f32 %v997_v28, %v815_v2  ;;  %v1310_v4 = vrot.slane %v1183_v34, 1  ;;  %v7052_v47 = vmul.f32 %v6637_v55, %v10329_v38  ;;  %v1617_v18 = vadd.f32 %v1549_v12, %v1372_v37 }
 0x10f   : > { %v1861_v8 = vrot.slane %v1737_v17, 1  ;;  %v2106_v58 = vrot.slane %v7032_v57, 2  ;;  %v1128_v33 = vadd.f32 %v1096_v56, %v1059_v10  ;;  %v1306_v28 = vsel %vm671_vm2, %v1303_v62, %v1305_v20  ;;  %v2287_v20 = vld [vmem:[#allocation2 + $0x158] sm:$0xff] }
 0x110   : > { %10330 = vst [vmem:[#allocation50_spill] sm:$0xff] %v7052_v47  ;;  %v1309_v2 = vsel %vm671_vm2, %v1307_v59, %v1308_v63  ;;  %v7059_v3 = vmul.f32 %v6637_v55, %v6225_v25  ;;  %v10146_v45 = vrot.slane %v7052_v47, 2  ;;  %v1130_v11 = vadd.f32 %v1098_v51, %v1061_v61  ;;  %v2288_v61 = vld [vmem:[#allocation2 + $0x160] sm:$0x3] }
 0x111   : > { %v1373_v44 = vadd.f32 %v1306_v28, %v1128_v33  ;;  %v1374_v29 = vadd.f32 %v1309_v2, %v1129_v31  ;;  %v1738_v37 = vmul.f32 %v6794_v16, %v10329_v38  ;;  %v1311_v17 = vsel %vm671_vm2, %v1308_v63, %v1310_v4  ;;  %v7119_v63 = vld [vmem:[#allocation2 + $0x18] sm:$0xff] }
 0x112   : > { %10331 = vst [vmem:[#allocation123_spill] sm:$0xff] %v7059_v3  ;;  %v1551_v57 = vsel %vm917_vm3, %v1548_v7, %v1550_v42  ;;  %v1739_v62 = vmul.f32 %v6794_v16, %v6225_v25  ;;  %v1983_v59 = vmul.f32 %v6863_v27, %v10329_v38  ;;  %v1686_v48 = vadd.f32 %v1654_v32, %v1617_v18  ;;  %v7179_v3 = vld [vmem:[%s10027_s3 + $0x8] ss:$0 sm:$0xff] }
 0x113   : > { %v1618_v34 = vadd.f32 %v1551_v57, %v1373_v44  ;;  %v1655_v10 = vmul.f32 %v7016_v14, %v10329_v38  ;;  %v1862_v31 = vrot.slane %v1738_v37, 1  ;;  %v1554_v56 = vsel %vm917_vm3, %v1552_v21, %v10146_v45  ;;  %v7085_v38 = vld [vmem:[%s10027_s3] ss:$0 sm:$0xff]  ;;  %v7090_v21 = vld [vmem:[%s10027_s3 + $0x1] ss:$0 sm:$0xff] }
 0x114   : > { %v1864_v51 = vrot.slane %v1739_v62, 1  ;;  %v1984_v42 = vmul.f32 %v6863_v27, %v6225_v25  ;;  %v2107_v7 = vrot.slane %v1983_v59, 2  ;;  %v7077_v12 = vadd.f32 %v1311_v17, %v1130_v11  ;;  %v2244_v17 = vld [vmem:[#allocation2] sm:$0xff] }
 0x115   : > { %v7080_v32 = vadd.f32 %v1554_v56, %v1374_v29  ;;  %v1687_v4 = vadd.f32 %v1655_v10, %v1618_v34  ;;  %v2332_v33 = vmul.f32 %v7085_v38, %v2287_v20  ;;  %v7095_v28 = vmul.f32 %v7090_v21, %v2287_v20  ;;  %v10335_v29 = vld [vmem:[#allocation5_spill] sm:$0xff]  ;;  %v7106_v20 = vld [vmem:[#allocation2 + $0x8] sm:$0xff] }
 0x116   : > { %10332 = vst [vmem:[#allocation124_spill] sm:$0xff] %v7077_v12  ;;  %v1865_v25 = vsel %vm671_vm2, %v1862_v31, %v1864_v51  ;;  %v2109_v18 = vrot.slane %v1984_v42, 2  ;;  %v1863_v2 = vsel %vm671_vm2, %v1861_v8, %v1862_v31  ;;  %v2416_v44 = vmul.f32 %v7090_v21, %v2288_v61  ;;  %v7111_v8 = vld [vmem:[%s10027_s3 + $0x2] ss:$0 sm:$0xff]  ;;  %v10337_v56 = vld [vmem:[#allocation4_spill] sm:$0xff] }
 0x117   : > { %10333 = vst [vmem:[#allocation125_spill] sm:$0xff] %v7080_v32  ;;  %10334 = vst [vmem:[#allocation126_spill] sm:$0xff] %v7095_v28  ;;  %v1932_v11 = vadd.f32 %v1865_v25, %v1687_v4  ;;  %v1626_v37 = vmul.f32 %v7016_v14, %v10335_v29  ;;  %v1931_v57 = vadd.f32 %v1863_v2, %v1686_v48  ;;  %v10336_v61 = vld [vmem:[#allocation19_spill] sm:$0xff] }
 0x118   : > { %v2110_v62 = vsel %vm917_vm3, %v2107_v7, %v2109_v18  ;;  %v1695_v59 = vmul.f32 %v6794_v16, %v10335_v29  ;;  %v1940_v34 = vmul.f32 %v6863_v27, %v10335_v29  ;;  %v2108_v10 = vsel %vm917_vm3, %v2106_v58, %v2107_v7  ;;  %v7121_v12 = vld [vmem:[#allocation2 + $0x20] sm:$0xff] }
 0x119   : > { %v2177_v31 = vadd.f32 %v2110_v62, %v1932_v11  ;;  %v1658_v48 = vadd.f32 %v1626_v37, %v10336_v61  ;;  %v1941_v51 = vmul.f32 %v6863_v27, %v10337_v56  ;;  %v2372_v18 = vmul.f32 %v7090_v21, %v2244_v17  ;;  %v7131_v11 = vld [vmem:[%s10027_s3 + $0x4] ss:$0 sm:$0xff]  ;;  %v10338_v62 = vld [vmem:[#allocation26_spill] sm:$0xff]  ;;  %v7143_v56 = vld [vmem:[%s10027_s3 + $0x5] ss:$0 sm:$0xff] }
 0x11a   : > { %v1791_v4 = vrot.slane %v1695_v59, 1  ;;  %v2036_v25 = vrot.slane %v1940_v34, 2  ;;  %v2541_v2 = vrot.slane %v2416_v44, 1  ;;  %v7125_v58 = vmul.f32 %v7090_v21, %v7106_v20 }
 0x11b   : > { %v2037_v45 = vrot.slane %v1941_v51, 2  ;;  %v2617_v7 = vmul.f32 %v7111_v8, %v2244_v17  ;;  %v2364_v37 = vadd.f32 %v2332_v33, %v2177_v31  ;;  %v10339_v59 = vrot.slane %v10338_v62, 1  ;;  %v7152_v31 = vld [vmem:[%s10027_s3 + $0x3] ss:$0 sm:$0xff] }
 0x11c   : > { %v2468_v34 = vrot.slane %v2372_v18, 1  ;;  %v7138_v61 = vmul.f32 %v7111_v8, %v7106_v20  ;;  %v7145_v51 = vadd.f32 %v2108_v10, %v1931_v57  ;;  %v2469_v33 = vrot.slane %v7125_v58, 1  ;;  %v7166_v10 = vld [vmem:[%s10027_s3 + $0x7] ss:$0 sm:$0xff] }
 0x11d   : > { %v1793_v44 = vsel %vm671_vm2, %v1791_v4, %v10339_v59  ;;  %v2038_v47 = vsel %vm917_vm3, %v2036_v25, %v2037_v45  ;;  %v7154_v4 = vld [vmem:[#allocation2 + $0x30] sm:$0xff]  ;;  %v2713_v18 = vrot.slane %v2617_v7, 2  ;;  %v2931_v59 = vmul.f32 %v7131_v11, %v7119_v63 }
 0x11e   : > { %10340 = vst [vmem:[#allocation5_spill] sm:$0xff] %v7145_v51  ;;  %v1903_v42 = vadd.f32 %v1793_v44, %v1658_v48  ;;  %v2714_v62 = vrot.slane %v7138_v61, 2  ;;  %v7161_v57 = vmul.f32 %v7131_v11, %v7121_v12  ;;  %v7168_v48 = vld [vmem:[#allocation2 + $0x38] sm:$0xff]  ;;  %v10341_v25 = vrot.slane %v7095_v28, 1 }
 0x11f   : > { %v2303_v44 = vmul.f32 %v7085_v38, %v2244_v17  ;;  %v3176_v61 = vmul.f32 %v7143_v56, %v7119_v63  ;;  %v2470_v51 = vsel %vm671_vm2, %v2468_v34, %v2469_v33  ;;  %v2862_v28 = vmul.f32 %v7152_v31, %v7119_v63  ;;  %v7193_v17 = vld [vmem:[%s10027_s3 + $0x6] ss:$0 sm:$0xff] }
 0x120   : > { %v2542_v58 = vsel %vm671_vm2, %v10341_v25, %v2541_v2  ;;  %v2148_v7 = vadd.f32 %v2038_v47, %v1903_v42  ;;  %v7188_v47 = vmul.f32 %v7143_v56, %v7121_v12  ;;  %v2715_v2 = vsel %vm917_vm3, %v2713_v18, %v2714_v62 }
 0x121   : > { %v7181_v32 = vadd.f32 %v2542_v58, %v2364_v37  ;;  %v3027_v25 = vrot.slane %v2931_v59, 1  ;;  %v3490_v37 = vmul.f32 %v7166_v10, %v7154_v4  ;;  %v3028_v34 = vrot.slane %v7161_v57, 1 }
 0x122   : > { %v2335_v42 = vadd.f32 %v2303_v44, %v2148_v7  ;;  %v7201_v58 = vmul.f32 %v7166_v10, %v7168_v48  ;;  %v7207_v52 = vmul.f32 %v7179_v3, %v7168_v48  ;;  %v2246_v7 = vld [vmem:[#allocation2 + $0x10] sm:$0x3]  ;;  %v3272_v18 = vrot.slane %v3176_v61, 2  ;;  %v7220_v61 = vld [vmem:[#allocation2 + $0x40] sm:$0x3] }
 0x123   : > { %10342 = vst [vmem:[#allocation19_spill] sm:$0xff] %v7181_v32  ;;  %v3735_v32 = vmul.f32 %v7179_v3, %v7154_v4  ;;  %v3421_v59 = vmul.f32 %v7193_v17, %v7154_v4  ;;  %v1904_v57 = vadd.f32 %v10344_v19, %v10343_v41  ;;  %v3273_v35 = vrot.slane %v7188_v47, 2 }
 0x124   : > { %v2580_v44 = vadd.f32 %v2470_v51, %v2335_v42  ;;  %v3586_v1 = vrot.slane %v3490_v37, 1  ;;  %v2040_v15 = vsel %vm917_vm3, %v2037_v45, %v10346_v60  ;;  %v2304_v42 = vmul.f32 %v7085_v38, %v7106_v20 }
 0x125   : > { %v2149_v51 = vadd.f32 %v2040_v15, %v1904_v57  ;;  %v2374_v19 = vmul.f32 %v7090_v21, %v2246_v7  ;;  %v3029_v41 = vsel %vm671_vm2, %v3027_v25, %v3028_v34  ;;  %v3831_v47 = vrot.slane %v3735_v32, 2 }
 0x126   : > { %v2825_v43 = vadd.f32 %v2715_v2, %v2580_v44  ;;  %v3832_v37 = vrot.slane %v7207_v52, 2  ;;  %v2619_v0 = vmul.f32 %v7111_v8, %v2246_v7  ;;  %v2933_v15 = vmul.f32 %v7131_v11, %v7218_v53 }
 0x127   : > { %v2336_v60 = vadd.f32 %v2304_v42, %v2149_v51  ;;  %v2471_v45 = vrot.slane %v2374_v19, 1  ;;  %v3274_v2 = vsel %vm917_vm3, %v3272_v18, %v3273_v35  ;;  %v3178_v20 = vmul.f32 %v7143_v56, %v7218_v53 }
 0x128   : > { %v2894_v23 = vadd.f32 %v2862_v28, %v2825_v43  ;;  %v2716_v44 = vrot.slane %v2619_v0, 2  ;;  %v3492_v25 = vmul.f32 %v7166_v10, %v7220_v61  ;;  %v10347_v52 = vrot.slane %v7201_v58, 1 }
 0x129   : > { %v2472_v43 = vsel %vm671_vm2, %v2469_v33, %v2471_v45  ;;  %v3030_v28 = vrot.slane %v2933_v15, 1  ;;  %v3833_v57 = vsel %vm917_vm3, %v3831_v47, %v3832_v37  ;;  %v2863_v18 = vmul.f32 %v7152_v31, %v7121_v12 }
 0x12a   : > { %v3139_v32 = vadd.f32 %v3029_v41, %v2894_v23  ;;  %v3588_v7 = vsel %vm671_vm2, %v3586_v1, %v10347_v52  ;;  %v2581_v51 = vadd.f32 %v2472_v43, %v2336_v60  ;;  %v3737_v42 = vmul.f32 %v7179_v3, %v7220_v61  ;;  %v10348_v52 = vld [vmem:[#allocation12_spill] sm:$0xff] }
 0x12b   : > { %v2717_v0 = vsel %vm917_vm3, %v2714_v62, %v2716_v44  ;;  %v3422_v23 = vmul.f32 %v7193_v17, %v7168_v48  ;;  %v1069_v1 = vmul.f32 %v6623_v6, %v10335_v29  ;;  %v3275_v41 = vrot.slane %v3178_v20, 2 }
 0x12c   : > { %v3384_v19 = vadd.f32 %v3274_v2, %v3139_v32  ;;  %v2826_v33 = vadd.f32 %v2717_v0, %v2581_v51  ;;  %v3589_v45 = vrot.slane %v3492_v25, 1  ;;  %v1139_v47 = vmul.f32 %v6613_v9, %v10335_v29  ;;  %v10350_v0 = vld [vmem:[#allocation7_spill] sm:$0xff] }
 0x12d   : > { %v3031_v15 = vsel %vm671_vm2, %v3028_v34, %v3030_v28  ;;  %v1101_v43 = vadd.f32 %v1069_v1, %v10348_v52  ;;  %v1384_v62 = vmul.f32 %v6637_v55, %v10335_v29  ;;  %v3834_v44 = vrot.slane %v3737_v42, 2  ;;  %v7266_v34 = vld [vmem:[%s10028_s4] ss:$0 sm:$0xff] }
 0x12e   : > { %v3453_v60 = vadd.f32 %v3421_v59, %v3384_v19  ;;  %v2895_v2 = vadd.f32 %v2863_v18, %v2826_v33  ;;  %v1237_v32 = vrot.slane %v1139_v47, 1  ;;  %v1943_v25 = vmul.f32 %v6863_v27, %v10349_v40  ;;  %v10351_v18 = vld [vmem:[#allocation20_spill] sm:$0xff]  ;;  %v10353_v47 = vld [vmem:[#allocation23_spill] sm:$0xff] }
 0x12f   : > { %v1482_v20 = vrot.slane %v1384_v62, 2  ;;  %v7261_v59 = vmul.f32 %v6863_v27, %v10350_v0  ;;  %v3276_v28 = vsel %vm917_vm3, %v3273_v35, %v3275_v41  ;;  %v10352_v42 = vrot.slane %v10351_v18, 1 }
 0x130   : > { %v3698_v51 = vadd.f32 %v3588_v7, %v3453_v60  ;;  %v3140_v29 = vadd.f32 %v3031_v15, %v2895_v2  ;;  %v1628_v19 = vmul.f32 %v7016_v14, %v10349_v40  ;;  %v10354_v60 = vrot.slane %v10353_v47, 2 }
 0x131   : > { %v1239_v7 = vsel %vm671_vm2, %v1237_v32, %v10352_v42  ;;  %v1796_v62 = vrot.slane %v1698_v5, 1  ;;  %v2041_v22 = vrot.slane %v1943_v25, 2  ;;  %v2042_v15 = vrot.slane %v7261_v59, 2  ;;  %v7309_v42 = vld [vmem:[#allocation2 + $0x50] sm:$0xff] }
 0x132   : > { %v3943_v1 = vadd.f32 %v3833_v57, %v3698_v51  ;;  %v1346_v33 = vadd.f32 %v1239_v7, %v1101_v43  ;;  %v1484_v52 = vsel %vm917_vm3, %v1482_v20, %v10354_v60  ;;  %v3385_v24 = vadd.f32 %v3276_v28, %v3140_v29 }
 0x133   : > { %v2375_v35 = vmul.f32 %v7090_v21, %v7119_v63  ;;  %v7283_v32 = vmul.f32 %v7090_v21, %v7121_v12  ;;  %v2620_v57 = vmul.f32 %v7111_v8, %v7119_v63  ;;  %v10355_v5 = vrot.slane %v7201_v58, 1 }
 0x134   : > { %v3982_v41 = vadd.f32 %v7266_v34, %v3943_v1  ;;  %v1591_v2 = vadd.f32 %v1484_v52, %v1346_v33  ;;  %v3454_v43 = vadd.f32 %v3422_v23, %v3385_v24  ;;  %v3835_v20 = vsel %vm917_vm3, %v3832_v37, %v3834_v44  ;;  %v7307_v44 = vld [vmem:[#allocation2 + $0x48] sm:$0xff] }
 0x135   : > { %v3590_v51 = vsel %vm671_vm2, %v10355_v5, %v3589_v45  ;;  %v7293_v25 = vmul.f32 %v7111_v8, %v7121_v12  ;;  %v10356_v29 = vrot.slane %v6169_v39, 1  ;;  %v2473_v18 = vrot.slane %v2375_v35, 1 }
 0x136   : > { %4069 = vst.msk [vmem:[#allocation3 + $0x19] sm:$0xff] %vm326_vm0, %v3982_v41  ;;  %v1660_v59 = vadd.f32 %v1628_v19, %v1591_v2  ;;  %v2474_v24 = vrot.slane %v7283_v32, 1  ;;  %v3699_v23 = vadd.f32 %v3590_v51, %v3454_v43  ;;  %v2043_v58 = vsel %vm917_vm3, %v2041_v22, %v2042_v15 }
 0x137   : > { %v1798_v28 = vsel %vm671_vm2, %v1796_v62, %v10356_v29  ;;  %v2934_v37 = vmul.f32 %v7131_v11, %v7154_v4  ;;  %v7305_v45 = vmul.f32 %v7131_v11, %v7168_v48  ;;  %v2718_v7 = vrot.slane %v2620_v57, 2 }
 0x138   : > { %v1905_v39 = vadd.f32 %v1798_v28, %v1660_v59  ;;  %v3179_v19 = vmul.f32 %v7143_v56, %v7154_v4  ;;  %v7315_v1 = vmul.f32 %v7143_v56, %v7168_v48  ;;  %v3944_v22 = vadd.f32 %v3835_v20, %v3699_v23 }
 0x139   : > { %v2719_v33 = vrot.slane %v7293_v25, 2  ;;  %v3032_v47 = vrot.slane %v2934_v37, 1  ;;  %v3033_v60 = vrot.slane %v7305_v45, 1  ;;  %v2305_v62 = vmul.f32 %v7085_v38, %v7119_v63 }
 0x13a   : > { %v2150_v52 = vadd.f32 %v2043_v58, %v1905_v39  ;;  %v2475_v35 = vsel %vm671_vm2, %v2473_v18, %v2474_v24  ;;  %v2864_v41 = vmul.f32 %v7152_v31, %v7154_v4  ;;  %v3983_v2 = vadd.f32 %v7266_v34, %v3944_v22  ;;  %v10357_v39 = vld [vmem:[#allocation33_spill] sm:$0xff] }
 0x13b   : > { %v3277_v32 = vrot.slane %v3179_v19, 2  ;;  %v3493_v57 = vmul.f32 %v7166_v10, %v7307_v44  ;;  %v7329_v43 = vmul.f32 %v7166_v10, %v7309_v42  ;;  %v3278_v51 = vrot.slane %v7315_v1, 2 }
 0x13c   : > { %v2337_v5 = vadd.f32 %v2305_v62, %v2150_v52  ;;  %v3738_v63 = vmul.f32 %v7179_v3, %v7307_v44  ;;  %v7336_v20 = vmul.f32 %v7179_v3, %v7309_v42  ;;  %4070 = vst.msk [vmem:[#allocation3 + $0x21] sm:$0xff] %vm326_vm0, %v3983_v2  ;;  %v2720_v25 = vsel %vm917_vm3, %v2718_v7, %v2719_v33  ;;  %v7356_v62 = vld [vmem:[#allocation2 + $0x58] sm:$0x3] }
 0x13d   : > { %v3034_v59 = vsel %vm671_vm2, %v3032_v47, %v3033_v60  ;;  %v3423_v29 = vmul.f32 %v7193_v17, %v7307_v44  ;;  %v1629_v28 = vmul.f32 %v7016_v14, %v10350_v0  ;;  %v3591_v23 = vrot.slane %v3493_v57, 1 }
 0x13e   : > { %v2582_v18 = vadd.f32 %v2475_v35, %v2337_v5  ;;  %v3592_v58 = vrot.slane %v7329_v43, 1  ;;  %v3836_v37 = vrot.slane %v3738_v63, 2  ;;  %v3837_v45 = vrot.slane %v7336_v20, 2 }
 0x13f   : > { %v1661_v19 = vadd.f32 %v1629_v28, %v10357_v39  ;;  %v2377_v7 = vmul.f32 %v7090_v21, %v7218_v53  ;;  %v2622_v1 = vmul.f32 %v7111_v8, %v7218_v53  ;;  %v3279_v47 = vsel %vm917_vm3, %v3277_v32, %v3278_v51 }
 0x140   : > { %v2827_v22 = vadd.f32 %v2720_v25, %v2582_v18  ;;  %v10358_v0 = vrot.slane %v6194_v13, 2  ;;  %v2936_v35 = vmul.f32 %v7131_v11, %v7220_v61  ;;  %v2306_v57 = vmul.f32 %v7085_v38, %v7121_v12 }
 0x141   : > { %v1906_v2 = vadd.f32 %v6241_v46, %v1661_v19  ;;  %v2476_v43 = vrot.slane %v2377_v7, 1  ;;  %v2721_v5 = vrot.slane %v2622_v1, 2  ;;  %v3593_v63 = vsel %vm671_vm2, %v3591_v23, %v3592_v58 }
 0x142   : > { %v2045_v52 = vsel %vm917_vm3, %v2042_v15, %v10358_v0  ;;  %v2896_v53 = vadd.f32 %v2864_v41, %v2827_v22  ;;  %v3035_v32 = vrot.slane %v2936_v35, 1  ;;  %v3181_v13 = vmul.f32 %v7143_v56, %v7220_v61 }
 0x143   : > { %v3838_v15 = vsel %vm917_vm3, %v3836_v37, %v3837_v45  ;;  %v2151_v20 = vadd.f32 %v2045_v52, %v1906_v2  ;;  %v2865_v25 = vmul.f32 %v7152_v31, %v7168_v48  ;;  %v3495_v46 = vmul.f32 %v7166_v10, %v7356_v62  ;;  %v10359_v52 = vld [vmem:[#allocation30_spill] sm:$0xff] }
 0x144   : > { %v3141_v28 = vadd.f32 %v3034_v59, %v2896_v53  ;;  %v2477_v12 = vsel %vm671_vm2, %v2474_v24, %v2476_v43  ;;  %v3424_v41 = vmul.f32 %v7193_v17, %v7309_v42  ;;  %v3740_v18 = vmul.f32 %v7179_v3, %v7356_v62 }
 0x145   : > { %v2338_v23 = vadd.f32 %v2306_v57, %v2151_v20  ;;  %v2722_v39 = vsel %vm917_vm3, %v2719_v33, %v2721_v5  ;;  %v1071_v37 = vmul.f32 %v6623_v6, %v10349_v40  ;;  %v1142_v19 = vmul.f32 %v6613_v9, %v10349_v40  ;;  %v10360_v5 = vld [vmem:[#allocation8_spill] sm:$0xff] }
 0x146   : > { %v3386_v7 = vadd.f32 %v3279_v47, %v3141_v28  ;;  %v3036_v59 = vsel %vm671_vm2, %v3033_v60, %v3035_v32  ;;  %v3280_v1 = vrot.slane %v3181_v13, 2  ;;  %v1387_v24 = vmul.f32 %v6637_v55, %v10349_v40  ;;  %v10361_v9 = vld [vmem:[#allocation40_spill] sm:$0xff]  ;;  %v10363_v40 = vld [vmem:[#allocation9_spill] sm:$0xff] }
 0x147   : > { %v2583_v22 = vadd.f32 %v2477_v12, %v2338_v23  ;;  %v3594_v0 = vrot.slane %v3495_v46, 1  ;;  %v1103_v35 = vadd.f32 %v1071_v37, %v10359_v52  ;;  %v1242_v2 = vrot.slane %v1142_v19, 1  ;;  %v10364_v46 = vld [vmem:[#allocation46_spill] sm:$0xff] }
 0x148   : > { %v3455_v57 = vadd.f32 %v3423_v29, %v3386_v7  ;;  %v3839_v33 = vrot.slane %v3740_v18, 2  ;;  %v1487_v43 = vrot.slane %v1387_v24, 2  ;;  %v1701_v6 = vmul.f32 %v6794_v16, %v10360_v5 }
 0x149   : > { %v2828_v53 = vadd.f32 %v2722_v39, %v2583_v22  ;;  %v10362_v47 = vrot.slane %v10361_v9, 1  ;;  %v1946_v32 = vmul.f32 %v6863_v27, %v10360_v5  ;;  %v7394_v55 = vmul.f32 %v6863_v27, %v10363_v40 }
 0x14a   : > { %v3700_v13 = vadd.f32 %v3593_v63, %v3455_v57  ;;  %v3281_v29 = vsel %vm917_vm3, %v3278_v51, %v3280_v1  ;;  %v10365_v28 = vrot.slane %v10364_v46, 2  ;;  %v1801_v18 = vrot.slane %v1701_v6, 1 }
 0x14b   : > { %v1244_v60 = vsel %vm671_vm2, %v1242_v2, %v10362_v47  ;;  %v2897_v12 = vadd.f32 %v2865_v25, %v2828_v53  ;;  %v2046_v23 = vrot.slane %v1946_v32, 2  ;;  %v2047_v39 = vrot.slane %v7394_v55, 2  ;;  %v7435_v53 = vld [vmem:[#allocation2 + $0x68] sm:$0xff] }
 0x14c   : > { %v1348_v20 = vadd.f32 %v1244_v60, %v1103_v35  ;;  %v1489_v16 = vsel %vm917_vm3, %v1487_v43, %v10365_v28  ;;  %v3945_v37 = vadd.f32 %v3838_v15, %v3700_v13  ;;  %v1630_v7 = vmul.f32 %v7016_v14, %v10360_v5 }
 0x14d   : > { %v2378_v63 = vmul.f32 %v7090_v21, %v7154_v4  ;;  %v3142_v24 = vadd.f32 %v3036_v59, %v2897_v12  ;;  %v3595_v51 = vsel %vm671_vm2, %v3592_v58, %v3594_v0  ;;  %v3840_v1 = vsel %vm917_vm3, %v3837_v45, %v3839_v33 }
 0x14e   : > { %v1593_v19 = vadd.f32 %v1489_v16, %v1348_v20  ;;  %v7409_v25 = vmul.f32 %v7090_v21, %v7168_v48  ;;  %v3984_v22 = vadd.f32 %v7266_v34, %v3945_v37  ;;  %v2623_v15 = vmul.f32 %v7111_v8, %v7154_v4 }
 0x14f   : > { %v7416_v35 = vmul.f32 %v7111_v8, %v7168_v48  ;;  %v3387_v2 = vadd.f32 %v3281_v29, %v3142_v24  ;;  %v10366_v59 = vrot.slane %v6246_v26, 1  ;;  %v2048_v45 = vsel %vm917_vm3, %v2046_v23, %v2047_v39  ;;  %v7433_v26 = vld [vmem:[#allocation2 + $0x60] sm:$0xff] }
 0x150   : > { %v1662_v52 = vadd.f32 %v1630_v7, %v1593_v19  ;;  %v2307_v0 = vmul.f32 %v7085_v38, %v7154_v4  ;;  %4071 = vst.msk [vmem:[#allocation3 + $0x31] sm:$0xff] %vm326_vm0, %v3984_v22  ;;  %v2478_v33 = vrot.slane %v2378_v63, 1  ;;  %v2937_v43 = vmul.f32 %v7131_v11, %v7307_v44 }
 0x151   : > { %v1803_v58 = vsel %vm671_vm2, %v1801_v18, %v10366_v59  ;;  %v7431_v6 = vmul.f32 %v7131_v11, %v7309_v42  ;;  %v3456_v9 = vadd.f32 %v3424_v41, %v3387_v2  ;;  %v2479_v47 = vrot.slane %v7409_v25, 1 }
 0x152   : > { %v1907_v57 = vadd.f32 %v1803_v58, %v1662_v52  ;;  %v3182_v4 = vmul.f32 %v7143_v56, %v7307_v44  ;;  %v7442_v60 = vmul.f32 %v7143_v56, %v7309_v42  ;;  %v2723_v13 = vrot.slane %v2623_v15, 2 }
 0x153   : > { %v2724_v29 = vrot.slane %v7416_v35, 2  ;;  %v3037_v20 = vrot.slane %v2937_v43, 1  ;;  %v3701_v46 = vadd.f32 %v3595_v51, %v3456_v9  ;;  %v3038_v28 = vrot.slane %v7431_v6, 1 }
 0x154   : > { %v2152_v32 = vadd.f32 %v2048_v45, %v1907_v57  ;;  %v3282_v16 = vrot.slane %v3182_v4, 2  ;;  %v3283_v41 = vrot.slane %v7442_v60, 2  ;;  %v2866_v18 = vmul.f32 %v7152_v31, %v7307_v44 }
 0x155   : > { %v3496_v23 = vmul.f32 %v7166_v10, %v7433_v26  ;;  %v7453_v37 = vmul.f32 %v7166_v10, %v7435_v53  ;;  %v3946_v19 = vadd.f32 %v3840_v1, %v3701_v46  ;;  %v2480_v7 = vsel %vm671_vm2, %v2478_v33, %v2479_v47  ;;  %v7472_v33 = vld [vmem:[#allocation2 + $0x70] sm:$0x3] }
 0x156   : > { %v2339_v12 = vadd.f32 %v2307_v0, %v2152_v32  ;;  %v3741_v63 = vmul.f32 %v7179_v3, %v7433_v26  ;;  %v7460_v24 = vmul.f32 %v7179_v3, %v7435_v53  ;;  %v2725_v25 = vsel %vm917_vm3, %v2723_v13, %v2724_v29  ;;  %v10367_v0 = vld [vmem:[#allocation51_spill] sm:$0xff] }
 0x157   : > { %v3425_v22 = vmul.f32 %v7193_v17, %v7433_v26  ;;  %v1631_v52 = vmul.f32 %v7016_v14, %v10363_v40  ;;  %v3985_v1 = vadd.f32 %v7266_v34, %v3946_v19  ;;  %v3039_v15 = vsel %vm671_vm2, %v3037_v20, %v3038_v28 }
 0x158   : > { %v2584_v51 = vadd.f32 %v2480_v7, %v2339_v12  ;;  %v3284_v35 = vsel %vm917_vm3, %v3282_v16, %v3283_v41  ;;  %v3596_v2 = vrot.slane %v3496_v23, 1  ;;  %v3597_v58 = vrot.slane %v7453_v37, 1 }
 0x159   : > { %v3841_v45 = vrot.slane %v3741_v63, 2  ;;  %v1663_v57 = vadd.f32 %v1631_v52, %v10367_v0  ;;  %4072 = vst.msk [vmem:[#allocation3 + $0x39] sm:$0xff] %vm326_vm0, %v3985_v1  ;;  %v3842_v43 = vrot.slane %v7460_v24, 2  ;;  %v2308_v40 = vmul.f32 %v7085_v38, %v7168_v48  ;;  %v7509_v1 = vld [vmem:[%s10026_s2 + $0x3] ss:$0 sm:$0xff] }
 0x15a   : > { %v2829_v59 = vadd.f32 %v2725_v25, %v2584_v51  ;;  %v2380_v6 = vmul.f32 %v7090_v21, %v7220_v61  ;;  %v2625_v9 = vmul.f32 %v7111_v8, %v7220_v61  ;;  %v2939_v32 = vmul.f32 %v7131_v11, %v7356_v62 }
 0x15b   : > { %v1908_v60 = vadd.f32 %v6306_v30, %v1663_v57  ;;  %v3184_v13 = vmul.f32 %v7143_v56, %v7356_v62  ;;  %v10368_v20 = vrot.slane %v6262_v50, 2  ;;  %v3498_v61 = vmul.f32 %v7166_v10, %v7472_v33 }
 0x15c   : > { %v2898_v4 = vadd.f32 %v2866_v18, %v2829_v59  ;;  %v2481_v46 = vrot.slane %v2380_v6, 1  ;;  %v2726_v16 = vrot.slane %v2625_v9, 2  ;;  %v3598_v30 = vsel %vm671_vm2, %v3596_v2, %v3597_v58 }
 0x15d   : > { %v2050_v48 = vsel %vm917_vm3, %v2047_v39, %v10368_v20  ;;  %v3040_v23 = vrot.slane %v2939_v32, 1  ;;  %v3843_v19 = vsel %vm917_vm3, %v3841_v45, %v3842_v43  ;;  %v2867_v50 = vmul.f32 %v7152_v31, %v7309_v42  ;;  %v7524_v45 = vld [vmem:[%s10026_s2 + $0x5] ss:$0 sm:$0xff] }
 0x15e   : > { %v3143_v12 = vadd.f32 %v3039_v15, %v2898_v4  ;;  %v2153_v18 = vadd.f32 %v2050_v48, %v1908_v60  ;;  %v3285_v55 = vrot.slane %v3184_v13, 2  ;;  %v3426_v39 = vmul.f32 %v7193_v17, %v7435_v53  ;;  %v10370_v4 = vld [vmem:[#allocation10_spill] sm:$0xff]  ;;  %v10371_v48 = vld [vmem:[#allocation52_spill] sm:$0xff] }
 0x15f   : > { %v2482_v24 = vsel %vm671_vm2, %v2479_v47, %v2481_v46  ;;  %v2727_v51 = vsel %vm917_vm3, %v2724_v29, %v2726_v16  ;;  %v3599_v25 = vrot.slane %v3498_v61, 1  ;;  %v3743_v52 = vmul.f32 %v7179_v3, %v7472_v33  ;;  %v10373_v61 = vld [vmem:[#allocation11_spill] sm:$0xff] }
 0x160   : > { %v3388_v7 = vadd.f32 %v3284_v35, %v3143_v12  ;;  %v2340_v63 = vadd.f32 %v2308_v40, %v2153_v18  ;;  %v1073_v15 = vmul.f32 %v7509_v1, %v10360_v5  ;;  %v7516_v35 = vld [vmem:[%s10026_s2 + $0x4] ss:$0 sm:$0xff]  ;;  %v3041_v59 = vsel %vm671_vm2, %v3038_v28, %v3040_v23  ;;  %v10369_v40 = vld [vmem:[#allocation53_spill] sm:$0xff] }
 0x161   : > { %v1145_v47 = vmul.f32 %v7516_v35, %v10360_v5  ;;  %v1390_v0 = vmul.f32 %v7524_v45, %v10360_v5  ;;  %v3286_v57 = vsel %vm917_vm3, %v3283_v41, %v3285_v55  ;;  %v1949_v20 = vmul.f32 %v6863_v27, %v10370_v4 }
 0x162   : > { %v3457_v29 = vadd.f32 %v3425_v22, %v3388_v7  ;;  %v2585_v2 = vadd.f32 %v2482_v24, %v2340_v63  ;;  %v1105_v6 = vadd.f32 %v1073_v15, %v10369_v40  ;;  %v7533_v22 = vld [vmem:[%s10026_s2 + $0x7] ss:$0 sm:$0xff]  ;;  %v3844_v5 = vrot.slane %v3743_v52, 2  ;;  %v10374_v7 = vld [vmem:[#allocation54_spill] sm:$0xff] }
 0x163   : > { %v1247_v9 = vrot.slane %v1145_v47, 1  ;;  %v1704_v28 = vmul.f32 %v7533_v22, %v10370_v4  ;;  %v1492_v13 = vrot.slane %v1390_v0, 2  ;;  %v10372_v41 = vrot.slane %v10371_v48, 1 }
 0x164   : > { %v3702_v60 = vadd.f32 %v3598_v30, %v3457_v29  ;;  %v2830_v32 = vadd.f32 %v2727_v51, %v2585_v2  ;;  %v1632_v16 = vmul.f32 %v7016_v14, %v10370_v4  ;;  %v7546_v12 = vmul.f32 %v6863_v27, %v10373_v61 }
 0x165   : > { %v1249_v46 = vsel %vm671_vm2, %v1247_v9, %v10372_v41  ;;  %v1806_v55 = vrot.slane %v1704_v28, 1  ;;  %v10375_v63 = vrot.slane %v10374_v7, 2  ;;  %v2051_v51 = vrot.slane %v1949_v20, 2 }
 0x166   : > { %v3947_v18 = vadd.f32 %v3843_v19, %v3702_v60  ;;  %v2899_v23 = vadd.f32 %v2867_v50, %v2830_v32  ;;  %v1350_v30 = vadd.f32 %v1249_v46, %v1105_v6  ;;  %v2052_v52 = vrot.slane %v7546_v12, 2 }
 0x167   : > { %v1494_v24 = vsel %vm917_vm3, %v1492_v13, %v10375_v63  ;;  %v2381_v15 = vmul.f32 %v7090_v21, %v7307_v44  ;;  %v7557_v27 = vmul.f32 %v7090_v21, %v7309_v42  ;;  %v3600_v19 = vsel %vm671_vm2, %v3597_v58, %v3599_v25 }
 0x168   : > { %v3986_v47 = vadd.f32 %v7266_v34, %v3947_v18  ;;  %v3144_v29 = vadd.f32 %v3041_v59, %v2899_v23  ;;  %v1595_v2 = vadd.f32 %v1494_v24, %v1350_v30  ;;  %v3845_v50 = vsel %vm917_vm3, %v3842_v43, %v3844_v5 }
 0x169   : > { %v2626_v0 = vmul.f32 %v7111_v8, %v7307_v44  ;;  %v7567_v40 = vmul.f32 %v7111_v8, %v7309_v42  ;;  %v10376_v9 = vrot.slane %v6313_v49, 1  ;;  %v2309_v37 = vmul.f32 %v7085_v38, %v7307_v44  ;;  %v7586_v49 = vld [vmem:[#allocation2 + $0x80] sm:$0xff] }
 0x16a   : > { %4073 = vst.msk [vmem:[#allocation3 + $0x49] sm:$0xff] %vm326_vm0, %v3986_v47  ;;  %v3389_v59 = vadd.f32 %v3286_v57, %v3144_v29  ;;  %v1664_v6 = vadd.f32 %v1632_v16, %v1595_v2  ;;  %v2053_v58 = vsel %vm917_vm3, %v2051_v51, %v2052_v52  ;;  %v2483_v43 = vrot.slane %v2381_v15, 1  ;;  %v7584_v57 = vld [vmem:[#allocation2 + $0x78] sm:$0xff] }
 0x16b   : > { %v1808_v28 = vsel %vm671_vm2, %v1806_v55, %v10376_v9  ;;  %v2940_v25 = vmul.f32 %v7131_v11, %v7433_v26  ;;  %v7582_v60 = vmul.f32 %v7131_v11, %v7435_v53  ;;  %v2484_v44 = vrot.slane %v7557_v27, 1 }
 0x16c   : > { %v3458_v32 = vadd.f32 %v3426_v39, %v3389_v59  ;;  %v1909_v13 = vadd.f32 %v1808_v28, %v1664_v6  ;;  %v3185_v20 = vmul.f32 %v7143_v56, %v7433_v26  ;;  %v2728_v5 = vrot.slane %v2626_v0, 2 }
 0x16d   : > { %v2729_v48 = vrot.slane %v7567_v40, 2  ;;  %v3042_v41 = vrot.slane %v2940_v25, 1  ;;  %v3186_v46 = vmul.f32 %v7143_v56, %v7435_v53  ;;  %v3043_v23 = vrot.slane %v7582_v60, 1  ;;  %v7622_v60 = vld [vmem:[#allocation2 + $0x88] sm:$0x3] }
 0x16e   : > { %v3703_v16 = vadd.f32 %v3600_v19, %v3458_v32  ;;  %v2154_v18 = vadd.f32 %v2053_v58, %v1909_v13  ;;  %v3287_v30 = vrot.slane %v3185_v20, 2  ;;  %v2868_v39 = vmul.f32 %v7152_v31, %v7433_v26  ;;  %v10378_v13 = vld [vmem:[#allocation64_spill] sm:$0xff] }
 0x16f   : > { %v3288_v55 = vrot.slane %v3186_v46, 2  ;;  %v3499_v7 = vmul.f32 %v7166_v10, %v7584_v57  ;;  %v7601_v63 = vmul.f32 %v7166_v10, %v7586_v49  ;;  %v3744_v15 = vmul.f32 %v7179_v3, %v7584_v57 }
 0x170   : > { %v3948_v24 = vadd.f32 %v3845_v50, %v3703_v16  ;;  %v2341_v51 = vadd.f32 %v2309_v37, %v2154_v18  ;;  %v7607_v47 = vmul.f32 %v7179_v3, %v7586_v49  ;;  %v2485_v29 = vsel %vm671_vm2, %v2483_v43, %v2484_v44  ;;  %v10377_v37 = vld [vmem:[#allocation55_spill] sm:$0xff] }
 0x171   : > { %v2730_v2 = vsel %vm917_vm3, %v2728_v5, %v2729_v48  ;;  %v3427_v27 = vmul.f32 %v7193_v17, %v7584_v57  ;;  %v1633_v19 = vmul.f32 %v7016_v14, %v10373_v61  ;;  %v3044_v40 = vsel %vm671_vm2, %v3042_v41, %v3043_v23  ;;  %v10379_v18 = vld [vmem:[#allocation59_spill] sm:$0xff] }
 0x172   : > { %v3987_v50 = vadd.f32 %v7266_v34, %v3948_v24  ;;  %v2586_v0 = vadd.f32 %v2485_v29, %v2341_v51  ;;  %v3289_v59 = vsel %vm917_vm3, %v3287_v30, %v3288_v55  ;;  %v3601_v6 = vrot.slane %v3499_v7, 1 }
 0x173   : > { %v3602_v9 = vrot.slane %v7601_v63, 1  ;;  %v3846_v28 = vrot.slane %v3744_v15, 2  ;;  %v1665_v58 = vadd.f32 %v1633_v19, %v10377_v37  ;;  %v3847_v25 = vrot.slane %v7607_v47, 2 }
 0x174   : > { %4074 = vst.msk [vmem:[#allocation3 + $0x51] sm:$0xff] %vm326_vm0, %v3987_v50  ;;  %v2831_v43 = vadd.f32 %v2730_v2, %v2586_v0  ;;  %v2383_v61 = vmul.f32 %v7090_v21, %v7356_v62  ;;  %v2628_v32 = vmul.f32 %v7111_v8, %v7356_v62  ;;  %v2310_v5 = vmul.f32 %v7085_v38, %v7309_v42 }
 0x175   : > { %v1910_v20 = vadd.f32 %v10378_v13, %v1665_v58  ;;  %v2942_v41 = vmul.f32 %v7131_v11, %v7472_v33  ;;  %v3187_v46 = vmul.f32 %v7143_v56, %v7472_v33  ;;  %v10380_v30 = vrot.slane %v10379_v18, 2  ;;  %v7668_v18 = vld [vmem:[%s10026_s2 + $0x8] ss:$0 sm:$0xff] }
 0x176   : > { %v2900_v16 = vadd.f32 %v2868_v39, %v2831_v43  ;;  %v2486_v63 = vrot.slane %v2383_v61, 1  ;;  %v2731_v62 = vrot.slane %v2628_v32, 2  ;;  %v3603_v24 = vsel %vm671_vm2, %v3601_v6, %v3602_v9 }
 0x177   : > { %v2055_v7 = vsel %vm917_vm3, %v2052_v52, %v10380_v30  ;;  %v3045_v15 = vrot.slane %v2942_v41, 1  ;;  %v3501_v42 = vmul.f32 %v7166_v10, %v7622_v60  ;;  %v3848_v39 = vsel %vm917_vm3, %v3846_v28, %v3847_v25  ;;  %v10383_v30 = vld [vmem:[#allocation56_spill] sm:$0xff] }
 0x178   : > { %v2155_v51 = vadd.f32 %v2055_v7, %v1910_v20  ;;  %v3145_v29 = vadd.f32 %v3044_v40, %v2900_v16  ;;  %v2869_v2 = vmul.f32 %v7152_v31, %v7435_v53  ;;  %v3290_v12 = vrot.slane %v3187_v46, 2  ;;  %v10382_v46 = vld [vmem:[#allocation13_spill] sm:$0xff] }
 0x179   : > { %v2487_v52 = vsel %vm671_vm2, %v2484_v44, %v2486_v63  ;;  %v2732_v50 = vsel %vm917_vm3, %v2729_v48, %v2731_v62  ;;  %v3428_v0 = vmul.f32 %v7193_v17, %v7586_v49  ;;  %v3746_v40 = vmul.f32 %v7179_v3, %v7622_v60  ;;  %v10385_v63 = vld [vmem:[#allocation14_spill] sm:$0xff] }
 0x17a   : > { %v2342_v19 = vadd.f32 %v2310_v5, %v2155_v51  ;;  %v3390_v6 = vadd.f32 %v3289_v59, %v3145_v29  ;;  %v1075_v37 = vmul.f32 %v7509_v1, %v10370_v4  ;;  %v1148_v28 = vmul.f32 %v7516_v35, %v10370_v4  ;;  %v10381_v59 = vld [vmem:[#allocation57_spill] sm:$0xff] }
 0x17b   : > { %v3046_v43 = vsel %vm671_vm2, %v3043_v23, %v3045_v15  ;;  %v3604_v61 = vrot.slane %v3501_v42, 1  ;;  %v1393_v44 = vmul.f32 %v7524_v45, %v10370_v4  ;;  %v3291_v32 = vsel %vm917_vm3, %v3288_v55, %v3290_v12 }
 0x17c   : > { %v2587_v58 = vadd.f32 %v2487_v52, %v2342_v19  ;;  %v3459_v48 = vadd.f32 %v3427_v27, %v3390_v6  ;;  %v1107_v13 = vadd.f32 %v1075_v37, %v10381_v59  ;;  %v1252_v20 = vrot.slane %v1148_v28, 1  ;;  %v10386_v19 = vld [vmem:[#allocation58_spill] sm:$0xff] }
 0x17d   : > { %v1497_v41 = vrot.slane %v1393_v44, 2  ;;  %v1707_v16 = vmul.f32 %v7533_v22, %v10382_v46  ;;  %v1952_v23 = vmul.f32 %v7668_v18, %v10382_v46  ;;  %v3849_v27 = vrot.slane %v3746_v40, 2 }
 0x17e   : > { %v2832_v5 = vadd.f32 %v2732_v50, %v2587_v58  ;;  %v3704_v4 = vadd.f32 %v3603_v24, %v3459_v48  ;;  %v10384_v55 = vrot.slane %v10383_v30, 1  ;;  %v7677_v62 = vmul.f32 %v7668_v18, %v10385_v63  ;;  %v7716_v30 = vld [vmem:[#allocation2 + $0x98] sm:$0xff] }
 0x17f   : > { %v3605_v15 = vsel %vm671_vm2, %v3602_v9, %v3604_v61  ;;  %v1811_v29 = vrot.slane %v1707_v16, 1  ;;  %v10387_v52 = vrot.slane %v10386_v19, 2  ;;  %v1634_v24 = vmul.f32 %v7016_v14, %v10382_v46 }
 0x180   : > { %v1254_v7 = vsel %vm671_vm2, %v1252_v20, %v10384_v55  ;;  %v2901_v51 = vadd.f32 %v2869_v2, %v2832_v5  ;;  %v3949_v12 = vadd.f32 %v3848_v39, %v3704_v4  ;;  %v2384_v6 = vmul.f32 %v7090_v21, %v7433_v26 }
 0x181   : > { %v1352_v42 = vadd.f32 %v1254_v7, %v1107_v13  ;;  %v1499_v50 = vsel %vm917_vm3, %v1497_v41, %v10387_v52  ;;  %v2056_v28 = vrot.slane %v1952_v23, 2  ;;  %v7689_v2 = vmul.f32 %v7090_v21, %v7435_v53  ;;  %v7710_v41 = vld [vmem:[#allocation2 + $0x90] sm:$0xff] }
 0x182   : > { %v3146_v40 = vadd.f32 %v3046_v43, %v2901_v51  ;;  %v3988_v9 = vadd.f32 %v7266_v34, %v3949_v12  ;;  %v10388_v39 = vrot.slane %v6377_v54, 1  ;;  %v2057_v61 = vrot.slane %v7677_v62, 2 }
 0x183   : > { %v1597_v37 = vadd.f32 %v1499_v50, %v1352_v42  ;;  %v2629_v14 = vmul.f32 %v7111_v8, %v7433_v26  ;;  %v2488_v43 = vrot.slane %v2384_v6, 1  ;;  %v7700_v59 = vmul.f32 %v7111_v8, %v7435_v53 }
 0x184   : > { %v1813_v58 = vsel %vm671_vm2, %v1811_v29, %v10388_v39  ;;  %v3391_v44 = vadd.f32 %v3291_v32, %v3146_v40  ;;  %4075 = vst.msk [vmem:[#allocation3 + $0x61] sm:$0xff] %vm326_vm0, %v3988_v9  ;;  %v2489_v13 = vrot.slane %v7689_v2, 1  ;;  %v2943_v54 = vmul.f32 %v7131_v11, %v7584_v57 }
 0x185   : > { %v1666_v48 = vadd.f32 %v1634_v24, %v1597_v37  ;;  %v2733_v20 = vrot.slane %v2629_v14, 2  ;;  %v7708_v5 = vmul.f32 %v7131_v11, %v7586_v49  ;;  %v3850_v16 = vsel %vm917_vm3, %v3847_v25, %v3849_v27  ;;  %v7752_v37 = vld [vmem:[%s10026_s2 + $0x6] ss:$0 sm:$0xff] }
 0x186   : > { %v3460_v32 = vadd.f32 %v3428_v0, %v3391_v44  ;;  %v2734_v4 = vrot.slane %v7700_v59, 2  ;;  %v2058_v55 = vsel %vm917_vm3, %v2056_v28, %v2057_v61  ;;  %v2311_v7 = vmul.f32 %v7085_v38, %v7433_v26  ;;  %v10389_v59 = vld [vmem:[#allocation60_spill] sm:$0xff] }
 0x187   : > { %v1911_v23 = vadd.f32 %v1813_v58, %v1666_v48  ;;  %v3047_v62 = vrot.slane %v2943_v54, 1  ;;  %v3048_v51 = vrot.slane %v7708_v5, 1  ;;  %v3188_v47 = vmul.f32 %v7143_v56, %v7584_v57 }
 0x188   : > { %v3705_v42 = vadd.f32 %v3605_v15, %v3460_v32  ;;  %v7726_v25 = vmul.f32 %v7143_v56, %v7586_v49  ;;  %v2490_v0 = vsel %vm671_vm2, %v2488_v43, %v2489_v13  ;;  %v2735_v27 = vsel %vm917_vm3, %v2733_v20, %v2734_v4  ;;  %v7762_v32 = vld [vmem:[#allocation2 + $0xa0] sm:$0x3] }
 0x189   : > { %v2156_v29 = vadd.f32 %v2058_v55, %v1911_v23  ;;  %v2870_v26 = vmul.f32 %v7152_v31, %v7584_v57  ;;  %v3502_v15 = vmul.f32 %v7166_v10, %v7710_v41  ;;  %v7738_v52 = vmul.f32 %v7166_v10, %v7716_v30  ;;  %v10390_v55 = vld [vmem:[#allocation65_spill] sm:$0xff] }
 0x18a   : > { %v3950_v12 = vadd.f32 %v3850_v16, %v3705_v42  ;;  %v3747_v50 = vmul.f32 %v7179_v3, %v7710_v41  ;;  %v3049_v24 = vsel %vm671_vm2, %v3047_v62, %v3048_v51  ;;  %v3429_v6 = vmul.f32 %v7193_v17, %v7710_v41 }
 0x18b   : > { %v2343_v19 = vadd.f32 %v2311_v7, %v2156_v29  ;;  %v7747_v40 = vmul.f32 %v7179_v3, %v7716_v30  ;;  %v1635_v28 = vmul.f32 %v7752_v37, %v10385_v63  ;;  %v3292_v58 = vrot.slane %v3188_v47, 2 }
 0x18c   : > { %v3989_v9 = vadd.f32 %v7266_v34, %v3950_v12  ;;  %v3293_v14 = vrot.slane %v7726_v25, 2  ;;  %v3606_v44 = vrot.slane %v3502_v15, 1  ;;  %v3607_v48 = vrot.slane %v7738_v52, 1 }
 0x18d   : > { %v2588_v39 = vadd.f32 %v2490_v0, %v2343_v19  ;;  %v3851_v43 = vrot.slane %v3747_v50, 2  ;;  %v1667_v20 = vadd.f32 %v1635_v28, %v10389_v59  ;;  %v3852_v5 = vrot.slane %v7747_v40, 2  ;;  %v10393_v59 = vld [vmem:[#allocation15_spill] sm:$0xff] }
 0x18e   : > { %4076 = vst.msk [vmem:[#allocation3 + $0x69] sm:$0xff] %vm326_vm0, %v3989_v9  ;;  %v2386_v63 = vmul.f32 %v7090_v21, %v7472_v33  ;;  %v2631_v16 = vmul.f32 %v7111_v8, %v7472_v33  ;;  %v10391_v7 = vrot.slane %v10390_v55, 2  ;;  %v2312_v42 = vmul.f32 %v7085_v38, %v7435_v53  ;;  %v10392_v9 = vld [vmem:[#allocation63_spill] sm:$0xff] }
 0x18f   : > { %v2833_v54 = vadd.f32 %v2735_v27, %v2588_v39  ;;  %v1912_v23 = vadd.f32 %v6431_v36, %v1667_v20  ;;  %v2945_v29 = vmul.f32 %v7131_v11, %v7622_v60  ;;  %v3190_v21 = vmul.f32 %v7143_v56, %v7622_v60 }
 0x190   : > { %v2060_v62 = vsel %vm917_vm3, %v2057_v61, %v10391_v7  ;;  %v2491_v25 = vrot.slane %v2386_v63, 1  ;;  %v2736_v0 = vrot.slane %v2631_v16, 2  ;;  %v3294_v8 = vsel %vm917_vm3, %v3292_v58, %v3293_v14 }
 0x191   : > { %v2902_v47 = vadd.f32 %v2870_v26, %v2833_v54  ;;  %v2157_v33 = vadd.f32 %v2060_v62, %v1912_v23  ;;  %v3050_v36 = vrot.slane %v2945_v29, 1  ;;  %v3504_v27 = vmul.f32 %v7166_v10, %v7762_v32  ;;  %v10397_v29 = vld [vmem:[#allocation62_spill] sm:$0xff] }
 0x192   : > { %v3608_v15 = vsel %vm671_vm2, %v3606_v44, %v3607_v48  ;;  %v3853_v38 = vsel %vm917_vm3, %v3851_v43, %v3852_v5  ;;  %v2871_v11 = vmul.f32 %v7152_v31, %v7586_v49  ;;  %v2492_v56 = vsel %vm671_vm2, %v2489_v13, %v2491_v25 }
 0x193   : > { %v3147_v61 = vadd.f32 %v3049_v24, %v2902_v47  ;;  %v2344_v53 = vadd.f32 %v2312_v42, %v2157_v33  ;;  %v3295_v26 = vrot.slane %v3190_v21, 2  ;;  %v3430_v12 = vmul.f32 %v7193_v17, %v7716_v30 }
 0x194   : > { %v2737_v19 = vsel %vm917_vm3, %v2734_v4, %v2736_v0  ;;  %v1077_v52 = vmul.f32 %v7509_v1, %v10382_v46  ;;  %v1151_v50 = vmul.f32 %v7516_v35, %v10382_v46  ;;  %v3051_v31 = vsel %vm671_vm2, %v3048_v51, %v3050_v36  ;;  %v10394_v51 = vld [vmem:[#allocation61_spill] sm:$0xff]  ;;  %v7824_v36 = vld [vmem:[%s10027_s3 + $0x1] ss:$0 sm:$0xff] }
 0x195   : > { %v3392_v10 = vadd.f32 %v3294_v8, %v3147_v61  ;;  %v2589_v24 = vadd.f32 %v2492_v56, %v2344_v53  ;;  %v3609_v28 = vrot.slane %v3504_v27, 1  ;;  %v1396_v2 = vmul.f32 %v7524_v45, %v10382_v46 }
 0x196   : > { %v3749_v17 = vmul.f32 %v7179_v3, %v7762_v32  ;;  %v1109_v39 = vadd.f32 %v1077_v52, %v10392_v9  ;;  %v1257_v4 = vrot.slane %v1151_v50, 1  ;;  %v3296_v44 = vsel %vm917_vm3, %v3293_v14, %v3295_v26  ;;  %v10399_v26 = vld [vmem:[#allocation70_spill] sm:$0xff] }
 0x197   : > { %v3461_v13 = vadd.f32 %v3429_v6, %v3392_v10  ;;  %v2834_v58 = vadd.f32 %v2737_v19, %v2589_v24  ;;  %v1502_v43 = vrot.slane %v1396_v2, 2  ;;  %v1710_v20 = vmul.f32 %v7533_v22, %v10393_v59  ;;  %v10396_v6 = vld [vmem:[#allocation16_spill] sm:$0xff] }
 0x198   : > { %v10395_v63 = vrot.slane %v10394_v51, 1  ;;  %v1955_v46 = vmul.f32 %v7668_v18, %v10393_v59  ;;  %v7813_v3 = vmul.f32 %v7668_v18, %v10396_v6  ;;  %v3610_v55 = vsel %vm671_vm2, %v3607_v48, %v3609_v28  ;;  %v7853_v28 = vld [vmem:[%s10027_s3 + $0x4] ss:$0 sm:$0xff] }
 0x199   : > { %v3706_v54 = vadd.f32 %v3608_v15, %v3461_v13  ;;  %v2903_v23 = vadd.f32 %v2871_v11, %v2834_v58  ;;  %v1816_v7 = vrot.slane %v1710_v20, 1  ;;  %v3854_v42 = vrot.slane %v3749_v17, 2  ;;  %v7857_v13 = vld [vmem:[#allocation2 + $0xa8] sm:$0xff]  ;;  %v7864_v58 = vld [vmem:[#allocation2 + $0xb0] sm:$0xff] }
 0x19a   : > { %v1259_v16 = vsel %vm671_vm2, %v1257_v4, %v10395_v63  ;;  %v10398_v47 = vrot.slane %v10397_v29, 2  ;;  %v1636_v0 = vmul.f32 %v7752_v37, %v10393_v59  ;;  %v2061_v33 = vrot.slane %v1955_v46, 2 }
 0x19b   : > { %v1354_v14 = vadd.f32 %v1259_v16, %v1109_v39  ;;  %v3951_v62 = vadd.f32 %v3853_v38, %v3706_v54  ;;  %v3148_v21 = vadd.f32 %v3051_v31, %v2903_v23  ;;  %v2387_v48 = vmul.f32 %v7824_v36, %v7584_v57  ;;  %v7837_v38 = vld [vmem:[%s10027_s3 + $0x2] ss:$0 sm:$0xff]  ;;  %v7893_v16 = vld [vmem:[%s10027_s3 + $0x3] ss:$0 sm:$0xff] }
 0x19c   : > { %v1504_v25 = vsel %vm917_vm3, %v1502_v43, %v10398_v47  ;;  %v2062_v61 = vrot.slane %v7813_v3, 2  ;;  %v7832_v15 = vmul.f32 %v7824_v36, %v7586_v49  ;;  %v2632_v11 = vmul.f32 %v7837_v38, %v7584_v57 }
 0x19d   : > { %v1599_v8 = vadd.f32 %v1504_v25, %v1354_v14  ;;  %v3990_v27 = vadd.f32 %v7266_v34, %v3951_v62  ;;  %v3393_v53 = vadd.f32 %v3296_v44, %v3148_v21  ;;  %v10400_v10 = vrot.slane %v10399_v26, 1  ;;  %v7919_v21 = vld [vmem:[%s10027_s3 + $0x8] ss:$0 sm:$0xff] }
 0x19e   : > { %v7846_v52 = vmul.f32 %v7837_v38, %v7586_v49  ;;  %v2493_v50 = vrot.slane %v2387_v48, 1  ;;  %v2494_v24 = vrot.slane %v7832_v15, 1  ;;  %v2738_v31 = vrot.slane %v2632_v11, 2  ;;  %v7931_v11 = vld [vmem:[%s10027_s3 + $0x6] ss:$0 sm:$0xff] }
 0x19f   : > { %v1668_v56 = vadd.f32 %v1636_v0, %v1599_v8  ;;  %v1818_v19 = vsel %vm671_vm2, %v1816_v7, %v10400_v10  ;;  %4077 = vst.msk [vmem:[#allocation3 + $0x79] sm:$0xff] %vm326_vm0, %v3990_v27  ;;  %v2946_v2 = vmul.f32 %v7853_v28, %v7710_v41  ;;  %v3462_v17 = vadd.f32 %v3430_v12, %v3393_v53  ;;  %v7875_v12 = vld [vmem:[%s10027_s3 + $0x5] ss:$0 sm:$0xff]  ;;  %v7904_v7 = vld [vmem:[%s10027_s3 + $0x7] ss:$0 sm:$0xff] }
 0x1a0   : > { %v2739_v39 = vrot.slane %v7846_v52, 2  ;;  %v7862_v4 = vmul.f32 %v7853_v28, %v7716_v30  ;;  %v3855_v44 = vsel %vm917_vm3, %v3852_v5, %v3854_v42  ;;  %v2063_v43 = vsel %vm917_vm3, %v2061_v33, %v2062_v61  ;;  %v7886_v5 = vld [vmem:[%s10027_s3] ss:$0 sm:$0xff]  ;;  %v10405_v52 = vld [vmem:[#allocation69_spill] sm:$0xff] }
 0x1a1   : > { %v1913_v9 = vadd.f32 %v1818_v19, %v1668_v56  ;;  %v3191_v20 = vmul.f32 %v7875_v12, %v7710_v41  ;;  %v7881_v54 = vmul.f32 %v7875_v12, %v7716_v30  ;;  %v3707_v51 = vadd.f32 %v3610_v55, %v3462_v17 }
 0x1a2   : > { %v2313_v63 = vmul.f32 %v7886_v5, %v7584_v57  ;;  %v2872_v46 = vmul.f32 %v7893_v16, %v7710_v41  ;;  %v2495_v23 = vsel %vm671_vm2, %v2493_v50, %v2494_v24  ;;  %v3052_v55 = vrot.slane %v2946_v2, 1  ;;  %v10401_v2 = vld [vmem:[#allocation66_spill] sm:$0xff] }
 0x1a3   : > { %v2158_v40 = vadd.f32 %v2063_v43, %v1913_v9  ;;  %v3053_v14 = vrot.slane %v7862_v4, 1  ;;  %v3505_v57 = vmul.f32 %v7904_v7, %v7857_v13  ;;  %v3952_v62 = vadd.f32 %v3855_v44, %v3707_v51  ;;  %v7942_v9 = vld [vmem:[#allocation2 + $0xb8] sm:$0x3]  ;;  %v10402_v51 = vld [vmem:[#allocation76_spill] sm:$0xff] }
 0x1a4   : > { %v2740_v29 = vsel %vm917_vm3, %v2738_v31, %v2739_v39  ;;  %v7913_v47 = vmul.f32 %v7904_v7, %v7864_v58  ;;  %v3297_v25 = vrot.slane %v3191_v20, 2  ;;  %v3298_v0 = vrot.slane %v7881_v54, 2 }
 0x1a5   : > { %v2345_v42 = vadd.f32 %v2313_v63, %v2158_v40  ;;  %v3750_v8 = vmul.f32 %v7919_v21, %v7857_v13  ;;  %v7925_v33 = vmul.f32 %v7919_v21, %v7864_v58  ;;  %v3991_v48 = vadd.f32 %v7266_v34, %v3952_v62 }
 0x1a6   : > { %v3431_v53 = vmul.f32 %v7931_v11, %v7857_v13  ;;  %v1637_v56 = vmul.f32 %v7752_v37, %v10396_v6  ;;  %v3054_v26 = vsel %vm671_vm2, %v3052_v55, %v3053_v14  ;;  %v3611_v10 = vrot.slane %v3505_v57, 1  ;;  %v10403_v57 = vld [vmem:[#allocation71_spill] sm:$0xff] }
 0x1a7   : > { %v2590_v27 = vadd.f32 %v2495_v23, %v2345_v42  ;;  %v3612_v19 = vrot.slane %v7913_v47, 1  ;;  %v3856_v50 = vrot.slane %v3750_v8, 2  ;;  %4078 = vst.msk [vmem:[#allocation3 + $0x81] sm:$0xff] %vm326_vm0, %v3991_v48  ;;  %v3857_v31 = vrot.slane %v7925_v33, 2 }
 0x1a8   : > { %v1669_v17 = vadd.f32 %v1637_v56, %v10401_v2  ;;  %v2389_v4 = vmul.f32 %v7824_v36, %v7622_v60  ;;  %v3299_v6 = vsel %vm917_vm3, %v3297_v25, %v3298_v0  ;;  %v2314_v44 = vmul.f32 %v7886_v5, %v7586_v49 }
 0x1a9   : > { %v2835_v34 = vadd.f32 %v2740_v29, %v2590_v27  ;;  %v2634_v43 = vmul.f32 %v7837_v38, %v7622_v60  ;;  %v2948_v20 = vmul.f32 %v7853_v28, %v7762_v32  ;;  %v3193_v23 = vmul.f32 %v7875_v12, %v7762_v32 }
 0x1aa   : > { %v1914_v40 = vadd.f32 %v10402_v51, %v1669_v17  ;;  %v2496_v63 = vrot.slane %v2389_v4, 1  ;;  %v3613_v55 = vsel %vm671_vm2, %v3611_v10, %v3612_v19  ;;  %v10404_v62 = vrot.slane %v10403_v57, 2 }
 0x1ab   : > { %v2904_v54 = vadd.f32 %v2872_v46, %v2835_v34  ;;  %v2741_v42 = vrot.slane %v2634_v43, 2  ;;  %v3507_v60 = vmul.f32 %v7904_v7, %v7942_v9  ;;  %v3858_v46 = vsel %vm917_vm3, %v3856_v50, %v3857_v31  ;;  %v10406_v43 = vld [vmem:[#allocation17_spill] sm:$0xff] }
 0x1ac   : > { %v2065_v49 = vsel %vm917_vm3, %v2062_v61, %v10404_v62  ;;  %v3055_v25 = vrot.slane %v2948_v20, 1  ;;  %v2497_v8 = vsel %vm671_vm2, %v2494_v24, %v2496_v63  ;;  %v2873_v33 = vmul.f32 %v7893_v16, %v7716_v30  ;;  %v10407_v63 = vld [vmem:[#allocation18_spill] sm:$0xff]  ;;  %v10410_v62 = vld [vmem:[#allocation68_spill] sm:$0xff] }
 0x1ad   : > { %v3149_v29 = vadd.f32 %v3054_v26, %v2904_v54  ;;  %v2159_v47 = vadd.f32 %v2065_v49, %v1914_v40  ;;  %v3300_v48 = vrot.slane %v3193_v23, 2  ;;  %v3432_v3 = vmul.f32 %v7931_v11, %v7864_v58  ;;  %v10408_v23 = vld [vmem:[#allocation67_spill] sm:$0xff] }
 0x1ae   : > { %v2742_v56 = vsel %vm917_vm3, %v2739_v39, %v2741_v42  ;;  %v1079_v26 = vmul.f32 %v7509_v1, %v10393_v59  ;;  %v3614_v10 = vrot.slane %v3507_v60, 1  ;;  %v3752_v15 = vmul.f32 %v7919_v21, %v7942_v9 }
 0x1af   : > { %v3394_v61 = vadd.f32 %v3299_v6, %v3149_v29  ;;  %v2346_v27 = vadd.f32 %v2314_v44, %v2159_v47  ;;  %v1154_v24 = vmul.f32 %v7516_v35, %v10393_v59  ;;  %v1399_v50 = vmul.f32 %v7524_v45, %v10393_v59 }
 0x1b0   : > { %v3056_v17 = vsel %vm671_vm2, %v3053_v14, %v3055_v25  ;;  %v1111_v4 = vadd.f32 %v1079_v26, %v10405_v52  ;;  %v3301_v39 = vsel %vm917_vm3, %v3298_v0, %v3300_v48  ;;  %v1713_v20 = vmul.f32 %v7533_v22, %v10406_v43  ;;  %v10412_v52 = vld [vmem:[#allocation77_spill] sm:$0xff] }
 0x1b1   : > { %v3463_v34 = vadd.f32 %v3431_v53, %v3394_v61  ;;  %v2591_v2 = vadd.f32 %v2497_v8, %v2346_v27  ;;  %v1262_v6 = vrot.slane %v1154_v24, 1  ;;  %v1507_v44 = vrot.slane %v1399_v50, 2  ;;  %v8011_v61 = vld [vmem:[%s10028_s4] ss:$0 sm:$0xff] }
 0x1b2   : > { %v1958_v40 = vmul.f32 %v7668_v18, %v10406_v43  ;;  %v7992_v59 = vmul.f32 %v7668_v18, %v10407_v63  ;;  %v3615_v14 = vsel %vm671_vm2, %v3612_v19, %v3614_v10  ;;  %v3859_v53 = vrot.slane %v3752_v15, 2 }
 0x1b3   : > { %v3708_v54 = vadd.f32 %v3613_v55, %v3463_v34  ;;  %v2836_v51 = vadd.f32 %v2742_v56, %v2591_v2  ;;  %v10409_v57 = vrot.slane %v10408_v23, 1  ;;  %v10411_v49 = vrot.slane %v10410_v62, 2 }
 0x1b4   : > { %v1821_v47 = vrot.slane %v1713_v20, 1  ;;  %v2066_v25 = vrot.slane %v1958_v40, 2  ;;  %v2067_v8 = vrot.slane %v7992_v59, 2  ;;  %v2390_v48 = vmul.f32 %v7824_v36, %v7710_v41  ;;  %v8041_v20 = vld [vmem:[#allocation2 + $0xc8] sm:$0xff] }
 0x1b5   : > { %v1264_v0 = vsel %vm671_vm2, %v1262_v6, %v10409_v57  ;;  %v1509_v42 = vsel %vm917_vm3, %v1507_v44, %v10411_v49  ;;  %v3953_v55 = vadd.f32 %v3858_v46, %v3708_v54  ;;  %v2905_v60 = vadd.f32 %v2873_v33, %v2836_v51 }
 0x1b6   : > { %v1356_v29 = vadd.f32 %v1264_v0, %v1111_v4  ;;  %v8006_v19 = vmul.f32 %v7824_v36, %v7716_v30  ;;  %v1638_v56 = vmul.f32 %v7752_v37, %v10406_v43  ;;  %v3860_v26 = vsel %vm917_vm3, %v3857_v31, %v3859_v53 }
 0x1b7   : > { %v3992_v46 = vadd.f32 %v8011_v61, %v3953_v55  ;;  %v3150_v33 = vadd.f32 %v3056_v17, %v2905_v60  ;;  %v2315_v10 = vmul.f32 %v7886_v5, %v7710_v41  ;;  %v2635_v15 = vmul.f32 %v7837_v38, %v7710_v41 }
 0x1b8   : > { %v1601_v27 = vadd.f32 %v1509_v42, %v1356_v29  ;;  %v8023_v24 = vmul.f32 %v7837_v38, %v7716_v30  ;;  %v2498_v2 = vrot.slane %v2390_v48, 1  ;;  %v2499_v17 = vrot.slane %v8006_v19, 1 }
 0x1b9   : > { %4079 = vst.msk [vmem:[#allocation3 + $0x91] sm:$0xff] %vm326_vm0, %v3992_v46  ;;  %v3395_v50 = vadd.f32 %v3301_v39, %v3150_v33  ;;  %v10413_v4 = vrot.slane %v10412_v52, 1  ;;  %v2068_v6 = vsel %vm917_vm3, %v2066_v25, %v2067_v8  ;;  %v2949_v41 = vmul.f32 %v7853_v28, %v7857_v13  ;;  %v8039_v39 = vld [vmem:[#allocation2 + $0xc0] sm:$0xff] }
 0x1ba   : > { %v1670_v34 = vadd.f32 %v1638_v56, %v1601_v27  ;;  %v8037_v44 = vmul.f32 %v7853_v28, %v7864_v58  ;;  %v3194_v40 = vmul.f32 %v7875_v12, %v7857_v13  ;;  %v8047_v53 = vmul.f32 %v7875_v12, %v7864_v58 }
 0x1bb   : > { %v1823_v31 = vsel %vm671_vm2, %v1821_v47, %v10413_v4  ;;  %v3464_v54 = vadd.f32 %v3432_v3, %v3395_v50  ;;  %v2743_v23 = vrot.slane %v2635_v15, 2  ;;  %v2744_v57 = vrot.slane %v8023_v24, 2  ;;  %v10414_v4 = vld [vmem:[#allocation72_spill] sm:$0xff] }
 0x1bc   : > { %v1915_v51 = vadd.f32 %v1823_v31, %v1670_v34  ;;  %v3057_v0 = vrot.slane %v2949_v41, 1  ;;  %v3058_v62 = vrot.slane %v8037_v44, 1  ;;  %v2500_v3 = vsel %vm671_vm2, %v2498_v2, %v2499_v17 }
 0x1bd   : > { %v3709_v49 = vadd.f32 %v3615_v14, %v3464_v54  ;;  %v2874_v55 = vmul.f32 %v7893_v16, %v7857_v13  ;;  %v3302_v60 = vrot.slane %v3194_v40, 2  ;;  %v3508_v29 = vmul.f32 %v7904_v7, %v8039_v39  ;;  %v10415_v40 = vld [vmem:[#allocation84_spill] sm:$0xff] }
 0x1be   : > { %v2160_v42 = vadd.f32 %v2068_v6, %v1915_v51  ;;  %v8060_v47 = vmul.f32 %v7904_v7, %v8041_v20  ;;  %v3753_v25 = vmul.f32 %v7919_v21, %v8039_v39  ;;  %v3303_v46 = vrot.slane %v8047_v53, 2  ;;  %v8079_v6 = vld [vmem:[#allocation2 + $0xd0] sm:$0x3] }
 0x1bf   : > { %v3954_v14 = vadd.f32 %v3860_v26, %v3709_v49  ;;  %v8067_v33 = vmul.f32 %v7919_v21, %v8041_v20  ;;  %v2745_v27 = vsel %vm917_vm3, %v2743_v23, %v2744_v57  ;;  %v3059_v56 = vsel %vm671_vm2, %v3057_v0, %v3058_v62 }
 0x1c0   : > { %v2347_v48 = vadd.f32 %v2315_v10, %v2160_v42  ;;  %v3433_v15 = vmul.f32 %v7931_v11, %v8039_v39  ;;  %v1639_v24 = vmul.f32 %v7752_v37, %v10407_v63  ;;  %v3616_v10 = vrot.slane %v3508_v29, 1 }
 0x1c1   : > { %v3993_v50 = vadd.f32 %v8011_v61, %v3954_v14  ;;  %v3617_v34 = vrot.slane %v8060_v47, 1  ;;  %v3861_v2 = vrot.slane %v3753_v25, 2  ;;  %v3862_v52 = vrot.slane %v8067_v33, 2 }
 0x1c2   : > { %v2592_v26 = vadd.f32 %v2500_v3, %v2347_v48  ;;  %v1671_v31 = vadd.f32 %v1639_v24, %v10414_v4  ;;  %v2392_v41 = vmul.f32 %v7824_v36, %v7762_v32  ;;  %v3304_v63 = vsel %vm917_vm3, %v3302_v60, %v3303_v46  ;;  %v10416_v3 = vld [vmem:[#allocation78_spill] sm:$0xff] }
 0x1c3   : > { %4080 = vst.msk [vmem:[#allocation3 + $0x99] sm:$0xff] %vm326_vm0, %v3993_v50  ;;  %v2316_v54 = vmul.f32 %v7886_v5, %v7716_v30  ;;  %v2637_v51 = vmul.f32 %v7837_v38, %v7762_v32  ;;  %v2951_v0 = vmul.f32 %v7853_v28, %v7942_v9  ;;  %v3196_v49 = vmul.f32 %v7875_v12, %v7942_v9 }
 0x1c4   : > { %v2837_v44 = vadd.f32 %v2745_v27, %v2592_v26  ;;  %v1916_v53 = vadd.f32 %v10415_v40, %v1671_v31  ;;  %v2501_v23 = vrot.slane %v2392_v41, 1  ;;  %v10417_v29 = vrot.slane %v10416_v3, 2 }
 0x1c5   : > { %v2746_v30 = vrot.slane %v2637_v51, 2  ;;  %v3510_v32 = vmul.f32 %v7904_v7, %v8079_v6  ;;  %v3618_v47 = vsel %vm671_vm2, %v3616_v10, %v3617_v34  ;;  %v3863_v25 = vsel %vm917_vm3, %v3861_v2, %v3862_v52 }
 0x1c6   : > { %v2906_v42 = vadd.f32 %v2874_v55, %v2837_v44  ;;  %v2070_v60 = vsel %vm917_vm3, %v2067_v8, %v10417_v29  ;;  %v3060_v48 = vrot.slane %v2951_v0, 1  ;;  %v2875_v55 = vmul.f32 %v7893_v16, %v7864_v58  ;;  %v10420_v0 = vld [vmem:[#allocation22_spill] sm:$0xff] }
 0x1c7   : > { %v2161_v14 = vadd.f32 %v2070_v60, %v1916_v53  ;;  %v3305_v24 = vrot.slane %v3196_v49, 2  ;;  %v3434_v59 = vmul.f32 %v7931_v11, %v8041_v20  ;;  %v2502_v50 = vsel %vm671_vm2, %v2499_v17, %v2501_v23 }
 0x1c8   : > { %v3151_v27 = vadd.f32 %v3059_v56, %v2906_v42  ;;  %v2747_v26 = vsel %vm917_vm3, %v2744_v57, %v2746_v30  ;;  %v1081_v10 = vmul.f32 %v7509_v1, %v10406_v43  ;;  %v3619_v4 = vrot.slane %v3510_v32, 1 }
 0x1c9   : > { %v2348_v8 = vadd.f32 %v2316_v54, %v2161_v14  ;;  %v3755_v56 = vmul.f32 %v7919_v21, %v8079_v6  ;;  %v1157_v31 = vmul.f32 %v7516_v35, %v10406_v43  ;;  %v3061_v44 = vsel %vm671_vm2, %v3058_v62, %v3060_v48  ;;  %v10418_v54 = vld [vmem:[#allocation75_spill] sm:$0xff] }
 0x1ca   : > { %v3396_v2 = vadd.f32 %v3304_v63, %v3151_v27  ;;  %v1113_v19 = vadd.f32 %v1081_v10, %v10418_v54  ;;  %v1402_v17 = vmul.f32 %v7524_v45, %v10406_v43  ;;  %v3306_v51 = vsel %vm917_vm3, %v3303_v46, %v3305_v24  ;;  %v10419_v63 = vld [vmem:[#allocation21_spill] sm:$0xff] }
 0x1cb   : > { %v2593_v41 = vadd.f32 %v2502_v50, %v2348_v8  ;;  %v1267_v1 = vrot.slane %v1157_v31, 1  ;;  %v1716_v40 = vmul.f32 %v7533_v22, %v10419_v63  ;;  %v1961_v35 = vmul.f32 %v7668_v18, %v10419_v63  ;;  %v10421_v43 = vld [vmem:[#allocation73_spill] sm:$0xff]  ;;  %v10423_v22 = vld [vmem:[#allocation74_spill] sm:$0xff] }
 0x1cc   : > { %v3465_v57 = vadd.f32 %v3433_v15, %v3396_v2  ;;  %v1512_v23 = vrot.slane %v1402_v17, 2  ;;  %v8130_v62 = vmul.f32 %v7668_v18, %v10420_v0  ;;  %v3620_v42 = vsel %vm671_vm2, %v3617_v34, %v3619_v4  ;;  %v8173_v17 = vld [vmem:[#allocation2 + $0xd8] sm:$0xff] }
 0x1cd   : > { %v2838_v53 = vadd.f32 %v2747_v26, %v2593_v41  ;;  %v3864_v45 = vrot.slane %v3755_v56, 2  ;;  %v10422_v15 = vrot.slane %v10421_v43, 1  ;;  %v10424_v60 = vrot.slane %v10423_v22, 2  ;;  %v10425_v56 = vld [vmem:[#allocation83_spill] sm:$0xff] }
 0x1ce   : > { %v3710_v49 = vadd.f32 %v3618_v47, %v3465_v57  ;;  %v1826_v32 = vrot.slane %v1716_v40, 1  ;;  %v2071_v48 = vrot.slane %v1961_v35, 2  ;;  %v2072_v27 = vrot.slane %v8130_v62, 2  ;;  %v8175_v57 = vld [vmem:[#allocation2 + $0xe0] sm:$0xff] }
 0x1cf   : > { %v1269_v46 = vsel %vm671_vm2, %v1267_v1, %v10422_v15  ;;  %v2907_v3 = vadd.f32 %v2875_v55, %v2838_v53  ;;  %v1514_v30 = vsel %vm917_vm3, %v1512_v23, %v10424_v60  ;;  %v2393_v47 = vmul.f32 %v7824_v36, %v7857_v13 }
 0x1d0   : > { %v1358_v29 = vadd.f32 %v1269_v46, %v1113_v19  ;;  %v3955_v14 = vadd.f32 %v3863_v25, %v3710_v49  ;;  %v1640_v8 = vmul.f32 %v7752_v37, %v10419_v63  ;;  %v8146_v55 = vmul.f32 %v7824_v36, %v7864_v58 }
 0x1d1   : > { %v3152_v34 = vadd.f32 %v3061_v44, %v2907_v3  ;;  %v3865_v25 = vsel %vm917_vm3, %v3862_v52, %v3864_v45  ;;  %v2638_v26 = vmul.f32 %v7837_v38, %v7857_v13  ;;  %v8156_v10 = vmul.f32 %v7837_v38, %v7864_v58 }
 0x1d2   : > { %v1603_v24 = vadd.f32 %v1514_v30, %v1358_v29  ;;  %v3994_v50 = vadd.f32 %v8011_v61, %v3955_v14  ;;  %v10426_v31 = vrot.slane %v10425_v56, 1  ;;  %v2317_v44 = vmul.f32 %v7886_v5, %v7857_v13 }
 0x1d3   : > { %v3397_v2 = vadd.f32 %v3306_v51, %v3152_v34  ;;  %v2073_v33 = vsel %vm917_vm3, %v2071_v48, %v2072_v27  ;;  %v2503_v52 = vrot.slane %v2393_v47, 1  ;;  %v2952_v54 = vmul.f32 %v7853_v28, %v8039_v39 }
 0x1d4   : > { %v1672_v4 = vadd.f32 %v1640_v8, %v1603_v24  ;;  %v1828_v41 = vsel %vm671_vm2, %v1826_v32, %v10426_v31  ;;  %4081 = vst.msk [vmem:[#allocation3 + $0xa9] sm:$0xff] %vm326_vm0, %v3994_v50  ;;  %v8171_v19 = vmul.f32 %v7853_v28, %v8041_v20  ;;  %v2504_v1 = vrot.slane %v8146_v55, 1 }
 0x1d5   : > { %v3466_v51 = vadd.f32 %v3434_v59, %v3397_v2  ;;  %v3197_v40 = vmul.f32 %v7875_v12, %v8039_v39  ;;  %v2748_v53 = vrot.slane %v2638_v26, 2  ;;  %v2749_v23 = vrot.slane %v8156_v10, 2  ;;  %v10427_v2 = vld [vmem:[#allocation82_spill] sm:$0xff] }
 0x1d6   : > { %v1917_v13 = vadd.f32 %v1828_v41, %v1672_v4  ;;  %v3062_v35 = vrot.slane %v2952_v54, 1  ;;  %v8183_v49 = vmul.f32 %v7875_v12, %v8041_v20  ;;  %v3063_v15 = vrot.slane %v8171_v19, 1  ;;  %v8214_v41 = vld [vmem:[#allocation2 + $0xe8] sm:$0x3] }
 0x1d7   : > { %v3711_v45 = vadd.f32 %v3620_v42, %v3466_v51  ;;  %v3307_v46 = vrot.slane %v3197_v40, 2  ;;  %v2876_v59 = vmul.f32 %v7893_v16, %v8039_v39  ;;  %v3511_v29 = vmul.f32 %v7904_v7, %v8173_v17  ;;  %v10429_v40 = vld [vmem:[#allocation86_spill] sm:$0xff] }
 0x1d8   : > { %v2162_v43 = vadd.f32 %v2073_v33, %v1917_v13  ;;  %v3308_v3 = vrot.slane %v8183_v49, 2  ;;  %v8193_v22 = vmul.f32 %v7904_v7, %v8175_v57  ;;  %v3756_v42 = vmul.f32 %v7919_v21, %v8173_v17  ;;  %v10428_v33 = vld [vmem:[#allocation91_spill] sm:$0xff] }
 0x1d9   : > { %v3956_v60 = vadd.f32 %v3865_v25, %v3711_v45  ;;  %v8199_v32 = vmul.f32 %v7919_v21, %v8175_v57  ;;  %v2505_v14 = vsel %vm671_vm2, %v2503_v52, %v2504_v1  ;;  %v2750_v48 = vsel %vm917_vm3, %v2748_v53, %v2749_v23 }
 0x1da   : > { %v2349_v30 = vadd.f32 %v2317_v44, %v2162_v43  ;;  %v3435_v47 = vmul.f32 %v7931_v11, %v8173_v17  ;;  %v1641_v34 = vmul.f32 %v7752_v37, %v10420_v0  ;;  %v3064_v55 = vsel %vm671_vm2, %v3062_v35, %v3063_v15 }
 0x1db   : > { %v3995_v24 = vadd.f32 %v8011_v61, %v3956_v60  ;;  %v3309_v50 = vsel %vm917_vm3, %v3307_v46, %v3308_v3  ;;  %v3621_v25 = vrot.slane %v3511_v29, 1  ;;  %v3622_v26 = vrot.slane %v8193_v22, 1 }
 0x1dc   : > { %v2594_v8 = vadd.f32 %v2505_v14, %v2349_v30  ;;  %v3866_v10 = vrot.slane %v3756_v42, 2  ;;  %v1673_v4 = vadd.f32 %v1641_v34, %v10427_v2  ;;  %v3867_v31 = vrot.slane %v8199_v32, 2  ;;  %v8249_v34 = vld [vmem:[%s10026_s2 + $0x3] ss:$0 sm:$0xff] }
 0x1dd   : > { %4082 = vst.msk [vmem:[#allocation3 + $0xb1] sm:$0xff] %vm326_vm0, %v3995_v24  ;;  %v2395_v0 = vmul.f32 %v7824_v36, %v7942_v9  ;;  %v2640_v44 = vmul.f32 %v7837_v38, %v7942_v9  ;;  %v2318_v54 = vmul.f32 %v7886_v5, %v7864_v58  ;;  %v2954_v19 = vmul.f32 %v7853_v28, %v8079_v6 }
 0x1de   : > { %v2839_v56 = vadd.f32 %v2750_v48, %v2594_v8  ;;  %v1918_v52 = vadd.f32 %v10428_v33, %v1673_v4  ;;  %v3199_v51 = vmul.f32 %v7875_v12, %v8079_v6  ;;  %v10430_v53 = vrot.slane %v10429_v40, 2 }
 0x1df   : > { %v2506_v49 = vrot.slane %v2395_v0, 1  ;;  %v2751_v9 = vrot.slane %v2640_v44, 2  ;;  %v3623_v45 = vsel %vm671_vm2, %v3621_v25, %v3622_v26  ;;  %v3065_v46 = vrot.slane %v2954_v19, 1  ;;  %v8264_v25 = vld [vmem:[%s10026_s2 + $0x5] ss:$0 sm:$0xff] }
 0x1e0   : > { %v2908_v13 = vadd.f32 %v2876_v59, %v2839_v56  ;;  %v2075_v35 = vsel %vm917_vm3, %v2072_v27, %v10430_v53  ;;  %v3513_v58 = vmul.f32 %v7904_v7, %v8214_v41  ;;  %v3868_v59 = vsel %vm917_vm3, %v3866_v10, %v3867_v31  ;;  %v10431_v56 = vld [vmem:[#allocation80_spill] sm:$0xff]  ;;  %v10435_v53 = vld [vmem:[#allocation25_spill] sm:$0xff] }
 0x1e1   : > { %v2163_v43 = vadd.f32 %v2075_v35, %v1918_v52  ;;  %v2877_v22 = vmul.f32 %v7893_v16, %v8041_v20  ;;  %v3310_v62 = vrot.slane %v3199_v51, 2  ;;  %v2507_v27 = vsel %vm671_vm2, %v2504_v1, %v2506_v49  ;;  %v8256_v1 = vld [vmem:[%s10026_s2 + $0x4] ss:$0 sm:$0xff] }
 0x1e2   : > { %v3153_v29 = vadd.f32 %v3064_v55, %v2908_v13  ;;  %v2752_v30 = vsel %vm917_vm3, %v2749_v23, %v2751_v9  ;;  %v3436_v42 = vmul.f32 %v7931_v11, %v8175_v57  ;;  %v3758_v48 = vmul.f32 %v7919_v21, %v8214_v41  ;;  %v10433_v13 = vld [vmem:[#allocation79_spill] sm:$0xff] }
 0x1e3   : > { %v2350_v60 = vadd.f32 %v2318_v54, %v2163_v43  ;;  %v1083_v24 = vmul.f32 %v8249_v34, %v10419_v63  ;;  %v1160_v23 = vmul.f32 %v8256_v1, %v10419_v63  ;;  %v3066_v55 = vsel %vm671_vm2, %v3063_v15, %v3065_v46  ;;  %v8273_v15 = vld [vmem:[%s10026_s2 + $0x7] ss:$0 sm:$0xff]  ;;  %v10432_v54 = vld [vmem:[#allocation24_spill] sm:$0xff] }
 0x1e4   : > { %v3398_v14 = vadd.f32 %v3309_v50, %v3153_v29  ;;  %v3624_v50 = vrot.slane %v3513_v58, 1  ;;  %v1405_v10 = vmul.f32 %v8264_v25, %v10419_v63  ;;  %v3311_v4 = vsel %vm917_vm3, %v3308_v3, %v3310_v62  ;;  %v10436_v29 = vld [vmem:[#allocation81_spill] sm:$0xff] }
 0x1e5   : > { %v2595_v8 = vadd.f32 %v2507_v27, %v2350_v60  ;;  %v1115_v0 = vadd.f32 %v1083_v24, %v10431_v56  ;;  %v1272_v44 = vrot.slane %v1160_v23, 1  ;;  %v1719_v19 = vmul.f32 %v8273_v15, %v10432_v54 }
 0x1e6   : > { %v3467_v2 = vadd.f32 %v3435_v47, %v3398_v14  ;;  %v1517_v52 = vrot.slane %v1405_v10, 2  ;;  %v1964_v51 = vmul.f32 %v7668_v18, %v10432_v54  ;;  %v3869_v47 = vrot.slane %v3758_v48, 2 }
 0x1e7   : > { %v2840_v33 = vadd.f32 %v2752_v30, %v2595_v8  ;;  %v10434_v3 = vrot.slane %v10433_v13, 1  ;;  %v8284_v35 = vmul.f32 %v7668_v18, %v10435_v53  ;;  %v3625_v9 = vsel %vm671_vm2, %v3622_v26, %v3624_v50  ;;  %v8323_v13 = vld [vmem:[#allocation2 + $0xf8] sm:$0xff] }
 0x1e8   : > { %v3712_v63 = vadd.f32 %v3623_v45, %v3467_v2  ;;  %v1831_v46 = vrot.slane %v1719_v19, 1  ;;  %v10437_v62 = vrot.slane %v10436_v29, 2  ;;  %v1642_v45 = vmul.f32 %v7752_v37, %v10432_v54 }
 0x1e9   : > { %v1274_v40 = vsel %vm671_vm2, %v1272_v44, %v10434_v3  ;;  %v2909_v49 = vadd.f32 %v2877_v22, %v2840_v33  ;;  %v2396_v27 = vmul.f32 %v7824_v36, %v8039_v39  ;;  %v2076_v18 = vrot.slane %v1964_v51, 2 }
 0x1ea   : > { %v1360_v43 = vadd.f32 %v1274_v40, %v1115_v0  ;;  %v3957_v58 = vadd.f32 %v3868_v59, %v3712_v63  ;;  %v1519_v60 = vsel %vm917_vm3, %v1517_v52, %v10437_v62  ;;  %v8296_v22 = vmul.f32 %v7824_v36, %v8041_v20  ;;  %v10438_v59 = vld [vmem:[#allocation90_spill] sm:$0xff]  ;;  %v8317_v52 = vld [vmem:[#allocation2 + $0xf0] sm:$0xff] }
 0x1eb   : > { %v3154_v30 = vadd.f32 %v3066_v55, %v2909_v49  ;;  %v10439_v48 = vrot.slane %v10438_v59, 1  ;;  %v2077_v23 = vrot.slane %v8284_v35, 2  ;;  %v2641_v8 = vmul.f32 %v7837_v38, %v8039_v39 }
 0x1ec   : > { %v1605_v14 = vadd.f32 %v1519_v60, %v1360_v43  ;;  %v3996_v26 = vadd.f32 %v8011_v61, %v3957_v58  ;;  %v2508_v55 = vrot.slane %v2396_v27, 1  ;;  %v8307_v2 = vmul.f32 %v7837_v38, %v8041_v20 }
 0x1ed   : > { %v1833_v24 = vsel %vm671_vm2, %v1831_v46, %v10439_v48  ;;  %v3399_v50 = vadd.f32 %v3311_v4, %v3154_v30  ;;  %v2509_v56 = vrot.slane %v8296_v22, 1  ;;  %v2753_v0 = vrot.slane %v2641_v8, 2 }
 0x1ee   : > { %v1674_v10 = vadd.f32 %v1642_v45, %v1605_v14  ;;  %4083 = vst.msk [vmem:[#allocation3 + $0xc1] sm:$0xff] %vm326_vm0, %v3996_v26  ;;  %v2955_v44 = vmul.f32 %v7853_v28, %v8173_v17  ;;  %v8315_v33 = vmul.f32 %v7853_v28, %v8175_v57  ;;  %v3870_v19 = vsel %vm917_vm3, %v3867_v31, %v3869_v47 }
 0x1ef   : > { %v3468_v4 = vadd.f32 %v3436_v42, %v3399_v50  ;;  %v2754_v63 = vrot.slane %v8307_v2, 2  ;;  %v2078_v3 = vsel %vm917_vm3, %v2076_v18, %v2077_v23  ;;  %v2319_v40 = vmul.f32 %v7886_v5, %v8039_v39  ;;  %v10440_v50 = vld [vmem:[#allocation89_spill] sm:$0xff] }
 0x1f0   : > { %v1919_v51 = vadd.f32 %v1833_v24, %v1674_v10  ;;  %v3067_v35 = vrot.slane %v2955_v44, 1  ;;  %v3068_v49 = vrot.slane %v8315_v33, 1  ;;  %v3200_v32 = vmul.f32 %v7875_v12, %v8173_v17  ;;  %v10441_v33 = vld [vmem:[#allocation98_spill] sm:$0xff] }
 0x1f1   : > { %v3713_v43 = vadd.f32 %v3625_v9, %v3468_v4  ;;  %v3201_v31 = vmul.f32 %v7875_v12, %v8175_v57  ;;  %v2510_v42 = vsel %vm671_vm2, %v2508_v55, %v2509_v56  ;;  %v2755_v47 = vsel %vm917_vm3, %v2753_v0, %v2754_v63  ;;  %v8359_v0 = vld [vmem:[#allocation2 + $0x100] sm:$0x3] }
 0x1f2   : > { %v2164_v46 = vadd.f32 %v2078_v3, %v1919_v51  ;;  %v2878_v58 = vmul.f32 %v7893_v16, %v8173_v17  ;;  %v3514_v39 = vmul.f32 %v7904_v7, %v8317_v52  ;;  %v8341_v9 = vmul.f32 %v7904_v7, %v8323_v13 }
 0x1f3   : > { %v3958_v29 = vadd.f32 %v3870_v19, %v3713_v43  ;;  %v3759_v60 = vmul.f32 %v7919_v21, %v8317_v52  ;;  %v3069_v45 = vsel %vm671_vm2, %v3067_v35, %v3068_v49  ;;  %v3437_v27 = vmul.f32 %v7931_v11, %v8317_v52  ;;  %v10442_v19 = vld [vmem:[#allocation92_spill] sm:$0xff] }
 0x1f4   : > { %v2351_v62 = vadd.f32 %v2319_v40, %v2164_v46  ;;  %v8350_v30 = vmul.f32 %v7919_v21, %v8323_v13  ;;  %v1643_v14 = vmul.f32 %v7752_v37, %v10435_v53  ;;  %v3312_v26 = vrot.slane %v3200_v32, 2 }
 0x1f5   : > { %v3997_v18 = vadd.f32 %v8011_v61, %v3958_v29  ;;  %v3313_v59 = vrot.slane %v3201_v31, 2  ;;  %v3626_v48 = vrot.slane %v3514_v39, 1  ;;  %v3627_v24 = vrot.slane %v8341_v9, 1 }
 0x1f6   : > { %v2596_v22 = vadd.f32 %v2510_v42, %v2351_v62  ;;  %v3871_v8 = vrot.slane %v3759_v60, 2  ;;  %v1675_v10 = vadd.f32 %v1643_v14, %v10440_v50  ;;  %v3872_v2 = vrot.slane %v8350_v30, 2 }
 0x1f7   : > { %4084 = vst.msk [vmem:[#allocation3 + $0xc9] sm:$0xff] %vm326_vm0, %v3997_v18  ;;  %v2398_v53 = vmul.f32 %v7824_v36, %v8079_v6  ;;  %v2643_v44 = vmul.f32 %v7837_v38, %v8079_v6  ;;  %v10443_v51 = vrot.slane %v10442_v19, 2  ;;  %v2320_v40 = vmul.f32 %v7886_v5, %v8041_v20 }
 0x1f8   : > { %v2841_v55 = vadd.f32 %v2755_v47, %v2596_v22  ;;  %v1920_v4 = vadd.f32 %v10441_v33, %v1675_v10  ;;  %v2957_v35 = vmul.f32 %v7853_v28, %v8214_v41  ;;  %v3202_v31 = vmul.f32 %v7875_v12, %v8214_v41 }
 0x1f9   : > { %v2080_v3 = vsel %vm917_vm3, %v2077_v23, %v10443_v51  ;;  %v2511_v46 = vrot.slane %v2398_v53, 1  ;;  %v2756_v32 = vrot.slane %v2643_v44, 2  ;;  %v3314_v6 = vsel %vm917_vm3, %v3312_v26, %v3313_v59  ;;  %v10444_v53 = vld [vmem:[#allocation85_spill] sm:$0xff]  ;;  %v10445_v51 = vld [vmem:[#allocation27_spill] sm:$0xff] }
 0x1fa   : > { %v2910_v43 = vadd.f32 %v2878_v58, %v2841_v55  ;;  %v2165_v42 = vadd.f32 %v2080_v3, %v1920_v4  ;;  %v3070_v47 = vrot.slane %v2957_v35, 1  ;;  %v3516_v39 = vmul.f32 %v7904_v7, %v8359_v0 }
 0x1fb   : > { %v3628_v29 = vsel %vm671_vm2, %v3626_v48, %v3627_v24  ;;  %v3873_v20 = vsel %vm917_vm3, %v3871_v8, %v3872_v2  ;;  %v2879_v58 = vmul.f32 %v7893_v16, %v8175_v57  ;;  %v2512_v9 = vsel %vm671_vm2, %v2509_v56, %v2511_v46  ;;  %v10448_v46 = vld [vmem:[#allocation28_spill] sm:$0xff] }
 0x1fc   : > { %v3155_v23 = vadd.f32 %v3069_v45, %v2910_v43  ;;  %v2352_v62 = vadd.f32 %v2320_v40, %v2165_v42  ;;  %v3315_v60 = vrot.slane %v3202_v31, 2  ;;  %v3438_v14 = vmul.f32 %v7931_v11, %v8323_v13 }
 0x1fd   : > { %v2757_v22 = vsel %vm917_vm3, %v2754_v63, %v2756_v32  ;;  %v1085_v45 = vmul.f32 %v8249_v34, %v10432_v54  ;;  %v1163_v26 = vmul.f32 %v8256_v1, %v10432_v54  ;;  %v3071_v8 = vsel %vm671_vm2, %v3068_v49, %v3070_v47  ;;  %v10446_v49 = vld [vmem:[#allocation87_spill] sm:$0xff] }
 0x1fe   : > { %v3400_v18 = vadd.f32 %v3314_v6, %v3155_v23  ;;  %v2597_v48 = vadd.f32 %v2512_v9, %v2352_v62  ;;  %v3629_v50 = vrot.slane %v3516_v39, 1  ;;  %v1408_v56 = vmul.f32 %v8264_v25, %v10432_v54  ;;  %v8407_v54 = vld [vmem:[%s10026_s2 + $0x8] ss:$0 sm:$0xff] }
 0x1ff   : > { %v3761_v55 = vmul.f32 %v7919_v21, %v8359_v0  ;;  %v1117_v44 = vadd.f32 %v1085_v45, %v10444_v53  ;;  %v1277_v63 = vrot.slane %v1163_v26, 1  ;;  %v3316_v4 = vsel %vm917_vm3, %v3313_v59, %v3315_v60  ;;  %v10449_v23 = vld [vmem:[#allocation88_spill] sm:$0xff] }
 0x200   : > { %v3469_v10 = vadd.f32 %v3437_v27, %v3400_v18  ;;  %v2842_v33 = vadd.f32 %v2757_v22, %v2597_v48  ;;  %v1522_v19 = vrot.slane %v1408_v56, 2  ;;  %v1722_v3 = vmul.f32 %v8273_v15, %v10445_v51 }
 0x201   : > { %v10447_v35 = vrot.slane %v10446_v49, 1  ;;  %v1967_v27 = vmul.f32 %v8407_v54, %v10445_v51  ;;  %v8413_v59 = vmul.f32 %v8407_v54, %v10448_v46  ;;  %v3630_v31 = vsel %vm671_vm2, %v3627_v24, %v3629_v50  ;;  %v8449_v49 = vld [vmem:[#allocation2 + $0x110] sm:$0xff] }
 0x202   : > { %v3714_v40 = vadd.f32 %v3628_v29, %v3469_v10  ;;  %v2911_v32 = vadd.f32 %v2879_v58, %v2842_v33  ;;  %v1836_v42 = vrot.slane %v1722_v3, 1  ;;  %v3874_v39 = vrot.slane %v3761_v55, 2  ;;  %v8442_v33 = vld [vmem:[#allocation2 + $0x108] sm:$0xff] }
 0x203   : > { %v1279_v43 = vsel %vm671_vm2, %v1277_v63, %v10447_v35  ;;  %v10450_v29 = vrot.slane %v10449_v23, 2  ;;  %v1644_v9 = vmul.f32 %v7752_v37, %v10445_v51  ;;  %v2081_v22 = vrot.slane %v1967_v27, 2  ;;  %v10451_v37 = vld [vmem:[#allocation96_spill] sm:$0xff] }
 0x204   : > { %v1362_v6 = vadd.f32 %v1279_v43, %v1117_v44  ;;  %v3959_v47 = vadd.f32 %v3873_v20, %v3714_v40  ;;  %v3156_v60 = vadd.f32 %v3071_v8, %v2911_v32  ;;  %v2399_v45 = vmul.f32 %v7824_v36, %v8173_v17 }
 0x205   : > { %v1524_v62 = vsel %vm917_vm3, %v1522_v19, %v10450_v29  ;;  %v2082_v24 = vrot.slane %v8413_v59, 2  ;;  %v8427_v20 = vmul.f32 %v7824_v36, %v8175_v57  ;;  %v2644_v26 = vmul.f32 %v7837_v38, %v8173_v17 }
 0x206   : > { %v1607_v18 = vadd.f32 %v1524_v62, %v1362_v6  ;;  %v3998_v58 = vadd.f32 %v8011_v61, %v3959_v47  ;;  %v3401_v48 = vadd.f32 %v3316_v4, %v3156_v60  ;;  %v10452_v8 = vrot.slane %v10451_v37, 1 }
 0x207   : > { %v8436_v10 = vmul.f32 %v7837_v38, %v8175_v57  ;;  %v2513_v55 = vrot.slane %v2399_v45, 1  ;;  %v2514_v53 = vrot.slane %v8427_v20, 1  ;;  %v2758_v44 = vrot.slane %v2644_v26, 2  ;;  %v8487_v26 = vld [vmem:[%s10026_s2 + $0x6] ss:$0 sm:$0xff] }
 0x208   : > { %v1676_v50 = vadd.f32 %v1644_v9, %v1607_v18  ;;  %v1838_v56 = vsel %vm671_vm2, %v1836_v42, %v10452_v8  ;;  %4085 = vst.msk [vmem:[#allocation3 + $0xd9] sm:$0xff] %vm326_vm0, %v3998_v58  ;;  %v2958_v63 = vmul.f32 %v7853_v28, %v8317_v52  ;;  %v3470_v4 = vadd.f32 %v3438_v14, %v3401_v48 }
 0x209   : > { %v2759_v3 = vrot.slane %v8436_v10, 2  ;;  %v8447_v40 = vmul.f32 %v7853_v28, %v8323_v13  ;;  %v3875_v35 = vsel %vm917_vm3, %v3872_v2, %v3874_v39  ;;  %v2083_v43 = vsel %vm917_vm3, %v2081_v22, %v2082_v24 }
 0x20a   : > { %v1921_v19 = vadd.f32 %v1838_v56, %v1676_v50  ;;  %v3203_v14 = vmul.f32 %v7875_v12, %v8317_v52  ;;  %v8461_v27 = vmul.f32 %v7875_v12, %v8323_v13  ;;  %v3715_v32 = vadd.f32 %v3630_v31, %v3470_v4  ;;  %v8495_v4 = vld [vmem:[#allocation2 + $0x118] sm:$0x3] }
 0x20b   : > { %v2321_v42 = vmul.f32 %v7886_v5, %v8173_v17  ;;  %v2880_v30 = vmul.f32 %v7893_v16, %v8317_v52  ;;  %v2515_v2 = vsel %vm671_vm2, %v2513_v55, %v2514_v53  ;;  %v3072_v47 = vrot.slane %v2958_v63, 1 }
 0x20c   : > { %v2166_v6 = vadd.f32 %v2083_v43, %v1921_v19  ;;  %v3073_v39 = vrot.slane %v8447_v40, 1  ;;  %v3517_v23 = vmul.f32 %v7904_v7, %v8442_v33  ;;  %v3960_v29 = vadd.f32 %v3875_v35, %v3715_v32 }
 0x20d   : > { %v2760_v9 = vsel %vm917_vm3, %v2758_v44, %v2759_v3  ;;  %v3518_v31 = vmul.f32 %v7904_v7, %v8449_v49  ;;  %v3317_v60 = vrot.slane %v3203_v14, 2  ;;  %v3318_v17 = vrot.slane %v8461_v27, 2  ;;  %v10453_v44 = vld [vmem:[#allocation97_spill] sm:$0xff] }
 0x20e   : > { %v2353_v62 = vadd.f32 %v2321_v42, %v2166_v6  ;;  %v3762_v18 = vmul.f32 %v7919_v21, %v8442_v33  ;;  %v8479_v22 = vmul.f32 %v7919_v21, %v8449_v49  ;;  %v3999_v45 = vadd.f32 %v8011_v61, %v3960_v29  ;;  %v10454_v27 = vld [vmem:[#allocation105_spill] sm:$0xff] }
 0x20f   : > { %v3439_v20 = vmul.f32 %v7931_v11, %v8442_v33  ;;  %v1645_v48 = vmul.f32 %v8487_v26, %v10448_v46  ;;  %v3074_v50 = vsel %vm671_vm2, %v3072_v47, %v3073_v39  ;;  %v3631_v37 = vrot.slane %v3517_v23, 1 }
 0x210   : > { %v2598_v58 = vadd.f32 %v2515_v2, %v2353_v62  ;;  %v3632_v8 = vrot.slane %v3518_v31, 1  ;;  %v3876_v56 = vrot.slane %v3762_v18, 2  ;;  %4086 = vst.msk [vmem:[#allocation3 + $0xe1] sm:$0xff] %vm326_vm0, %v3999_v45  ;;  %v3877_v55 = vrot.slane %v8479_v22, 2  ;;  %v10455_v2 = vld [vmem:[#allocation100_spill] sm:$0xff] }
 0x211   : > { %v1677_v63 = vadd.f32 %v1645_v48, %v10453_v44  ;;  %v2401_v19 = vmul.f32 %v7824_v36, %v8214_v41  ;;  %v3319_v40 = vsel %vm917_vm3, %v3317_v60, %v3318_v17  ;;  %v2322_v46 = vmul.f32 %v7886_v5, %v8175_v57  ;;  %v10457_v48 = vld [vmem:[#allocation94_spill] sm:$0xff] }
 0x212   : > { %v2843_v10 = vadd.f32 %v2760_v9, %v2598_v58  ;;  %v2646_v35 = vmul.f32 %v7837_v38, %v8214_v41  ;;  %v2960_v43 = vmul.f32 %v7853_v28, %v8359_v0  ;;  %v3205_v42 = vmul.f32 %v7875_v12, %v8359_v0 }
 0x213   : > { %v1922_v32 = vadd.f32 %v10454_v27, %v1677_v63  ;;  %v2516_v6 = vrot.slane %v2401_v19, 1  ;;  %v3633_v36 = vsel %vm671_vm2, %v3631_v37, %v3632_v8  ;;  %v10456_v47 = vrot.slane %v10455_v2, 2 }
 0x214   : > { %v2912_v14 = vadd.f32 %v2880_v30, %v2843_v10  ;;  %v2761_v23 = vrot.slane %v2646_v35, 2  ;;  %v3519_v38 = vmul.f32 %v7904_v7, %v8495_v4  ;;  %v3878_v41 = vsel %vm917_vm3, %v3876_v56, %v3877_v55  ;;  %v10458_v10 = vld [vmem:[#allocation32_spill] sm:$0xff] }
 0x215   : > { %v2085_v57 = vsel %vm917_vm3, %v2082_v24, %v10456_v47  ;;  %v3075_v29 = vrot.slane %v2960_v43, 1  ;;  %v2517_v62 = vsel %vm671_vm2, %v2514_v53, %v2516_v6  ;;  %v2881_v12 = vmul.f32 %v7893_v16, %v8323_v13  ;;  %v10462_v43 = vld [vmem:[#allocation95_spill] sm:$0xff] }
 0x216   : > { %v3157_v28 = vadd.f32 %v3074_v50, %v2912_v14  ;;  %v2167_v30 = vadd.f32 %v2085_v57, %v1922_v32  ;;  %v3320_v9 = vrot.slane %v3205_v42, 2  ;;  %v3440_v59 = vmul.f32 %v7931_v11, %v8449_v49 }
 0x217   : > { %v2762_v60 = vsel %vm917_vm3, %v2759_v3, %v2761_v23  ;;  %v1087_v7 = vmul.f32 %v8249_v34, %v10445_v51  ;;  %v3634_v18 = vrot.slane %v3519_v38, 1  ;;  %v3764_v22 = vmul.f32 %v7919_v21, %v8495_v4 }
 0x218   : > { %v3402_v31 = vadd.f32 %v3319_v40, %v3157_v28  ;;  %v2354_v24 = vadd.f32 %v2322_v46, %v2167_v30  ;;  %v1166_v53 = vmul.f32 %v8256_v1, %v10445_v51  ;;  %v1411_v16 = vmul.f32 %v8264_v25, %v10445_v51  ;;  %v10459_v40 = vld [vmem:[#allocation36_spill] sm:$0xff]  ;;  %v10460_v46 = vld [vmem:[#allocation93_spill] sm:$0xff] }
 0x219   : > { %v3076_v11 = vsel %vm671_vm2, %v3073_v39, %v3075_v29  ;;  %v1119_v50 = vadd.f32 %v1087_v7, %v10457_v48  ;;  %v3321_v3 = vsel %vm917_vm3, %v3318_v17, %v3320_v9  ;;  %v1725_v44 = vmul.f32 %v8273_v15, %v10458_v10 }
 0x21a   : > { %v3471_v45 = vadd.f32 %v3439_v20, %v3402_v31  ;;  %v2599_v58 = vadd.f32 %v2517_v62, %v2354_v24  ;;  %v1282_v37 = vrot.slane %v1166_v53, 1  ;;  %v1527_v56 = vrot.slane %v1411_v16, 2 }
 0x21b   : > { %v1970_v19 = vmul.f32 %v8407_v54, %v10458_v10  ;;  %v8541_v51 = vmul.f32 %v8407_v54, %v10459_v40  ;;  %v3635_v39 = vsel %vm671_vm2, %v3632_v8, %v3634_v18  ;;  %v3879_v20 = vrot.slane %v3764_v22, 2  ;;  %v8554_v8 = vld [vmem:[%s10027_s3 + $0x1] ss:$0 sm:$0xff] }
 0x21c   : > { %v3716_v21 = vadd.f32 %v3633_v36, %v3471_v45  ;;  %v2844_v63 = vadd.f32 %v2762_v60, %v2599_v58  ;;  %v10461_v35 = vrot.slane %v10460_v46, 1  ;;  %v10463_v14 = vrot.slane %v10462_v43, 2  ;;  %v8598_v58 = vld [vmem:[#allocation2 + $0x120] sm:$0xff] }
 0x21d   : > { %v1841_v36 = vrot.slane %v1725_v44, 1  ;;  %v2086_v2 = vrot.slane %v1970_v19, 2  ;;  %v2087_v47 = vrot.slane %v8541_v51, 2  ;;  %v2402_v57 = vmul.f32 %v8554_v8, %v8317_v52 }
 0x21e   : > { %v1284_v17 = vsel %vm671_vm2, %v1282_v37, %v10461_v35  ;;  %v1529_v27 = vsel %vm917_vm3, %v1527_v56, %v10463_v14  ;;  %v3961_v32 = vadd.f32 %v3878_v41, %v3716_v21  ;;  %v2913_v6 = vadd.f32 %v2881_v12, %v2844_v63  ;;  %v8571_v12 = vld [vmem:[%s10027_s3 + $0x2] ss:$0 sm:$0xff]  ;;  %v8621_v35 = vld [vmem:[%s10027_s3 + $0x3] ss:$0 sm:$0xff]  ;;  %v8628_v14 = vld [vmem:[%s10027_s3 + $0x7] ss:$0 sm:$0xff] }
 0x21f   : > { %v1364_v42 = vadd.f32 %v1284_v17, %v1119_v50  ;;  %v8560_v23 = vmul.f32 %v8554_v8, %v8323_v13  ;;  %v1646_v30 = vmul.f32 %v8487_v26, %v10458_v10  ;;  %v3880_v29 = vsel %vm917_vm3, %v3877_v55, %v3879_v20 }
 0x220   : > { %v4000_v38 = vadd.f32 %v8011_v61, %v3961_v32  ;;  %v3158_v28 = vadd.f32 %v3076_v11, %v2913_v6  ;;  %v2323_v62 = vmul.f32 %v7886_v5, %v8317_v52  ;;  %v2647_v9 = vmul.f32 %v8571_v12, %v8317_v52  ;;  %v10464_v5 = vld [vmem:[#allocation104_spill] sm:$0xff]  ;;  %v8590_v52 = vld [vmem:[%s10027_s3 + $0x4] ss:$0 sm:$0xff] }
 0x221   : > { %v1609_v41 = vadd.f32 %v1529_v27, %v1364_v42  ;;  %v8577_v31 = vmul.f32 %v8571_v12, %v8323_v13  ;;  %v2518_v55 = vrot.slane %v2402_v57, 1  ;;  %v2519_v7 = vrot.slane %v8560_v23, 1  ;;  %v8600_v11 = vld [vmem:[#allocation2 + $0x128] sm:$0xff] }
 0x222   : > { %4087 = vst.msk [vmem:[#allocation3 + $0xf1] sm:$0xff] %vm326_vm0, %v4000_v38  ;;  %v3403_v24 = vadd.f32 %v3321_v3, %v3158_v28  ;;  %v10465_v18 = vrot.slane %v10464_v5, 1  ;;  %v2088_v53 = vsel %vm917_vm3, %v2086_v2, %v2087_v47  ;;  %v2961_v16 = vmul.f32 %v8590_v52, %v8442_v33  ;;  %v8605_v3 = vld [vmem:[%s10027_s3 + $0x5] ss:$0 sm:$0xff]  ;;  %v8639_v32 = vld [vmem:[%s10027_s3 + $0x8] ss:$0 sm:$0xff] }
 0x223   : > { %v1678_v60 = vadd.f32 %v1646_v30, %v1609_v41  ;;  %v8596_v45 = vmul.f32 %v8590_v52, %v8449_v49  ;;  %v3206_v37 = vmul.f32 %v8605_v3, %v8442_v33  ;;  %v8611_v56 = vmul.f32 %v8605_v3, %v8449_v49  ;;  %v8653_v41 = vld [vmem:[%s10027_s3 + $0x6] ss:$0 sm:$0xff] }
 0x224   : > { %v1843_v22 = vsel %vm671_vm2, %v1841_v36, %v10465_v18  ;;  %v3472_v48 = vadd.f32 %v3440_v59, %v3403_v24  ;;  %v2763_v44 = vrot.slane %v2647_v9, 2  ;;  %v2764_v21 = vrot.slane %v8577_v31, 2  ;;  %v10466_v5 = vld [vmem:[#allocation103_spill] sm:$0xff] }
 0x225   : > { %v1923_v50 = vadd.f32 %v1843_v22, %v1678_v60  ;;  %v3077_v63 = vrot.slane %v2961_v16, 1  ;;  %v3078_v19 = vrot.slane %v8596_v45, 1  ;;  %v2520_v46 = vsel %vm671_vm2, %v2518_v55, %v2519_v7  ;;  %v8663_v22 = vld [vmem:[#allocation2 + $0x130] sm:$0x3] }
 0x226   : > { %v3717_v59 = vadd.f32 %v3635_v39, %v3472_v48  ;;  %v2882_v17 = vmul.f32 %v8621_v35, %v8442_v33  ;;  %v3322_v43 = vrot.slane %v3206_v37, 2  ;;  %v3520_v39 = vmul.f32 %v8628_v14, %v8598_v58 }
 0x227   : > { %v2168_v20 = vadd.f32 %v2088_v53, %v1923_v50  ;;  %v8634_v27 = vmul.f32 %v8628_v14, %v8600_v11  ;;  %v3765_v6 = vmul.f32 %v8639_v32, %v8598_v58  ;;  %v3323_v2 = vrot.slane %v8611_v56, 2  ;;  %v10467_v50 = vld [vmem:[#allocation111_spill] sm:$0xff] }
 0x228   : > { %v3962_v42 = vadd.f32 %v3880_v29, %v3717_v59  ;;  %v8646_v57 = vmul.f32 %v8639_v32, %v8600_v11  ;;  %v2765_v38 = vsel %vm917_vm3, %v2763_v44, %v2764_v21  ;;  %v3079_v28 = vsel %vm671_vm2, %v3077_v63, %v3078_v19 }
 0x229   : > { %v2355_v36 = vadd.f32 %v2323_v62, %v2168_v20  ;;  %v3441_v30 = vmul.f32 %v8653_v41, %v8598_v58  ;;  %v1647_v29 = vmul.f32 %v8487_v26, %v10459_v40  ;;  %v3636_v31 = vrot.slane %v3520_v39, 1  ;;  %v10468_v20 = vld [vmem:[#allocation107_spill] sm:$0xff] }
 0x22a   : > { %v4001_v62 = vadd.f32 %v8011_v61, %v3962_v42  ;;  %v3637_v24 = vrot.slane %v8634_v27, 1  ;;  %v3881_v60 = vrot.slane %v3765_v6, 2  ;;  %v3882_v55 = vrot.slane %v8646_v57, 2  ;;  %v8672_v61 = vld [vmem:[%s10027_s3] ss:$0 sm:$0xff] }
 0x22b   : > { %v2600_v9 = vadd.f32 %v2520_v46, %v2355_v36  ;;  %v1679_v18 = vadd.f32 %v1647_v29, %v10466_v5  ;;  %v2404_v53 = vmul.f32 %v8554_v8, %v8359_v0  ;;  %v3324_v40 = vsel %vm917_vm3, %v3322_v43, %v3323_v2 }
 0x22c   : > { %4088 = vst.msk [vmem:[#allocation3 + $0xf9] sm:$0xff] %vm326_vm0, %v4001_v62  ;;  %v2324_v45 = vmul.f32 %v8672_v61, %v8323_v13  ;;  %v2649_v48 = vmul.f32 %v8571_v12, %v8359_v0  ;;  %v2963_v44 = vmul.f32 %v8590_v52, %v8495_v4  ;;  %v3208_v63 = vmul.f32 %v8605_v3, %v8495_v4 }
 0x22d   : > { %v2845_v16 = vadd.f32 %v2765_v38, %v2600_v9  ;;  %v1924_v37 = vadd.f32 %v10467_v50, %v1679_v18  ;;  %v2521_v56 = vrot.slane %v2404_v53, 1  ;;  %v10469_v46 = vrot.slane %v10468_v20, 2 }
 0x22e   : > { %v2766_v13 = vrot.slane %v2649_v48, 2  ;;  %v3522_v0 = vmul.f32 %v8628_v14, %v8663_v22  ;;  %v3638_v39 = vsel %vm671_vm2, %v3636_v31, %v3637_v24  ;;  %v3883_v27 = vsel %vm917_vm3, %v3881_v60, %v3882_v55 }
 0x22f   : > { %v2914_v59 = vadd.f32 %v2882_v17, %v2845_v16  ;;  %v2090_v43 = vsel %vm917_vm3, %v2087_v47, %v10469_v46  ;;  %v3080_v42 = vrot.slane %v2963_v44, 1  ;;  %v2883_v17 = vmul.f32 %v8621_v35, %v8449_v49  ;;  %v10470_v16 = vld [vmem:[#allocation99_spill] sm:$0xff] }
 0x230   : > { %v2169_v6 = vadd.f32 %v2090_v43, %v1924_v37  ;;  %v3325_v38 = vrot.slane %v3208_v63, 2  ;;  %v3442_v51 = vmul.f32 %v8653_v41, %v8600_v11  ;;  %v2522_v29 = vsel %vm671_vm2, %v2519_v7, %v2521_v56  ;;  %v10472_v63 = vld [vmem:[#allocation39_spill] sm:$0xff] }
 0x231   : > { %v3159_v36 = vadd.f32 %v3079_v28, %v2914_v59  ;;  %v2767_v62 = vsel %vm917_vm3, %v2764_v21, %v2766_v13  ;;  %v1089_v9 = vmul.f32 %v8249_v34, %v10458_v10  ;;  %v3639_v60 = vrot.slane %v3522_v0, 1  ;;  %v10475_v0 = vld [vmem:[#allocation102_spill] sm:$0xff] }
 0x232   : > { %v2356_v47 = vadd.f32 %v2324_v45, %v2169_v6  ;;  %v3767_v28 = vmul.f32 %v8639_v32, %v8663_v22  ;;  %v1169_v5 = vmul.f32 %v8256_v1, %v10458_v10  ;;  %v3081_v53 = vsel %vm671_vm2, %v3078_v19, %v3080_v42 }
 0x233   : > { %v3404_v31 = vadd.f32 %v3324_v40, %v3159_v36  ;;  %v1121_v23 = vadd.f32 %v1089_v9, %v10470_v16  ;;  %v1414_v7 = vmul.f32 %v8264_v25, %v10458_v10  ;;  %v3326_v45 = vsel %vm917_vm3, %v3323_v2, %v3325_v38  ;;  %v10471_v40 = vld [vmem:[#allocation38_spill] sm:$0xff]  ;;  %v10477_v16 = vld [vmem:[#allocation109_spill] sm:$0xff] }
 0x234   : > { %v2601_v18 = vadd.f32 %v2522_v29, %v2356_v47  ;;  %v1287_v48 = vrot.slane %v1169_v5, 1  ;;  %v1728_v50 = vmul.f32 %v8273_v15, %v10471_v40  ;;  %v1973_v44 = vmul.f32 %v8407_v54, %v10471_v40 }
 0x235   : > { %v3473_v21 = vadd.f32 %v3441_v30, %v3404_v31  ;;  %v1532_v56 = vrot.slane %v1414_v7, 2  ;;  %v8719_v19 = vmul.f32 %v8407_v54, %v10472_v63  ;;  %v3640_v20 = vsel %vm671_vm2, %v3637_v24, %v3639_v60  ;;  %v10473_v30 = vld [vmem:[#allocation101_spill] sm:$0xff]  ;;  %v8740_v31 = vld [vmem:[%s10028_s4] ss:$0 sm:$0xff] }
 0x236   : > { %v2846_v37 = vadd.f32 %v2767_v62, %v2601_v18  ;;  %v3884_v10 = vrot.slane %v3767_v28, 2  ;;  %v10474_v46 = vrot.slane %v10473_v30, 1  ;;  %v10476_v6 = vrot.slane %v10475_v0, 2 }
 0x237   : > { %v3718_v59 = vadd.f32 %v3638_v39, %v3473_v21  ;;  %v1846_v36 = vrot.slane %v1728_v50, 1  ;;  %v2091_v47 = vrot.slane %v1973_v44, 2  ;;  %v2092_v29 = vrot.slane %v8719_v19, 2  ;;  %v8767_v50 = vld [vmem:[#allocation2 + $0x138] sm:$0xff] }
 0x238   : > { %v1289_v2 = vsel %vm671_vm2, %v1287_v48, %v10474_v46  ;;  %v2915_v43 = vadd.f32 %v2883_v17, %v2846_v37  ;;  %v1534_v42 = vsel %vm917_vm3, %v1532_v56, %v10476_v6  ;;  %v2405_v39 = vmul.f32 %v8554_v8, %v8442_v33  ;;  %v8769_v37 = vld [vmem:[#allocation2 + $0x140] sm:$0xff] }
 0x239   : > { %v1366_v13 = vadd.f32 %v1289_v2, %v1121_v23  ;;  %v3963_v38 = vadd.f32 %v3883_v27, %v3718_v59  ;;  %v1648_v9 = vmul.f32 %v8487_v26, %v10471_v40  ;;  %v8735_v17 = vmul.f32 %v8554_v8, %v8449_v49 }
 0x23a   : > { %v3160_v24 = vadd.f32 %v3081_v53, %v2915_v43  ;;  %v3885_v60 = vsel %vm917_vm3, %v3882_v55, %v3884_v10  ;;  %v2650_v28 = vmul.f32 %v8571_v12, %v8442_v33  ;;  %v8750_v5 = vmul.f32 %v8571_v12, %v8449_v49 }
 0x23b   : > { %v1611_v62 = vadd.f32 %v1534_v42, %v1366_v13  ;;  %v4002_v27 = vadd.f32 %v8740_v31, %v3963_v38  ;;  %v10478_v23 = vrot.slane %v10477_v16, 1  ;;  %v2325_v21 = vmul.f32 %v8672_v61, %v8442_v33 }
 0x23c   : > { %v3405_v18 = vadd.f32 %v3326_v45, %v3160_v24  ;;  %v2093_v57 = vsel %vm917_vm3, %v2091_v47, %v2092_v29  ;;  %v2523_v55 = vrot.slane %v2405_v39, 1  ;;  %v2964_v48 = vmul.f32 %v8590_v52, %v8598_v58 }
 0x23d   : > { %v1680_v53 = vadd.f32 %v1648_v9, %v1611_v62  ;;  %v1848_v7 = vsel %vm671_vm2, %v1846_v36, %v10478_v23  ;;  %4089 = vst.msk [vmem:[#allocation3 + $0x109] sm:$0xff] %vm326_vm0, %v4002_v27  ;;  %v8765_v45 = vmul.f32 %v8590_v52, %v8600_v11  ;;  %v2524_v44 = vrot.slane %v8735_v17, 1 }
 0x23e   : > { %v3474_v56 = vadd.f32 %v3442_v51, %v3405_v18  ;;  %v3209_v59 = vmul.f32 %v8605_v3, %v8598_v58  ;;  %v2768_v10 = vrot.slane %v2650_v28, 2  ;;  %v2769_v30 = vrot.slane %v8750_v5, 2 }
 0x23f   : > { %v1925_v33 = vadd.f32 %v1848_v7, %v1680_v53  ;;  %v3082_v46 = vrot.slane %v2964_v48, 1  ;;  %v3210_v2 = vmul.f32 %v8605_v3, %v8600_v11  ;;  %v3083_v0 = vrot.slane %v8765_v45, 1  ;;  %v10479_v7 = vld [vmem:[#allocation110_spill] sm:$0xff]  ;;  %v8805_v48 = vld [vmem:[#allocation2 + $0x148] sm:$0x3] }
 0x240   : > { %v3719_v43 = vadd.f32 %v3640_v20, %v3474_v56  ;;  %v3327_v6 = vrot.slane %v3209_v59, 2  ;;  %v2884_v51 = vmul.f32 %v8621_v35, %v8598_v58  ;;  %v3523_v36 = vmul.f32 %v8628_v14, %v8767_v50  ;;  %v10480_v56 = vld [vmem:[#allocation118_spill] sm:$0xff] }
 0x241   : > { %v2170_v13 = vadd.f32 %v2093_v57, %v1925_v33  ;;  %v3328_v42 = vrot.slane %v3210_v2, 2  ;;  %v8784_v38 = vmul.f32 %v8628_v14, %v8769_v37  ;;  %v3768_v20 = vmul.f32 %v8639_v32, %v8767_v50 }
 0x242   : > { %v3964_v47 = vadd.f32 %v3885_v60, %v3719_v43  ;;  %v8790_v24 = vmul.f32 %v8639_v32, %v8769_v37  ;;  %v2525_v62 = vsel %vm671_vm2, %v2523_v55, %v2524_v44  ;;  %v2770_v9 = vsel %vm917_vm3, %v2768_v10, %v2769_v30  ;;  %v10481_v43 = vld [vmem:[#allocation113_spill] sm:$0xff] }
 0x243   : > { %v2357_v39 = vadd.f32 %v2325_v21, %v2170_v13  ;;  %v3443_v17 = vmul.f32 %v8653_v41, %v8767_v50  ;;  %v1649_v27 = vmul.f32 %v8487_v26, %v10472_v63  ;;  %v3084_v5 = vsel %vm671_vm2, %v3082_v46, %v3083_v0 }
 0x244   : > { %v4003_v60 = vadd.f32 %v8740_v31, %v3964_v47  ;;  %v3329_v18 = vsel %vm917_vm3, %v3327_v6, %v3328_v42  ;;  %v3641_v53 = vrot.slane %v3523_v36, 1  ;;  %v3642_v16 = vrot.slane %v8784_v38, 1 }
 0x245   : > { %v2602_v28 = vadd.f32 %v2525_v62, %v2357_v39  ;;  %v3886_v23 = vrot.slane %v3768_v20, 2  ;;  %v1681_v21 = vadd.f32 %v1649_v27, %v10479_v7  ;;  %v3887_v55 = vrot.slane %v8790_v24, 2 }
 0x246   : > { %4090 = vst.msk [vmem:[#allocation3 + $0x111] sm:$0xff] %vm326_vm0, %v4003_v60  ;;  %v2407_v63 = vmul.f32 %v8554_v8, %v8495_v4  ;;  %v2652_v45 = vmul.f32 %v8571_v12, %v8495_v4  ;;  %v2326_v59 = vmul.f32 %v8672_v61, %v8449_v49  ;;  %v2966_v10 = vmul.f32 %v8590_v52, %v8663_v22 }
 0x247   : > { %v2847_v57 = vadd.f32 %v2770_v9, %v2602_v28  ;;  %v1926_v33 = vadd.f32 %v10480_v56, %v1681_v21  ;;  %v3211_v46 = vmul.f32 %v8605_v3, %v8663_v22  ;;  %v10482_v13 = vrot.slane %v10481_v43, 2 }
 0x248   : > { %v2526_v36 = vrot.slane %v2407_v63, 1  ;;  %v2771_v4 = vrot.slane %v2652_v45, 2  ;;  %v3643_v38 = vsel %vm671_vm2, %v3641_v53, %v3642_v16  ;;  %v3085_v39 = vrot.slane %v2966_v10, 1  ;;  %v10484_v10 = vld [vmem:[#allocation42_spill] sm:$0xff] }
 0x249   : > { %v2916_v2 = vadd.f32 %v2884_v51, %v2847_v57  ;;  %v2095_v6 = vsel %vm917_vm3, %v2092_v29, %v10482_v13  ;;  %v3525_v49 = vmul.f32 %v8628_v14, %v8805_v48  ;;  %v3888_v51 = vsel %vm917_vm3, %v3886_v23, %v3887_v55 }
 0x24a   : > { %v2171_v47 = vadd.f32 %v2095_v6, %v1926_v33  ;;  %v2885_v62 = vmul.f32 %v8621_v35, %v8600_v11  ;;  %v3330_v19 = vrot.slane %v3211_v46, 2  ;;  %v2527_v29 = vsel %vm671_vm2, %v2524_v44, %v2526_v36 }
 0x24b   : > { %v3161_v20 = vadd.f32 %v3084_v5, %v2916_v2  ;;  %v2772_v27 = vsel %vm917_vm3, %v2769_v30, %v2771_v4  ;;  %v3444_v60 = vmul.f32 %v8653_v41, %v8769_v37  ;;  %v3770_v5 = vmul.f32 %v8639_v32, %v8805_v48  ;;  %v10485_v2 = vld [vmem:[#allocation41_spill] sm:$0xff] }
 0x24c   : > { %v2358_v9 = vadd.f32 %v2326_v59, %v2171_v47  ;;  %v1091_v53 = vmul.f32 %v8249_v34, %v10471_v40  ;;  %v1172_v23 = vmul.f32 %v8256_v1, %v10471_v40  ;;  %v3086_v21 = vsel %vm671_vm2, %v3083_v0, %v3085_v39 }
 0x24d   : > { %v3406_v28 = vadd.f32 %v3329_v18, %v3161_v20  ;;  %v3644_v57 = vrot.slane %v3525_v49, 1  ;;  %v1417_v44 = vmul.f32 %v8264_v25, %v10471_v40  ;;  %v3331_v63 = vsel %vm917_vm3, %v3328_v42, %v3330_v19  ;;  %v10483_v18 = vld [vmem:[#allocation106_spill] sm:$0xff]  ;;  %v10487_v40 = vld [vmem:[#allocation43_spill] sm:$0xff] }
 0x24e   : > { %v2603_v7 = vadd.f32 %v2527_v29, %v2358_v9  ;;  %v1123_v45 = vadd.f32 %v1091_v53, %v10483_v18  ;;  %v1292_v56 = vrot.slane %v1172_v23, 1  ;;  %v1731_v34 = vmul.f32 %v8273_v15, %v10484_v10  ;;  %v10488_v15 = vld [vmem:[#allocation108_spill] sm:$0xff] }
 0x24f   : > { %v3475_v30 = vadd.f32 %v3443_v17, %v3406_v28  ;;  %v1537_v59 = vrot.slane %v1417_v44, 2  ;;  %v1976_v1 = vmul.f32 %v8407_v54, %v10484_v10  ;;  %v3889_v0 = vrot.slane %v3770_v5, 2 }
 0x250   : > { %v2848_v33 = vadd.f32 %v2772_v27, %v2603_v7  ;;  %v10486_v43 = vrot.slane %v10485_v2, 1  ;;  %v8855_v42 = vmul.f32 %v8407_v54, %v10487_v40  ;;  %v3645_v13 = vsel %vm671_vm2, %v3642_v16, %v3644_v57 }
 0x251   : > { %v3720_v46 = vadd.f32 %v3643_v38, %v3475_v30  ;;  %v1851_v36 = vrot.slane %v1731_v34, 1  ;;  %v10489_v47 = vrot.slane %v10488_v15, 2  ;;  %v1650_v38 = vmul.f32 %v8487_v26, %v10484_v10 }
 0x252   : > { %v1294_v25 = vsel %vm671_vm2, %v1292_v56, %v10486_v43  ;;  %v2917_v17 = vadd.f32 %v2885_v62, %v2848_v33  ;;  %v2408_v49 = vmul.f32 %v8554_v8, %v8598_v58  ;;  %v2096_v9 = vrot.slane %v1976_v1, 2 }
 0x253   : > { %v1368_v6 = vadd.f32 %v1294_v25, %v1123_v45  ;;  %v3965_v4 = vadd.f32 %v3888_v51, %v3720_v46  ;;  %v1539_v39 = vsel %vm917_vm3, %v1537_v59, %v10489_v47  ;;  %v8867_v62 = vmul.f32 %v8554_v8, %v8600_v11  ;;  %v10490_v51 = vld [vmem:[#allocation115_spill] sm:$0xff]  ;;  %v8888_v45 = vld [vmem:[#allocation2 + $0x150] sm:$0xff] }
 0x254   : > { %v3162_v20 = vadd.f32 %v3086_v21, %v2917_v17  ;;  %v10491_v29 = vrot.slane %v10490_v51, 1  ;;  %v2097_v28 = vrot.slane %v8855_v42, 2  ;;  %v2653_v5 = vmul.f32 %v8571_v12, %v8598_v58 }
 0x255   : > { %v1613_v19 = vadd.f32 %v1539_v39, %v1368_v6  ;;  %v4004_v16 = vadd.f32 %v8740_v31, %v3965_v4  ;;  %v2528_v7 = vrot.slane %v2408_v49, 1  ;;  %v8878_v21 = vmul.f32 %v8571_v12, %v8600_v11  ;;  %v8910_v6 = vld [vmem:[#allocation2 + $0x158] sm:$0xff] }
 0x256   : > { %v1853_v27 = vsel %vm671_vm2, %v1851_v36, %v10491_v29  ;;  %v3407_v53 = vadd.f32 %v3331_v63, %v3162_v20  ;;  %v2529_v57 = vrot.slane %v8867_v62, 1  ;;  %v2773_v44 = vrot.slane %v2653_v5, 2  ;;  %v10492_v29 = vld [vmem:[#allocation117_spill] sm:$0xff] }
 0x257   : > { %v1682_v23 = vadd.f32 %v1650_v38, %v1613_v19  ;;  %4091 = vst.msk [vmem:[#allocation3 + $0x121] sm:$0xff] %vm326_vm0, %v4004_v16  ;;  %v2967_v30 = vmul.f32 %v8590_v52, %v8767_v50  ;;  %v8886_v18 = vmul.f32 %v8590_v52, %v8769_v37  ;;  %v3890_v56 = vsel %vm917_vm3, %v3887_v55, %v3889_v0 }
 0x258   : > { %v3476_v63 = vadd.f32 %v3444_v60, %v3407_v53  ;;  %v2774_v59 = vrot.slane %v8878_v21, 2  ;;  %v2098_v34 = vsel %vm917_vm3, %v2096_v9, %v2097_v28  ;;  %v2327_v1 = vmul.f32 %v8672_v61, %v8598_v58 }
 0x259   : > { %v1927_v33 = vadd.f32 %v1853_v27, %v1682_v23  ;;  %v3087_v46 = vrot.slane %v2967_v30, 1  ;;  %v3088_v2 = vrot.slane %v8886_v18, 1  ;;  %v3212_v60 = vmul.f32 %v8605_v3, %v8767_v50 }
 0x25a   : > { %v3721_v43 = vadd.f32 %v3645_v13, %v3476_v63  ;;  %v8902_v24 = vmul.f32 %v8605_v3, %v8769_v37  ;;  %v2530_v55 = vsel %vm671_vm2, %v2528_v7, %v2529_v57  ;;  %v2775_v0 = vsel %vm917_vm3, %v2773_v44, %v2774_v59  ;;  %v10493_v7 = vld [vmem:[#allocation120_spill] sm:$0xff] }
 0x25b   : > { %v2172_v25 = vadd.f32 %v2098_v34, %v1927_v33  ;;  %v2886_v42 = vmul.f32 %v8621_v35, %v8767_v50  ;;  %v3526_v58 = vmul.f32 %v8628_v14, %v8888_v45  ;;  %v8914_v36 = vmul.f32 %v8910_v6, %v8628_v14  ;;  %v10494_v44 = vld [vmem:[#allocation116_spill] sm:$0xff] }
 0x25c   : > { %v3966_v17 = vadd.f32 %v3890_v56, %v3721_v43  ;;  %v3771_v4 = vmul.f32 %v8639_v32, %v8888_v45  ;;  %v3089_v15 = vsel %vm671_vm2, %v3087_v46, %v3088_v2  ;;  %v3445_v47 = vmul.f32 %v8653_v41, %v8888_v45 }
 0x25d   : > { %v2359_v13 = vadd.f32 %v2327_v1, %v2172_v25  ;;  %v8923_v39 = vmul.f32 %v8910_v6, %v8639_v32  ;;  %v1651_v38 = vmul.f32 %v8487_v26, %v10487_v40  ;;  %v3332_v19 = vrot.slane %v3212_v60, 2  ;;  %v8948_v60 = vld [vmem:[#allocation2 + $0x160] sm:$0x3] }
 0x25e   : > { %v4005_v49 = vadd.f32 %v8740_v31, %v3966_v17  ;;  %v3333_v9 = vrot.slane %v8902_v24, 2  ;;  %v3646_v62 = vrot.slane %v3526_v58, 1  ;;  %v3647_v16 = vrot.slane %v8914_v36, 1 }
 0x25f   : > { %v2604_v20 = vadd.f32 %v2530_v55, %v2359_v13  ;;  %v3891_v51 = vrot.slane %v3771_v4, 2  ;;  %v1683_v27 = vadd.f32 %v1651_v38, %v10492_v29  ;;  %v3892_v53 = vrot.slane %v8923_v39, 2 }
 0x260   : > { %4092 = vst.msk [vmem:[#allocation3 + $0x129] sm:$0xff] %vm326_vm0, %v4005_v49  ;;  %v2410_v40 = vmul.f32 %v8554_v8, %v8663_v22  ;;  %v2655_v23 = vmul.f32 %v8571_v12, %v8663_v22  ;;  %v10495_v30 = vrot.slane %v10494_v44, 2  ;;  %v2328_v63 = vmul.f32 %v8672_v61, %v8600_v11  ;;  %v5351_v49 = vld [vmem:[%s10026_s2 + $0x4] ss:$0 sm:$0xff] }
 0x261   : > { %v2849_v5 = vadd.f32 %v2775_v0, %v2604_v20  ;;  %v1928_v21 = vadd.f32 %v10493_v7, %v1683_v27  ;;  %v2969_v56 = vmul.f32 %v8590_v52, %v8805_v48  ;;  %v3214_v46 = vmul.f32 %v8605_v3, %v8805_v48 }
 0x262   : > { %v2100_v18 = vsel %vm917_vm3, %v2097_v28, %v10495_v30  ;;  %v2531_v34 = vrot.slane %v2410_v40, 1  ;;  %v2776_v1 = vrot.slane %v2655_v23, 2  ;;  %v3334_v22 = vsel %vm917_vm3, %v3332_v19, %v3333_v9  ;;  %v10497_v30 = vld [vmem:[#allocation45_spill] sm:$0xff] }
 0x263   : > { %v2918_v33 = vadd.f32 %v2886_v42, %v2849_v5  ;;  %v2173_v43 = vadd.f32 %v2100_v18, %v1928_v21  ;;  %v3090_v25 = vrot.slane %v2969_v56, 1  ;;  %v3528_v28 = vmul.f32 %v8948_v60, %v8628_v14  ;;  %v10496_v5 = vld [vmem:[#allocation112_spill] sm:$0xff] }
 0x264   : > { %v3648_v11 = vsel %vm671_vm2, %v3646_v62, %v3647_v16  ;;  %v3893_v55 = vsel %vm917_vm3, %v3891_v51, %v3892_v53  ;;  %v2887_v0 = vmul.f32 %v8621_v35, %v8769_v37  ;;  %v2532_v58 = vsel %vm671_vm2, %v2529_v57, %v2531_v34  ;;  %v10498_v56 = vld [vmem:[#allocation44_spill] sm:$0xff]  ;;  %v10500_v34 = vld [vmem:[#allocation47_spill] sm:$0xff] }
 0x265   : > { %v3163_v24 = vadd.f32 %v3089_v15, %v2918_v33  ;;  %v2360_v42 = vadd.f32 %v2328_v63, %v2173_v43  ;;  %v3335_v17 = vrot.slane %v3214_v46, 2  ;;  %v3446_v13 = vmul.f32 %v8910_v6, %v8653_v41  ;;  %v5350_v15 = vld [vmem:[%s10026_s2 + $0x3] ss:$0 sm:$0xff] }
 0x266   : > { %v2777_v4 = vsel %vm917_vm3, %v2774_v59, %v2776_v1  ;;  %v1093_v38 = vmul.f32 %v5350_v15, %v10484_v10  ;;  %v1175_v20 = vmul.f32 %v5351_v49, %v10484_v10  ;;  %v3091_v19 = vsel %vm671_vm2, %v3088_v2, %v3090_v25  ;;  %v5352_v59 = vld [vmem:[%s10026_s2 + $0x5] ss:$0 sm:$0xff]  ;;  %v5353_v2 = vld [vmem:[%s10026_s2 + $0x7] ss:$0 sm:$0xff] }
 0x267   : > { %v3408_v36 = vadd.f32 %v3334_v22, %v3163_v24  ;;  %v2605_v57 = vadd.f32 %v2532_v58, %v2360_v42  ;;  %v3649_v62 = vrot.slane %v3528_v28, 1  ;;  %v1420_v51 = vmul.f32 %v5352_v59, %v10484_v10  ;;  %v10501_v24 = vld [vmem:[#allocation114_spill] sm:$0xff] }
 0x268   : > { %v3773_v27 = vmul.f32 %v8948_v60, %v8639_v32  ;;  %v1125_v40 = vadd.f32 %v1093_v38, %v10496_v5  ;;  %v1297_v23 = vrot.slane %v1175_v20, 1  ;;  %v3336_v21 = vsel %vm917_vm3, %v3333_v9, %v3335_v17  ;;  %v10503_v20 = vld [vmem:[#allocation119_spill] sm:$0xff]  ;;  %v9019_v5 = vld [vmem:[#allocation2 + $0x168] sm:$0xff] }
 0x269   : > { %v3477_v29 = vadd.f32 %v3445_v47, %v3408_v36  ;;  %v2850_v7 = vadd.f32 %v2777_v4, %v2605_v57  ;;  %v1542_v44 = vrot.slane %v1420_v51, 2  ;;  %v1734_v18 = vmul.f32 %v5353_v2, %v10497_v30 }
 0x26a   : > { %v10499_v10 = vrot.slane %v10498_v56, 1  ;;  %v1979_v33 = vmul.f32 %v8407_v54, %v10497_v30  ;;  %v8990_v1 = vmul.f32 %v8407_v54, %v10500_v34  ;;  %v3650_v46 = vsel %vm671_vm2, %v3647_v16, %v3649_v62 }
 0x26b   : > { %v3722_v63 = vadd.f32 %v3648_v11, %v3477_v29  ;;  %v2919_v9 = vadd.f32 %v2887_v0, %v2850_v7  ;;  %v1856_v43 = vrot.slane %v1734_v18, 1  ;;  %v3894_v28 = vrot.slane %v3773_v27, 2 }
 0x26c   : > { %v1299_v47 = vsel %vm671_vm2, %v1297_v23, %v10499_v10  ;;  %v10502_v11 = vrot.slane %v10501_v24, 2  ;;  %v1652_v58 = vmul.f32 %v8487_v26, %v10497_v30  ;;  %v2101_v4 = vrot.slane %v1979_v33, 2 }
 0x26d   : > { %v1370_v22 = vadd.f32 %v1299_v47, %v1125_v40  ;;  %v3967_v25 = vadd.f32 %v3893_v55, %v3722_v63  ;;  %v3164_v17 = vadd.f32 %v3091_v19, %v2919_v9  ;;  %v2411_v54 = vmul.f32 %v8554_v8, %v8767_v50 }
 0x26e   : > { %v1544_v42 = vsel %vm917_vm3, %v1542_v44, %v10502_v11  ;;  %v2102_v16 = vrot.slane %v8990_v1, 2  ;;  %v9004_v55 = vmul.f32 %v8554_v8, %v8769_v37  ;;  %v2656_v15 = vmul.f32 %v8571_v12, %v8767_v50  ;;  %v9024_v44 = vld [vmem:[#allocation2 + $0x170] sm:$0xff] }
 0x26f   : > { %v1615_v36 = vadd.f32 %v1544_v42, %v1370_v22  ;;  %v4006_v0 = vadd.f32 %v8740_v31, %v3967_v25  ;;  %v3409_v38 = vadd.f32 %v3336_v21, %v3164_v17  ;;  %v10504_v57 = vrot.slane %v10503_v20, 1  ;;  %v9065_v20 = vld [vmem:[#allocation2 + $0x178] sm:$0x3] }
 0x270   : > { %v9013_v62 = vmul.f32 %v8571_v12, %v8769_v37  ;;  %v2533_v59 = vrot.slane %v2411_v54, 1  ;;  %v2534_v51 = vrot.slane %v9004_v55, 1  ;;  %v2778_v29 = vrot.slane %v2656_v15, 2 }
 0x271   : > { %v1684_v49 = vadd.f32 %v1652_v58, %v1615_v36  ;;  %v1858_v19 = vsel %vm671_vm2, %v1856_v43, %v10504_v57  ;;  %4093 = vst.msk [vmem:[#allocation3 + $0x139] sm:$0xff] %vm326_vm0, %v4006_v0  ;;  %v2970_v27 = vmul.f32 %v8590_v52, %v8888_v45  ;;  %v3478_v40 = vadd.f32 %v3446_v13, %v3409_v38  ;;  %v10505_v38 = vld [vmem:[#allocation121_spill] sm:$0xff] }
 0x272   : > { %v2779_v7 = vrot.slane %v9013_v62, 2  ;;  %v2971_v21 = vmul.f32 %v8910_v6, %v8590_v52  ;;  %v3895_v2 = vsel %vm917_vm3, %v3892_v53, %v3894_v28  ;;  %v2103_v30 = vsel %vm917_vm3, %v2101_v4, %v2102_v16 }
 0x273   : > { %v1929_v23 = vadd.f32 %v1858_v19, %v1684_v49  ;;  %v3215_v18 = vmul.f32 %v8605_v3, %v8888_v45  ;;  %v9034_v13 = vmul.f32 %v8910_v6, %v8605_v3  ;;  %v3723_v63 = vadd.f32 %v3650_v46, %v3478_v40 }
 0x274   : > { %v2329_v10 = vmul.f32 %v8672_v61, %v8767_v50  ;;  %v2888_v47 = vmul.f32 %v8621_v35, %v8888_v45  ;;  %v2535_v39 = vsel %vm671_vm2, %v2533_v59, %v2534_v51  ;;  %v3092_v53 = vrot.slane %v2970_v27, 1 }
 0x275   : > { %v2174_v56 = vadd.f32 %v2103_v30, %v1929_v23  ;;  %v3093_v33 = vrot.slane %v2971_v21, 1  ;;  %v3529_v1 = vmul.f32 %v8628_v14, %v9019_v5  ;;  %v3968_v9 = vadd.f32 %v3895_v2, %v3723_v63  ;;  %v10507_v21 = vld [vmem:[#allocation122_spill] sm:$0xff] }
 0x276   : > { %v2780_v43 = vsel %vm917_vm3, %v2778_v29, %v2779_v7  ;;  %v9046_v46 = vmul.f32 %v8628_v14, %v9024_v44  ;;  %v3337_v25 = vrot.slane %v3215_v18, 2  ;;  %v3338_v50 = vrot.slane %v9034_v13, 2  ;;  %v10506_v29 = vld [vmem:[#allocation49_spill] sm:$0xff] }
 0x277   : > { %v2361_v22 = vadd.f32 %v2329_v10, %v2174_v56  ;;  %v3774_v28 = vmul.f32 %v8639_v32, %v9019_v5  ;;  %v9053_v24 = vmul.f32 %v8639_v32, %v9024_v44  ;;  %v4007_v11 = vadd.f32 %v8740_v31, %v3968_v9 }
 0x278   : > { %v3447_v58 = vmul.f32 %v8653_v41, %v9019_v5  ;;  %v1653_v17 = vmul.f32 %v8487_v26, %v10500_v34  ;;  %v3094_v36 = vsel %vm671_vm2, %v3092_v53, %v3093_v33  ;;  %v3651_v4 = vrot.slane %v3529_v1, 1 }
 0x279   : > { %v2606_v42 = vadd.f32 %v2535_v39, %v2361_v22  ;;  %v3652_v54 = vrot.slane %v9046_v46, 1  ;;  %v3896_v0 = vrot.slane %v3774_v28, 2  ;;  %4094 = vst.msk [vmem:[#allocation3 + $0x141] sm:$0xff] %vm326_vm0, %v4007_v11  ;;  %v3897_v15 = vrot.slane %v9053_v24, 2  ;;  %v10512_v24 = vld [vmem:[#allocation19_spill] sm:$0xff] }
 0x27a   : > { %v1685_v49 = vadd.f32 %v1653_v17, %v10505_v38  ;;  %v2413_v57 = vmul.f32 %v8554_v8, %v8805_v48  ;;  %v3339_v26 = vsel %vm917_vm3, %v3337_v25, %v3338_v50  ;;  %v2330_v34 = vmul.f32 %v8672_v61, %v8769_v37 }
 0x27b   : > { %v2851_v55 = vadd.f32 %v2780_v43, %v2606_v42  ;;  %v2658_v19 = vmul.f32 %v8571_v12, %v8805_v48  ;;  %v2972_v62 = vmul.f32 %v8948_v60, %v8590_v52  ;;  %v3217_v23 = vmul.f32 %v8948_v60, %v8605_v3 }
 0x27c   : > { %v1930_v27 = vadd.f32 %v10506_v29, %v1685_v49  ;;  %v2536_v40 = vrot.slane %v2413_v57, 1  ;;  %v10508_v2 = vrot.slane %v10507_v21, 2  ;;  %v3531_v37 = vmul.f32 %v8628_v14, %v9065_v20 }
 0x27d   : > { %v2920_v59 = vadd.f32 %v2888_v47, %v2851_v55  ;;  %v2781_v18 = vrot.slane %v2658_v19, 2  ;;  %v3095_v13 = vrot.slane %v2972_v62, 1  ;;  %v3653_v63 = vsel %vm671_vm2, %v3651_v4, %v3652_v54 }
 0x27e   : > { %v2105_v30 = vsel %vm917_vm3, %v2102_v16, %v10508_v2  ;;  %v3898_v56 = vsel %vm917_vm3, %v3896_v0, %v3897_v15  ;;  %v2537_v47 = vsel %vm671_vm2, %v2534_v51, %v2536_v40  ;;  %v2889_v16 = vmul.f32 %v8910_v6, %v8621_v35  ;;  %v9124_v40 = vld [vmem:[#allocation2 + $0x188] sm:$0xff] }
 0x27f   : > { %v3165_v48 = vadd.f32 %v3094_v36, %v2920_v59  ;;  %v2175_v10 = vadd.f32 %v2105_v30, %v1930_v27  ;;  %v3340_v39 = vrot.slane %v3217_v23, 2  ;;  %v3448_v53 = vmul.f32 %v8653_v41, %v9024_v44  ;;  %v10509_v36 = vld [vmem:[#allocation5_spill] sm:$0xff]  ;;  %v9122_v27 = vld [vmem:[#allocation2 + $0x180] sm:$0xff] }
 0x280   : > { %v2782_v22 = vsel %vm917_vm3, %v2779_v7, %v2781_v18  ;;  %v2331_v43 = vmul.f32 %v8672_v61, %v8888_v45  ;;  %v3096_v25 = vsel %vm671_vm2, %v3093_v33, %v3095_v13  ;;  %v3654_v28 = vrot.slane %v3531_v37, 1 }
 0x281   : > { %v3410_v1 = vadd.f32 %v3339_v26, %v3165_v48  ;;  %v2362_v9 = vadd.f32 %v2330_v34, %v2175_v10  ;;  %v2414_v51 = vmul.f32 %v8554_v8, %v8888_v45  ;;  %v2659_v11 = vmul.f32 %v8571_v12, %v8888_v45 }
 0x282   : > { %v2363_v4 = vadd.f32 %v2331_v43, %v10509_v36  ;;  %v2660_v0 = vmul.f32 %v8910_v6, %v8571_v12  ;;  %v3341_v7 = vsel %vm917_vm3, %v3338_v50, %v3340_v39  ;;  %v3776_v55 = vmul.f32 %v8639_v32, %v9065_v20  ;;  %v9149_v36 = vld [vmem:[#allocation2 + $0x190] sm:$0x3] }
 0x283   : > { %v3479_v42 = vadd.f32 %v3447_v58, %v3410_v1  ;;  %v2607_v17 = vadd.f32 %v2537_v47, %v2362_v9  ;;  %v2538_v33 = vrot.slane %v2414_v51, 1  ;;  %v2783_v38 = vrot.slane %v2659_v11, 2  ;;  %v10510_v58 = vld [vmem:[#allocation126_spill] sm:$0xff] }
 0x284   : > { %v2784_v26 = vrot.slane %v2660_v0, 2  ;;  %v2973_v45 = vmul.f32 %v8590_v52, %v9019_v5  ;;  %v10511_v34 = vrot.slane %v10510_v58, 1  ;;  %v2974_v6 = vmul.f32 %v8590_v52, %v9024_v44 }
 0x285   : > { %v3724_v49 = vadd.f32 %v3653_v63, %v3479_v42  ;;  %v2852_v57 = vadd.f32 %v2782_v22, %v2607_v17  ;;  %v3218_v50 = vmul.f32 %v8605_v3, %v9019_v5  ;;  %v9120_v62 = vmul.f32 %v8605_v3, %v9024_v44 }
 0x286   : > { %v2540_v19 = vsel %vm671_vm2, %v2538_v33, %v10511_v34  ;;  %v2785_v21 = vsel %vm917_vm3, %v2783_v38, %v2784_v26  ;;  %v3097_v2 = vrot.slane %v2973_v45, 1  ;;  %v3098_v30 = vrot.slane %v2974_v6, 1 }
 0x287   : > { %v3969_v59 = vadd.f32 %v3898_v56, %v3724_v49  ;;  %v2921_v29 = vadd.f32 %v2889_v16, %v2852_v57  ;;  %v2608_v23 = vadd.f32 %v2540_v19, %v2363_v4  ;;  %v3342_v18 = vrot.slane %v3218_v50, 2 }
 0x288   : > { %v3343_v13 = vrot.slane %v9120_v62, 2  ;;  %v2890_v56 = vmul.f32 %v8621_v35, %v9019_v5  ;;  %v3655_v10 = vsel %vm671_vm2, %v3652_v54, %v3654_v28  ;;  %v3899_v47 = vrot.slane %v3776_v55, 2 }
 0x289   : > { %v4008_v37 = vadd.f32 %v8740_v31, %v3969_v59  ;;  %v3166_v48 = vadd.f32 %v3096_v25, %v2921_v29  ;;  %v2853_v63 = vadd.f32 %v2785_v21, %v2608_v23  ;;  %v3532_v16 = vmul.f32 %v8628_v14, %v9122_v27  ;;  %v9176_v59 = vld [vmem:[%s10026_s2 + $0x6] ss:$0 sm:$0xff]  ;;  %v5355_v29 = vld [vmem:[#allocation2 + $0x198] sm:$0xff] }
 0x28a   : > { %v3533_v39 = vmul.f32 %v8628_v14, %v9124_v40  ;;  %v3777_v22 = vmul.f32 %v8639_v32, %v9122_v27  ;;  %v9143_v43 = vmul.f32 %v8639_v32, %v9124_v40  ;;  %v3099_v46 = vsel %vm671_vm2, %v3097_v2, %v3098_v30 }
 0x28b   : > { %4095 = vst.msk [vmem:[#allocation3 + $0x151] sm:$0xff] %vm326_vm0, %v4008_v37  ;;  %v3411_v1 = vadd.f32 %v3341_v7, %v3166_v48  ;;  %v2922_v9 = vadd.f32 %v2890_v56, %v2853_v63  ;;  %v3344_v54 = vsel %vm917_vm3, %v3342_v18, %v3343_v13  ;;  %v3656_v25 = vrot.slane %v3532_v16, 1  ;;  %v10513_v63 = vld [vmem:[#allocation125_spill] sm:$0xff]  ;;  %v10516_v16 = vld [vmem:[#allocation31_spill] sm:$0xff] }
 0x28c   : > { %v2661_v28 = vmul.f32 %v8948_v60, %v8571_v12  ;;  %v3657_v42 = vrot.slane %v3533_v39, 1  ;;  %v3901_v17 = vrot.slane %v3777_v22, 2  ;;  %v3902_v4 = vrot.slane %v9143_v43, 2 }
 0x28d   : > { %v3480_v51 = vadd.f32 %v3448_v53, %v3411_v1  ;;  %v3167_v11 = vadd.f32 %v3099_v46, %v2922_v9  ;;  %v2975_v7 = vmul.f32 %v8590_v52, %v9065_v20  ;;  %v3220_v55 = vmul.f32 %v8605_v3, %v9065_v20  ;;  %v5356_v9 = vld [vmem:[%s10026_s2 + $0x8] ss:$0 sm:$0xff] }
 0x28e   : > { %v2786_v0 = vrot.slane %v2661_v28, 2  ;;  %v3900_v60 = vsel %vm917_vm3, %v3897_v15, %v3899_v47  ;;  %v3449_v38 = vmul.f32 %v8653_v41, %v9122_v27  ;;  %v2891_v57 = vmul.f32 %v8621_v35, %v9024_v44 }
 0x28f   : > { %v3725_v33 = vadd.f32 %v3655_v10, %v3480_v51  ;;  %v3412_v53 = vadd.f32 %v3344_v54, %v3167_v11  ;;  %v3100_v45 = vrot.slane %v2975_v7, 1  ;;  %v3534_v58 = vmul.f32 %v8628_v14, %v9149_v36  ;;  %v10514_v10 = vld [vmem:[#allocation34_spill] sm:$0xff] }
 0x290   : > { %v2787_v49 = vsel %vm917_vm3, %v2784_v26, %v2786_v0  ;;  %v3658_v6 = vsel %vm671_vm2, %v3656_v25, %v3657_v42  ;;  %v3903_v15 = vsel %vm917_vm3, %v3901_v17, %v3902_v4  ;;  %v3345_v62 = vrot.slane %v3220_v55, 2  ;;  %v5357_v25 = vld [vmem:[#allocation2 + $0x1a0] sm:$0xff] }
 0x291   : > { %v3970_v34 = vadd.f32 %v3900_v60, %v3725_v33  ;;  %v3481_v19 = vadd.f32 %v3449_v38, %v3412_v53  ;;  %v2854_v50 = vadd.f32 %v2787_v49, %v10512_v24  ;;  %v3779_v26 = vmul.f32 %v8639_v32, %v9149_v36 }
 0x292   : > { %v1656_v23 = vmul.f32 %v5355_v29, %v9176_v59  ;;  %v3101_v37 = vsel %vm671_vm2, %v3098_v30, %v3100_v45  ;;  %v3659_v48 = vrot.slane %v3534_v58, 1  ;;  %v10515_v47 = vrot.slane %v10514_v10, 1 }
 0x293   : > { %v4009_v21 = vadd.f32 %v8740_v31, %v3970_v34  ;;  %v3726_v2 = vadd.f32 %v3658_v6, %v3481_v19  ;;  %v2923_v18 = vadd.f32 %v2891_v57, %v2854_v50  ;;  %v10517_v39 = vrot.slane %v10516_v16, 1 }
 0x294   : > { %v1688_v56 = vadd.f32 %v1656_v23, %v10513_v63  ;;  %v1985_v22 = vmul.f32 %v5356_v9, %v5355_v29  ;;  %v3450_v30 = vmul.f32 %v8653_v41, %v9124_v40  ;;  %v9193_v28 = vmul.f32 %v5357_v25, %v5356_v9 }
 0x295   : > { %v1868_v1 = vsel %vm671_vm2, %v10517_v39, %v10515_v47  ;;  %4096 = vst.msk [vmem:[#allocation3 + $0x159] sm:$0xff] %vm326_vm0, %v4009_v21  ;;  %v3971_v46 = vadd.f32 %v3903_v15, %v3726_v2  ;;  %v3168_v54 = vadd.f32 %v3101_v37, %v2923_v18  ;;  %v3346_v51 = vsel %vm917_vm3, %v3343_v13, %v3345_v62  ;;  %v10519_v2 = vld [vmem:[#allocation123_spill] sm:$0xff] }
 0x296   : > { %v1933_v11 = vadd.f32 %v1868_v1, %v1688_v56  ;;  %v2111_v17 = vrot.slane %v1985_v22, 2  ;;  %v2417_v0 = vmul.f32 %v8554_v8, %v9019_v5  ;;  %v2112_v33 = vrot.slane %v9193_v28, 2  ;;  %v2295_v56 = vld [vmem:[#allocation2 + $0x198] sm:$0xff]  ;;  %v9242_v39 = vld [vmem:[#allocation2 + $0x1a0] sm:$0xff] }
 0x297   : > { %v4010_v7 = vadd.f32 %v8740_v31, %v3971_v46  ;;  %v3413_v55 = vadd.f32 %v3346_v51, %v3168_v54  ;;  %v9202_v60 = vmul.f32 %v8554_v8, %v9024_v44  ;;  %v3660_v53 = vsel %vm671_vm2, %v3657_v42, %v3659_v48 }
 0x298   : > { %v3904_v38 = vrot.slane %v3779_v26, 2  ;;  %v2662_v13 = vmul.f32 %v8571_v12, %v9019_v5  ;;  %v9209_v49 = vmul.f32 %v8571_v12, %v9024_v44  ;;  %v2113_v45 = vsel %vm917_vm3, %v2111_v17, %v2112_v33  ;;  %v5358_v12 = vld [vmem:[#allocation2 + $0x1a8] sm:$0x3]  ;;  %v10518_v26 = vld [vmem:[#allocation35_spill] sm:$0xff] }
 0x299   : > { %4097 = vst.msk [vmem:[#allocation3 + $0x169] sm:$0xff] %vm326_vm0, %v4010_v7  ;;  %v3482_v57 = vadd.f32 %v3450_v30, %v3413_v55  ;;  %v2543_v58 = vrot.slane %v2417_v0, 1  ;;  %v2544_v34 = vrot.slane %v9202_v60, 1  ;;  %v2178_v8 = vadd.f32 %v2113_v45, %v1933_v11 }
 0x29a   : > { %v2333_v42 = vmul.f32 %v8672_v61, %v9019_v5  ;;  %v2976_v19 = vmul.f32 %v8590_v52, %v9122_v27  ;;  %v9220_v6 = vmul.f32 %v8590_v52, %v9124_v40  ;;  %v1987_v24 = vmul.f32 %v5358_v12, %v5356_v9  ;;  %v10521_v52 = vld [vmem:[#allocation50_spill] sm:$0xff] }
 0x29b   : > { %v3727_v50 = vadd.f32 %v3660_v53, %v3482_v57  ;;  %v2788_v15 = vrot.slane %v2662_v13, 2  ;;  %v2789_v62 = vrot.slane %v9209_v49, 2  ;;  %v1869_v29 = vrot.slane %v10518_v26, 1  ;;  %v5365_v49 = vld [vmem:[%s10027_s3 + $0x8] ss:$0 sm:$0xff] }
 0x29c   : > { %v3905_v23 = vsel %vm917_vm3, %v3902_v4, %v3904_v38  ;;  %v2365_v5 = vadd.f32 %v2333_v42, %v2178_v8  ;;  %v3221_v21 = vmul.f32 %v8605_v3, %v9122_v27  ;;  %v10520_v18 = vrot.slane %v10519_v2, 2  ;;  %v10523_v4 = vld [vmem:[#allocation124_spill] sm:$0xff] }
 0x29d   : > { %v10522_v37 = vrot.slane %v10521_v52, 2  ;;  %v3972_v63 = vadd.f32 %v3905_v23, %v3727_v50  ;;  %v2545_v47 = vsel %vm671_vm2, %v2543_v58, %v2544_v34  ;;  %v9239_v43 = vmul.f32 %v8605_v3, %v9124_v40  ;;  %v5361_v23 = vld [vmem:[%s10027_s3 + $0x4] ss:$0 sm:$0xff]  ;;  %v2297_v52 = vld [vmem:[#allocation2 + $0x1a8] sm:$0x3] }
 0x29e   : > { %v2610_v1 = vadd.f32 %v2545_v47, %v2365_v5  ;;  %v3102_v9 = vrot.slane %v2976_v19, 1  ;;  %v3103_v22 = vrot.slane %v9220_v6, 1  ;;  %v2790_v54 = vsel %vm917_vm3, %v2788_v15, %v2789_v62 }
 0x29f   : > { %v1556_v48 = vsel %vm917_vm3, %v10522_v37, %v10520_v18  ;;  %v4011_v46 = vadd.f32 %v8740_v31, %v3972_v63  ;;  %v2892_v30 = vmul.f32 %v8621_v35, %v9122_v27  ;;  %v3347_v3 = vrot.slane %v3221_v21, 2 }
 0x2a0   : > { %v1620_v16 = vadd.f32 %v1556_v48, %v10523_v4  ;;  %v2855_v28 = vadd.f32 %v2790_v54, %v2610_v1  ;;  %v3535_v51 = vmul.f32 %v8628_v14, %v2295_v56  ;;  %v1657_v11 = vmul.f32 %v5357_v25, %v9176_v59  ;;  %v5359_v25 = vld [vmem:[%s10027_s3 + $0x1] ss:$0 sm:$0xff]  ;;  %v5363_v48 = vld [vmem:[%s10027_s3 + $0x3] ss:$0 sm:$0xff] }
 0x2a1   : > { %4098 = vst.msk [vmem:[#allocation3 + $0x171] sm:$0xff] %vm326_vm0, %v4011_v46  ;;  %v3348_v17 = vrot.slane %v9239_v43, 2  ;;  %v9257_v0 = vmul.f32 %v8628_v14, %v9242_v39  ;;  %v10524_v7 = vrot.slane %v10514_v10, 1  ;;  %v2114_v53 = vrot.slane %v1987_v24, 2  ;;  %v5360_v10 = vld [vmem:[%s10027_s3 + $0x2] ss:$0 sm:$0xff] }
 0x2a2   : > { %v2924_v35 = vadd.f32 %v2892_v30, %v2855_v28  ;;  %v3104_v27 = vsel %vm671_vm2, %v3102_v9, %v3103_v22  ;;  %v1689_v38 = vadd.f32 %v1657_v11, %v1620_v16  ;;  %v3780_v13 = vmul.f32 %v8639_v32, %v2295_v56 }
 0x2a3   : > { %v1870_v55 = vsel %vm671_vm2, %v10524_v7, %v1869_v29  ;;  %v3781_v59 = vmul.f32 %v8639_v32, %v9242_v39  ;;  %v2419_v14 = vmul.f32 %v5359_v25, %v9065_v20  ;;  %v2664_v57 = vmul.f32 %v5360_v10, %v9065_v20 }
 0x2a4   : > { %v3169_v45 = vadd.f32 %v3104_v27, %v2924_v35  ;;  %v3661_v58 = vrot.slane %v3535_v51, 1  ;;  %v1934_v8 = vadd.f32 %v1870_v55, %v1689_v38  ;;  %v2334_v42 = vmul.f32 %v8672_v61, %v9024_v44 }
 0x2a5   : > { %v3349_v32 = vsel %vm917_vm3, %v3347_v3, %v3348_v17  ;;  %v3662_v19 = vrot.slane %v9257_v0, 1  ;;  %v2115_v6 = vsel %vm917_vm3, %v2112_v33, %v2114_v53  ;;  %v2546_v12 = vrot.slane %v2419_v14, 1  ;;  %v5366_v3 = vld [vmem:[%s10027_s3 + $0x6] ss:$0 sm:$0xff] }
 0x2a6   : > { %v3414_v24 = vadd.f32 %v3349_v32, %v3169_v45  ;;  %v3451_v50 = vmul.f32 %v8653_v41, %v2295_v56  ;;  %v2179_v15 = vadd.f32 %v2115_v6, %v1934_v8  ;;  %v3906_v26 = vrot.slane %v3780_v13, 2  ;;  %v5362_v41 = vld [vmem:[%s10027_s3 + $0x5] ss:$0 sm:$0xff] }
 0x2a7   : > { %v3907_v29 = vrot.slane %v3781_v59, 2  ;;  %v2791_v20 = vrot.slane %v2664_v57, 2  ;;  %v2978_v61 = vmul.f32 %v5361_v23, %v9149_v36  ;;  %v3663_v21 = vsel %vm671_vm2, %v3661_v58, %v3662_v19 }
 0x2a8   : > { %v3483_v44 = vadd.f32 %v3451_v50, %v3414_v24  ;;  %v2366_v5 = vadd.f32 %v2334_v42, %v2179_v15  ;;  %v2547_v33 = vsel %vm671_vm2, %v2544_v34, %v2546_v12  ;;  %v3223_v2 = vmul.f32 %v5362_v41, %v9149_v36  ;;  %v5364_v36 = vld [vmem:[%s10027_s3 + $0x7] ss:$0 sm:$0xff] }
 0x2a9   : > { %v2893_v63 = vmul.f32 %v5363_v48, %v9124_v40  ;;  %v3908_v56 = vsel %vm917_vm3, %v3906_v26, %v3907_v29  ;;  %v2792_v60 = vsel %vm917_vm3, %v2789_v62, %v2791_v20  ;;  %v3105_v34 = vrot.slane %v2978_v61, 1 }
 0x2aa   : > { %v3728_v18 = vadd.f32 %v3663_v21, %v3483_v44  ;;  %v2611_v37 = vadd.f32 %v2547_v33, %v2366_v5  ;;  %v3350_v4 = vrot.slane %v3223_v2, 2  ;;  %v3537_v16 = vmul.f32 %v5364_v36, %v2297_v52 }
 0x2ab   : > { %v3106_v40 = vsel %vm671_vm2, %v3103_v22, %v3105_v34  ;;  %v3782_v46 = vmul.f32 %v5365_v49, %v2297_v52  ;;  %v3452_v51 = vmul.f32 %v5366_v3, %v9242_v39 }
 0x2ac   : > { %v3973_v47 = vadd.f32 %v3908_v56, %v3728_v18  ;;  %v2856_v43 = vadd.f32 %v2792_v60, %v2611_v37  ;;  %v3351_v54 = vsel %vm917_vm3, %v3348_v17, %v3350_v4  ;;  %v3664_v30 = vrot.slane %v3537_v16, 1 }
 0x2ad   : > { %v3909_v11 = vrot.slane %v3782_v46, 2 }
 0x2ae   : > { %v4012_v1 = vadd.f32 %v8740_v31, %v3973_v47  ;;  %v2925_v9 = vadd.f32 %v2893_v63, %v2856_v43  ;;  %v3665_v0 = vsel %vm671_vm2, %v3662_v19, %v3664_v30 }
 0x2af   : > { %v3910_v55 = vsel %vm917_vm3, %v3907_v29, %v3909_v11 }
 0x2b0   : > { %4099 = vst.msk [vmem:[#allocation3 + $0x181] sm:$0xff] %vm326_vm0, %v4012_v1  ;;  %v3170_v62 = vadd.f32 %v3106_v40, %v2925_v9 }
 0x2b2   : > { %v3415_v28 = vadd.f32 %v3351_v54, %v3170_v62 }
 0x2b4   : > { %v3484_v22 = vadd.f32 %v3452_v51, %v3415_v28 }
 0x2b6   : > { %v3729_v7 = vadd.f32 %v3665_v0, %v3484_v22 }
 0x2b8   : > { %v3974_v53 = vadd.f32 %v3910_v55, %v3729_v7 }
 0x2ba   : > { %v4013_v35 = vadd.f32 %v8740_v31, %v3974_v53 }
 0x2bc   : > { %4100 = vst.msk [vmem:[#allocation3 + $0x189] sm:$0xff] %vm326_vm0, %v4013_v35 }
 0x2bd PF: > { %s5143_s9 = smul.u32 192, %s5389_s24  ;;  %vm4158_vm4 = vcmask 1046528   ;;  %s5408_s24 = smov 8   ;;  %vm4199_vm5 = vcmask 1045504   ;;  %v4786_v53 = vld [vmem:[%s10029_s5] sm:$0xff]  ;;  %v4787_v35 = vld [vmem:[%s10029_s5 + $0x8] sm:$0xff] }
 0x2be   : > { %s5409_s11 = smov 16   ;;  %s5410_s12 = smov 24   ;;  %vm4650_vm6 = vcmask 64512   ;;  %vm4667_vm7 = vcmask 130048   ;;  %vm4684_vm8 = vcmask 195584   ;;  %vm4701_vm9 = vcmask 261120  }
 0x2bf   : > { %s9319_s10 = scalar_lea.vmem [#allocation3], %s5143_s9  ;;  %s5411_s13 = smov 32   ;;  %vm4718_vm10 = vcmask 326656   ;;  %vm4735_vm11 = vcmask 392192   ;;  %vm4752_vm12 = vcmask 457728   ;;  %vm4769_vm13 = vcmask 523264  }
 0x2c0   : > { %s5412_s14 = smov 40   ;;  %s5413_s15 = smov 48   ;;  %vm4802_vm14 = vcmask 588800  }
 0x2c1   : > { %s5414_s22 = smov 56   ;;  %s5415_s8 = smov 64  }
 0x2c3   : > { %v9322_v39 = vld [vmem:[%s9319_s10 + $0x8] sm:$0xff]  ;;  %v4106_v17 = vld [vmem:[%s9319_s10 + $0x10] sm:$0x3]  ;;  %v9326_v27 = vld [vmem:[%s9319_s10] sm:$0xff] }
 0x2c4   : > { %v4160_v31 = vrot.slane %v9322_v39, 1  ;;  %v4162_v38 = vrot.slane %v4106_v17, 1  ;;  %v4159_v13 = vrot.slane %v9326_v27, 1  ;;  %v9331_v59 = vld [vmem:[%s9319_s10 + $0x68] sm:$0xff]  ;;  %v4118_v25 = vld [vmem:[%s9319_s10 + $0x70] sm:$0x3] }
 0x2c5   : > { %v4180_v14 = vrot.slane %v9331_v59, 1  ;;  %v4182_v10 = vrot.slane %v4118_v25, 1  ;;  %v9336_v57 = vld [vmem:[%s9319_s10 + $0x60] sm:$0xff]  ;;  %v4221_v42 = vrot.slane %v9331_v59, 2  ;;  %v4200_v32 = vrot.slane %v9326_v27, 2  ;;  %v9372_v61 = vld [vmem:[%s9319_s10 + $0x78] sm:$0xff] }
 0x2c6   : > { %v4163_v45 = vsel %vm4158_vm4, %v4160_v31, %v4162_v38  ;;  %v4161_v58 = vsel %vm4158_vm4, %v4159_v13, %v4160_v31  ;;  %v4179_v8 = vrot.slane %v9336_v57, 1  ;;  %v4220_v12 = vrot.slane %v9336_v57, 2  ;;  %v9375_v44 = vld [vmem:[%s9319_s10 + $0x18] sm:$0xff]  ;;  %v9378_v5 = vld [vmem:[%s9319_s10 + $0x80] sm:$0xff]  ;;  %v4121_v48 = vld [vmem:[%s9319_s10 + $0x88] sm:$0x3] }
 0x2c7   : > { %4268 = vrot.lane.b32.xlu1 %v4163_v45, %s5408_s24  ;;  %4266 = vrot.lane.b32.xlu0 %v4161_v58, %s5408_s24  ;;  %v9346_v19 = vsel %vm4158_vm4, %v4180_v14, %v4182_v10  ;;  %v4201_v24 = vrot.slane %v9322_v39, 2  ;;  %v4223_v26 = vrot.slane %v4118_v25, 2  ;;  %v4203_v29 = vrot.slane %v4106_v17, 2  ;;  %v9381_v21 = vld [vmem:[%s9319_s10 + $0x20] sm:$0xff]  ;;  %v4109_v63 = vld [vmem:[%s9319_s10 + $0x28] sm:$0x3] }
 0x2c8   : > { %v9349_v6 = vsel %vm4158_vm4, %v4179_v8, %v4180_v14  ;;  %v9358_v50 = vsel %vm4199_vm5, %v4220_v12, %v4221_v42  ;;  %v4184_v33 = vrot.slane %v9372_v61, 1  ;;  %v4185_v41 = vrot.slane %v9378_v5, 1  ;;  %v9439_v54 = vld [vmem:[%s9319_s10 + $0x90] sm:$0xff]  ;;  %v9452_v28 = vld [vmem:[%s9319_s10 + $0x98] sm:$0xff]  ;;  %v4124_v31 = vld [vmem:[%s9319_s10 + $0xa0] sm:$0x3] }
 0x2c9   : > { %v4202_v15 = vsel %vm4199_vm5, %v4200_v32, %v4201_v24  ;;  %v9365_v20 = vsel %vm4199_vm5, %v4221_v42, %v4223_v26  ;;  %v4204_v23 = vsel %vm4199_vm5, %v4201_v24, %v4203_v29  ;;  %v4164_v2 = vrot.slane %v9375_v44, 1  ;;  %v9442_v30 = vld [vmem:[%s9319_s10 + $0x30] sm:$0xff]  ;;  %v9455_v3 = vld [vmem:[%s9319_s10 + $0x38] sm:$0xff]  ;;  %v4112_v38 = vld [vmem:[%s9319_s10 + $0x40] sm:$0x3] }
 0x2ca   : > { %v4165_v18 = vrot.slane %v9381_v21, 1  ;;  %v9396_v52 = vsel %vm4158_vm4, %v4184_v33, %v4185_v41  ;;  %v4187_v56 = vrot.slane %v4121_v48, 1  ;;  %v4167_v60 = vrot.slane %v4109_v63, 1  ;;  %10529 = vst [vmem:[#allocation131_spill] sm:$0xff] %v9455_v3  ;;  %v4788_v13 = vld [vmem:[%s10029_s5 + $0x10] sm:$0xff]  ;;  %v4789_v25 = vld [vmem:[%s10029_s5 + $0x18] sm:$0xff] }
 0x2cb   : > { %4284 = vrot.lane.b32.xlu1 %v9346_v19, %s5408_s24  ;;  %4282 = vrot.lane.b32.xlu0 %v9349_v6, %s5408_s24  ;;  %10525 = vst [vmem:[#allocation127_spill] sm:$0xff] %v9396_v52  ;;  %v4225_v34 = vrot.slane %v9372_v61, 2  ;;  %v4226_v47 = vrot.slane %v9378_v5, 2  ;;  %v4205_v36 = vrot.slane %v9375_v44, 2  ;;  %v4206_v16 = vrot.slane %v9381_v21, 2  ;;  %v4790_v32 = vld [vmem:[%s10029_s5 + $0x20] sm:$0xff] }
 0x2cc   : > { %v4166_v37 = vsel %vm4158_vm4, %v4164_v2, %v4165_v18  ;;  %v9410_v43 = vsel %vm4158_vm4, %v4185_v41, %v4187_v56  ;;  %v4168_v4 = vsel %vm4158_vm4, %v4165_v18, %v4167_v60  ;;  %v4228_v40 = vrot.slane %v4121_v48, 2  ;;  %v4791_v12 = vld [vmem:[%s10029_s5 + $0x28] sm:$0xff]  ;;  %v4793_v33 = vld [vmem:[%s10029_s5 + $0x38] sm:$0xff] }
 0x2cd   : > { %10526 = vst [vmem:[#allocation128_spill] sm:$0xff] %v9410_v43  ;;  %v9419_v1 = vsel %vm4199_vm5, %v4225_v34, %v4226_v47  ;;  %v4207_v9 = vsel %vm4199_vm5, %v4205_v36, %v4206_v16  ;;  %v4208_v49 = vrot.slane %v4109_v63, 2  ;;  %v4189_v51 = vrot.slane %v9439_v54, 1  ;;  %v9537_v34 = vld [vmem:[%s9319_s10 + $0xa8] sm:$0xff] }
 0x2ce   : > { %10527 = vst [vmem:[#allocation129_spill] sm:$0xff] %v9419_v1  ;;  %v9432_v46 = vsel %vm4199_vm5, %v4226_v47, %v4228_v40  ;;  %v4190_v11 = vrot.slane %v9452_v28, 1  ;;  %v4169_v22 = vrot.slane %v9442_v30, 1  ;;  %v4170_v0 = vrot.slane %v9455_v3, 1  ;;  %10530 = vst [vmem:[#allocation132_spill] sm:$0xff] %v9537_v34  ;;  %v9540_v47 = vld [vmem:[%s9319_s10 + $0x48] sm:$0xff] }
 0x2cf   : > { %4330 = vrot.lane.b32.xlu1 %v9358_v50, %s5409_s11  ;;  %4314 = vrot.lane.b32.xlu0 %v4202_v15, %s5409_s11  ;;  %10528 = vst [vmem:[#allocation130_spill] sm:$0xff] %v9432_v46  ;;  %v4209_v62 = vsel %vm4199_vm5, %v4206_v16, %v4208_v49  ;;  %v5232_v17 = vpack.c.bf16 %v4787_v35, %v4786_v53  ;;  %v4192_v14 = vrot.slane %v4124_v31, 1  ;;  %v4172_v10 = vrot.slane %v4112_v38, 1 }
 0x2d0   : > { %v4191_v7 = vsel %vm4158_vm4, %v4189_v51, %v4190_v11  ;;  %v4171_v55 = vsel %vm4158_vm4, %v4169_v22, %v4170_v0  ;;  %v5236_v45 = vpack.c.bf16 %v4789_v25, %v4788_v13  ;;  %v4230_v58 = vrot.slane %v9439_v54, 2  ;;  %10531 = vst [vmem:[#allocation133_spill] sm:$0xff] %v9540_v47  ;;  %v9564_v51 = vld [vmem:[%s9319_s10 + $0x50] sm:$0xff]  ;;  %v4127_v13 = vld [vmem:[%s9319_s10 + $0xb8] sm:$0x3] }
 0x2d1   : > { %5233 = vmatprep.subr.bf16.mxu0 %v5232_v17  ;;  %5248 = vmatprep.subr.bf16.mxu1 %v5232_v17  ;;  %v4231_v8 = vrot.slane %v9452_v28, 2  ;;  %v4210_v42 = vrot.slane %v9442_v30, 2  ;;  %v4193_v24 = vsel %vm4158_vm4, %v4190_v11, %v4192_v14  ;;  %v4173_v15 = vsel %vm4158_vm4, %v4170_v0, %v4172_v10  ;;  %10533 = vst [vmem:[#allocation135_spill] sm:$0xff] %v9564_v51  ;;  %v4115_v25 = vld [vmem:[%s9319_s10 + $0x58] sm:$0x3] }
 0x2d2   : > { %5235 = vmatpush3.bf16.msra.mxu0 %v5232_v17  ;;  %5253 = vmatpush3.bf16.msra.mxu1 %v5232_v17  ;;  %v4211_v26 = vrot.slane %v9455_v3, 2  ;;  %v5240_v29 = vpack.c.bf16 %v4791_v12, %v4790_v32  ;;  %v4233_v48 = vrot.slane %v4124_v31, 2  ;;  %v4213_v63 = vrot.slane %v4112_v38, 2 }
 0x2d3   : > { %4332 = vrot.lane.b32.xlu1 %v9365_v20, %s5409_s11  ;;  %4316 = vrot.lane.b32.xlu0 %v4204_v23, %s5409_s11  ;;  %v4792_v23 = vld [vmem:[%s10029_s5 + $0x30] sm:$0xff]  ;;  %v4232_v41 = vsel %vm4199_vm5, %v4230_v58, %v4231_v8  ;;  %v4194_v11 = vrot.slane %v9537_v34, 1  ;;  %v4174_v0 = vrot.slane %v9540_v47, 1  ;;  %v4177_v58 = vrot.slane %v4115_v25, 1 }
 0x2d4   : > { %5237 = vmatprep.subr.bf16.mxu0 %v5236_v45  ;;  %5249 = vmatprep.subr.bf16.mxu1 %v5236_v45  ;;  %v4212_v2 = vsel %vm4199_vm5, %v4210_v42, %v4211_v26  ;;  %v5244_v18 = vpack.c.bf16 %v4793_v33, %v4792_v23  ;;  %v4234_v56 = vsel %vm4199_vm5, %v4231_v8, %v4233_v48 }
 0x2d5   : > { %v4214_v60 = vsel %vm4199_vm5, %v4211_v26, %v4213_v63  ;;  %v4215_v26 = vrot.slane %v9540_v47, 2 }
 0x2d6   : > { %5239 = vmatpush3.bf16.msra.mxu0 %v5236_v45  ;;  %5254 = vmatpush3.bf16.msra.mxu1 %v5236_v45  ;;  %v4197_v45 = vrot.slane %v4127_v13, 1 }
 0x2d7   : > { %4378 = vrot.lane.b32.xlu1 %v9372_v61, %s5410_s12  ;;  %4362 = vrot.lane.b32.xlu0 %v9375_v44, %s5410_s12 }
 0x2d8   : > { %5241 = vmatprep.subr.bf16.mxu0 %v5240_v29  ;;  %5250 = vmatprep.subr.bf16.mxu1 %v5240_v29 }
 0x2da   : > { %5243 = vmatpush3.bf16.msra.mxu0 %v5240_v29  ;;  %5255 = vmatpush3.bf16.msra.mxu1 %v5240_v29  ;;  %v4216_v29 = vrot.slane %v9564_v51, 2 }
 0x2db   : > { %4380 = vrot.lane.b32.xlu1 %v9378_v5, %s5410_s12  ;;  %4364 = vrot.lane.b32.xlu0 %v9381_v21, %s5410_s12 }
 0x2dc   : > { %5245 = vmatprep.subr.bf16.mxu0 %v5244_v18  ;;  %5251 = vmatprep.subr.bf16.mxu1 %v5244_v18 }
 0x2de   : > { %5247 = vmatpush3.bf16.msra.mxu0 %v5244_v18  ;;  %5256 = vmatpush3.bf16.msra.mxu1 %v5244_v18 }
 0x2df   : > { %4426 = vrot.lane.b32.xlu1 %v9396_v52, %s5411_s13  ;;  %4410 = vrot.lane.b32.xlu0 %v4166_v37, %s5411_s13 }
 0x2e3   : > { %4286 = vrot.lane.b32.xlu1 %v9396_v52, %s5408_s24  ;;  %4270 = vrot.lane.b32.xlu0 %v4166_v37, %s5408_s24  ;;  %v4794_v37 = vld [vmem:[%s10029_s5 + $0x40] sm:$0xff] }
 0x2e4   : > { %5206 = vmatprep.subr.mxu0 %v4794_v37  ;;  %5252 = vmatprep.subr.mxu1 %v4794_v37 }
 0x2e5   : > { %5207 = vmatpush3.msra.mxu0 %v4794_v37  ;;  %5257 = vmatpush3.msra.mxu1 %v4794_v37 }
 0x2e7   : > { %4428 = vrot.lane.b32.xlu1 %v9410_v43, %s5411_s13  ;;  %4412 = vrot.lane.b32.xlu0 %v4168_v4, %s5411_s13 }
 0x2eb   : > { %4474 = vrot.lane.b32.xlu1 %v9419_v1, %s5412_s14  ;;  %4458 = vrot.lane.b32.xlu0 %v4207_v9, %s5412_s14 }
 0x2ef   : > { %4288 = vrot.lane.b32.xlu1 %v9410_v43, %s5408_s24  ;;  %4272 = vrot.lane.b32.xlu0 %v4168_v4, %s5408_s24 }
 0x2f3   : > { %4334 = vrot.lane.b32.xlu1 %v9419_v1, %s5409_s11  ;;  %4318 = vrot.lane.b32.xlu0 %v4207_v9, %s5409_s11 }
 0x2f7   : > { %4476 = vrot.lane.b32.xlu1 %v9432_v46, %s5412_s14  ;;  %4460 = vrot.lane.b32.xlu0 %v4209_v62, %s5412_s14 }
 0x2fb   : > { %4522 = vrot.lane.b32.xlu1 %v9439_v54, %s5413_s15  ;;  %4506 = vrot.lane.b32.xlu0 %v9442_v30, %s5413_s15 }
 0x2ff   : > { %4336 = vrot.lane.b32.xlu1 %v9432_v46, %s5409_s11  ;;  %4320 = vrot.lane.b32.xlu0 %v4209_v62, %s5409_s11  ;;  %v9561_v62 = vld [vmem:[%s9319_s10 + $0xb0] sm:$0xff] }
 0x300   : > { %10532 = vst [vmem:[#allocation134_spill] sm:$0xff] %v9561_v62  ;;  %v4195_v22 = vrot.slane %v9561_v62, 1 }
 0x302   : > { %v4196_v35 = vsel %vm4158_vm4, %v4194_v11, %v4195_v22  ;;  %v4198_v32 = vsel %vm4158_vm4, %v4195_v22, %v4197_v45  ;;  %v4238_v11 = vrot.slane %v4127_v13, 2  ;;  %v4218_v22 = vrot.slane %v4115_v25, 2 }
 0x303   : > { %4382 = vrot.lane.b32.xlu1 %v9439_v54, %s5410_s12  ;;  %4366 = vrot.lane.b32.xlu0 %v9442_v30, %s5410_s12 }
 0x307   : > { %4524 = vrot.lane.b32.xlu1 %v9452_v28, %s5413_s15  ;;  %4508 = vrot.lane.b32.xlu0 %v9455_v3, %s5413_s15 }
 0x30b   : > { %4570 = vrot.lane.b32.xlu1 %v4191_v7, %s5414_s22  ;;  %4554 = vrot.lane.b32.xlu0 %v4171_v55, %s5414_s22 }
 0x30f   : > { %4384 = vrot.lane.b32.xlu1 %v9452_v28, %s5410_s12  ;;  %4368 = vrot.lane.b32.xlu0 %v9455_v3, %s5410_s12 }
 0x313   : > { %4430 = vrot.lane.b32.xlu1 %v4191_v7, %s5411_s13  ;;  %4414 = vrot.lane.b32.xlu0 %v4171_v55, %s5411_s13 }
 0x317   : > { %4572 = vrot.lane.b32.xlu1 %v4193_v24, %s5414_s22  ;;  %4556 = vrot.lane.b32.xlu0 %v4173_v15, %s5414_s22 }
 0x31b   : > { %4618 = vrot.lane.b32.xlu1 %v4232_v41, %s5415_s8  ;;  %4602 = vrot.lane.b32.xlu0 %v4212_v2, %s5415_s8 }
 0x31f   : > { %4290 = vrot.lane.b32.xlu1 %v4191_v7, %s5408_s24  ;;  %4274 = vrot.lane.b32.xlu0 %v4171_v55, %s5408_s24  ;;  %v4175_v7 = vrot.slane %v9564_v51, 1 }
 0x321   : > { %v4176_v17 = vsel %vm4158_vm4, %v4174_v0, %v4175_v7  ;;  %v4178_v12 = vsel %vm4158_vm4, %v4175_v7, %v4177_v58 }
 0x323   : > { %4432 = vrot.lane.b32.xlu1 %v4193_v24, %s5411_s13  ;;  %4416 = vrot.lane.b32.xlu0 %v4173_v15, %s5411_s13 }
 0x327   : > { %4478 = vrot.lane.b32.xlu1 %v4232_v41, %s5412_s14  ;;  %4462 = vrot.lane.b32.xlu0 %v4212_v2, %s5412_s14 }
 0x32b   : > { %4620 = vrot.lane.b32.xlu1 %v4234_v56, %s5415_s8  ;;  %4604 = vrot.lane.b32.xlu0 %v4214_v60, %s5415_s8 }
 0x32f   : > { %4292 = vrot.lane.b32.xlu1 %v4193_v24, %s5408_s24  ;;  %4276 = vrot.lane.b32.xlu0 %v4173_v15, %s5408_s24  ;;  %v4235_v24 = vrot.slane %v9537_v34, 2  ;;  %v4236_v15 = vrot.slane %v9561_v62, 2 }
 0x333   : > { %4338 = vrot.lane.b32.xlu1 %v4232_v41, %s5409_s11  ;;  %4322 = vrot.lane.b32.xlu0 %v4212_v2, %s5409_s11  ;;  %v4237_v41 = vsel %vm4199_vm5, %v4235_v24, %v4236_v15  ;;  %v4217_v2 = vsel %vm4199_vm5, %v4215_v26, %v4216_v29 }
 0x337   : > { %4480 = vrot.lane.b32.xlu1 %v4234_v56, %s5412_s14  ;;  %4464 = vrot.lane.b32.xlu0 %v4214_v60, %s5412_s14 }
 0x339   : > { %v9542_v4 = vpop.permute.xlu1 %4268  ;;  %v9544_v36 = vpop.permute.xlu0 %4266 }
 0x33b   : > { %4526 = vrot.lane.b32.xlu1 %v9537_v34, %s5413_s15  ;;  %4510 = vrot.lane.b32.xlu0 %v9540_v47, %s5413_s15 }
 0x33d   : > { %v9550_v16 = vpop.permute.xlu1 %4284  ;;  %v9552_v9 = vpop.permute.xlu0 %4282 }
 0x33f   : > { %4340 = vrot.lane.b32.xlu1 %v4234_v56, %s5409_s11  ;;  %4324 = vrot.lane.b32.xlu0 %v4214_v60, %s5409_s11 }
 0x341   : > { %v9556_v40 = vpop.permute.xlu1 %4330  ;;  %v9558_v49 = vpop.permute.xlu0 %4314 }
 0x343   : > { %4386 = vrot.lane.b32.xlu1 %v9537_v34, %s5410_s12  ;;  %4370 = vrot.lane.b32.xlu0 %v9540_v47, %s5410_s12 }
 0x345   : > { %v9574_v55 = vpop.permute.xlu1 %4332  ;;  %v9576_v53 = vpop.permute.xlu0 %4316 }
 0x347   : > { %4528 = vrot.lane.b32.xlu1 %v9561_v62, %s5413_s15  ;;  %4512 = vrot.lane.b32.xlu0 %v9564_v51, %s5413_s15 }
 0x349   : > { %v9584_v31 = vpop.permute.xlu1 %4378  ;;  %v9586_v38 = vpop.permute.xlu0 %4362 }
 0x34b   : > { %4574 = vrot.lane.b32.xlu1 %v4196_v35, %s5414_s22  ;;  %4558 = vrot.lane.b32.xlu0 %v4176_v17, %s5414_s22 }
 0x34d   : > { %v9592_v14 = vpop.permute.xlu1 %4380  ;;  %v9594_v10 = vpop.permute.xlu0 %4364 }
 0x34f   : > { %4388 = vrot.lane.b32.xlu1 %v9561_v62, %s5410_s12  ;;  %4372 = vrot.lane.b32.xlu0 %v9564_v51, %s5410_s12  ;;  %v9676_v62 = vld [vmem:[%s9319_s10 + $0xc8] sm:$0xff] }
 0x350   : > { %v4244_v1 = vrot.slane %v9676_v62, 1 }
 0x351   : > { %v9600_v8 = vpop.permute.xlu1 %4426  ;;  %v9602_v42 = vpop.permute.xlu0 %4410 }
 0x353   : > { %4434 = vrot.lane.b32.xlu1 %v4196_v35, %s5411_s13  ;;  %4418 = vrot.lane.b32.xlu0 %v4176_v17, %s5411_s13 }
 0x355   : > { %v4287_v23 = vpop.permute.xlu1 %4286  ;;  %v4271_v33 = vpop.permute.xlu0 %4270 }
 0x356   : > { %v4661_v47 = vsel %vm4650_vm6, %v9372_v61, %v4287_v23  ;;  %v4653_v34 = vsel %vm4650_vm6, %v9375_v44, %v4271_v33 }
 0x357   : > { %4576 = vrot.lane.b32.xlu1 %v4198_v32, %s5414_s22  ;;  %4560 = vrot.lane.b32.xlu0 %v4178_v12, %s5414_s22 }
 0x359   : > { %v9616_v18 = vpop.permute.xlu1 %4428  ;;  %v9618_v37 = vpop.permute.xlu0 %4412 }
 0x35b   : > { %4622 = vrot.lane.b32.xlu1 %v4237_v41, %s5415_s8  ;;  %4606 = vrot.lane.b32.xlu0 %v4217_v2, %s5415_s8 }
 0x35d   : > { %v9622_v48 = vpop.permute.xlu1 %4474  ;;  %v9624_v63 = vpop.permute.xlu0 %4458 }
 0x35f   : > { %4294 = vrot.lane.b32.xlu1 %v4196_v35, %s5408_s24  ;;  %4278 = vrot.lane.b32.xlu0 %v4176_v17, %s5408_s24  ;;  %v4239_v35 = vsel %vm4199_vm5, %v4236_v15, %v4238_v11  ;;  %v4219_v17 = vsel %vm4199_vm5, %v4216_v29, %v4218_v22  ;;  %v9659_v11 = vld [vmem:[%s9319_s10 + $0xc0] sm:$0xff] }
 0x360   : > { %v4243_v46 = vrot.slane %v9659_v11, 1 }
 0x361   : > { %v9628_v56 = vpop.permute.xlu1 %4288  ;;  %v9630_v60 = vpop.permute.xlu0 %4272 }
 0x363   : > { %4436 = vrot.lane.b32.xlu1 %v4198_v32, %s5411_s13  ;;  %4420 = vrot.lane.b32.xlu0 %v4178_v12, %s5411_s13 }
 0x365   : > { %v4335_v0 = vpop.permute.xlu1 %4334  ;;  %v4319_v7 = vpop.permute.xlu0 %4318 }
 0x367   : > { %4482 = vrot.lane.b32.xlu1 %v4237_v41, %s5412_s14  ;;  %4466 = vrot.lane.b32.xlu0 %v4217_v2, %s5412_s14 }
 0x369   : > { %v9638_v45 = vpop.permute.xlu1 %4476  ;;  %v9640_v58 = vpop.permute.xlu0 %4460 }
 0x36b   : > { %4624 = vrot.lane.b32.xlu1 %v4239_v35, %s5415_s8  ;;  %4608 = vrot.lane.b32.xlu0 %v4219_v17, %s5415_s8 }
 0x36d   : > { %v9644_v13 = vpop.permute.xlu1 %4522  ;;  %v9646_v25 = vpop.permute.xlu0 %4506 }
 0x36f   : > { %4296 = vrot.lane.b32.xlu1 %v4198_v32, %s5408_s24  ;;  %4280 = vrot.lane.b32.xlu0 %v4178_v12, %s5408_s24 }
 0x371   : > { %v9650_v24 = vpop.permute.xlu1 %4336  ;;  %v9652_v15 = vpop.permute.xlu0 %4320 }
 0x373   : > { %4342 = vrot.lane.b32.xlu1 %v4237_v41, %s5409_s11  ;;  %4326 = vrot.lane.b32.xlu0 %v4217_v2, %s5409_s11 }
 0x375   : > { %v4383_v26 = vpop.permute.xlu1 %4382  ;;  %v4367_v29 = vpop.permute.xlu0 %4366 }
 0x377   : > { %4484 = vrot.lane.b32.xlu1 %v4239_v35, %s5412_s14  ;;  %4468 = vrot.lane.b32.xlu0 %v4219_v17, %s5412_s14 }
 0x379   : > { %v9661_v32 = vpop.permute.xlu1 %4524  ;;  %v9663_v12 = vpop.permute.xlu0 %4508 }
 0x37b   : > { %4530 = vrot.lane.b32.xlu1 %v9659_v11, %s5413_s15  ;;  %4514 = vrot.lane.b32.xlu0 %v9336_v57, %s5413_s15 }
 0x37d   : > { %v4571_v41 = vpop.permute.xlu1 %4570  ;;  %v4555_v2 = vpop.permute.xlu0 %4554 }
 0x37f   : > { %4344 = vrot.lane.b32.xlu1 %v4239_v35, %s5409_s11  ;;  %4328 = vrot.lane.b32.xlu0 %v4219_v17, %s5409_s11  ;;  %v4678_v35 = vsel %vm4667_vm7, %v4661_v47, %v4335_v0  ;;  %v4670_v17 = vsel %vm4667_vm7, %v4653_v34, %v4319_v7  ;;  %v4651_v34 = vsel %vm4650_vm6, %v9326_v27, %v9544_v36 }
 0x380   : > { %v4695_v23 = vsel %vm4684_vm8, %v4678_v35, %v4383_v26  ;;  %v4687_v43 = vsel %vm4684_vm8, %v4670_v17, %v4367_v29  ;;  %v4659_v47 = vsel %vm4650_vm6, %v9336_v57, %v9552_v9  ;;  %v4245_v7 = vsel %vm4158_vm4, %v4243_v46, %v4244_v1 }
 0x381   : > { %v9671_v22 = vpop.permute.xlu1 %4384  ;;  %v9673_v51 = vpop.permute.xlu0 %4368  ;;  %v4676_v0 = vsel %vm4667_vm7, %v4659_v47, %v9556_v40  ;;  %v4249_v47 = vrot.slane %v9676_v62, 2 }
 0x382   : > { %v4693_v27 = vsel %vm4684_vm8, %v4676_v0, %v9584_v31 }
 0x383   : > { %4390 = vrot.lane.b32.xlu1 %v9659_v11, %s5410_s12  ;;  %4374 = vrot.lane.b32.xlu0 %v9336_v57, %s5410_s12  ;;  %v4710_v26 = vsel %vm4701_vm9, %v4693_v27, %v9600_v8 }
 0x384   : > { %v4727_v46 = vsel %vm4718_vm10, %v4710_v26, %v9622_v48 }
 0x385   : > { %v4431_v44 = vpop.permute.xlu1 %4430  ;;  %v4415_v33 = vpop.permute.xlu0 %4414  ;;  %v4744_v31 = vsel %vm4735_vm11, %v4727_v46, %v9644_v13 }
 0x386   : > { %v9693_v52 = vsel %vm4701_vm9, %v4695_v23, %v4431_v44  ;;  %v9696_v3 = vsel %vm4701_vm9, %v4687_v43, %v4415_v33  ;;  %v4668_v43 = vsel %vm4667_vm7, %v4651_v34, %v9558_v49  ;;  %v4761_v8 = vsel %vm4752_vm12, %v4744_v31, %v4571_v41 }
 0x387   : > { %4532 = vrot.lane.b32.xlu1 %v9676_v62, %s5413_s15  ;;  %4516 = vrot.lane.b32.xlu0 %v9331_v59, %s5413_s15  ;;  %v4685_v57 = vsel %vm4684_vm8, %v4668_v43, %v9586_v38  ;;  %v4654_v23 = vsel %vm4650_vm6, %v9381_v21, %v9630_v60  ;;  %v4248_v44 = vrot.slane %v9659_v11, 2 }
 0x388   : > { %v4702_v40 = vsel %vm4701_vm9, %v4685_v57, %v9602_v42  ;;  %v4671_v34 = vsel %vm4667_vm7, %v4654_v23, %v9652_v15 }
 0x389   : > { %v4573_v36 = vpop.permute.xlu1 %4572  ;;  %v4557_v9 = vpop.permute.xlu0 %4556  ;;  %v4719_v49 = vsel %vm4718_vm10, %v4702_v40, %v9624_v63  ;;  %v4130_v63 = vld [vmem:[%s9319_s10 + $0xd0] sm:$0x3]  ;;  %v4688_v60 = vsel %vm4684_vm8, %v4671_v34, %v9673_v51 }
 0x38a   : > { %v4736_v38 = vsel %vm4735_vm11, %v4719_v49, %v9646_v25  ;;  %v4246_v13 = vrot.slane %v4130_v63, 1 }
 0x38b   : > { %4578 = vrot.lane.b32.xlu1 %v4245_v7, %s5414_s22  ;;  %4562 = vrot.lane.b32.xlu0 %v9349_v6, %s5414_s22  ;;  %v4753_v42 = vsel %vm4752_vm12, %v4736_v38, %v4555_v2  ;;  %v4662_v2 = vsel %vm4650_vm6, %v9378_v5, %v9628_v56 }
 0x38c   : > { %v4679_v33 = vsel %vm4667_vm7, %v4662_v2, %v9650_v24  ;;  %v4247_v56 = vsel %vm4158_vm4, %v4244_v1, %v4246_v13  ;;  %v4660_v1 = vsel %vm4650_vm6, %v9331_v59, %v9550_v16 }
 0x38d   : > { %v4619_v48 = vpop.permute.xlu1 %4618  ;;  %v4603_v29 = vpop.permute.xlu0 %4602  ;;  %v4696_v21 = vsel %vm4684_vm8, %v4679_v33, %v9671_v22  ;;  %v4250_v22 = vsel %vm4199_vm5, %v4248_v44, %v4249_v47 }
 0x38e   : > { %v4778_v35 = vsel %vm4769_vm13, %v4761_v8, %v4619_v48  ;;  %v4770_v17 = vsel %vm4769_vm13, %v4753_v42, %v4603_v29  ;;  %v4132_v42 = vld [vmem:[%s9319_s10 + $0xe0] sm:$0xff] }
 0x38f   : > { %4392 = vrot.lane.b32.xlu1 %v9676_v62, %s5410_s12  ;;  %5220 = vmatprep.mubr.msk.f32.mxu1 %vm4802_vm14, %v4778_v35  ;;  %v4677_v62 = vsel %vm4667_vm7, %v4660_v1, %v9574_v55  ;;  %v4257_v29 = vrot.slane %v4132_v42, 1  ;;  %v10534_v35 = vld [vmem:[#allocation131_spill] sm:$0xff] }
 0x390   : > { %4376 = vrot.lane.b32.xlu0 %v9331_v59, %s5410_s12  ;;  %5208 = vmatprep.mubr.msk.f32.mxu0 %vm4802_vm14, %v4770_v17 }
 0x391   : > { %v4291_v25 = vpop.permute.xlu1 %4290  ;;  %v4275_v41 = vpop.permute.xlu0 %4274 }
 0x392   : > { %v4663_v26 = vsel %vm4650_vm6, %v9439_v54, %v4291_v25  ;;  %v4131_v54 = vld [vmem:[%s9319_s10 + $0xd8] sm:$0xff] }
 0x393   : > { %4438 = vrot.lane.b32.xlu1 %v4245_v7, %s5411_s13  ;;  %v4256_v48 = vrot.slane %v4131_v54, 1 }
 0x394   : > { %4422 = vrot.lane.b32.xlu0 %v9349_v6, %s5411_s13  ;;  %v4652_v6 = vsel %vm4650_vm6, %v9322_v39, %v9542_v4  ;;  %v4694_v39 = vsel %vm4684_vm8, %v4677_v62, %v9592_v14 }
 0x395   : > { %v4433_v11 = vpop.permute.xlu1 %4432  ;;  %v4417_v0 = vpop.permute.xlu0 %4416  ;;  %v4669_v51 = vsel %vm4667_vm7, %v4652_v6, %v9576_v53  ;;  %v4711_v55 = vsel %vm4701_vm9, %v4694_v39, %v9616_v18 }
 0x396   : > { %v9764_v24 = vsel %vm4701_vm9, %v4696_v21, %v4433_v11  ;;  %v9767_v15 = vsel %vm4701_vm9, %v4688_v60, %v4417_v0  ;;  %v4686_v4 = vsel %vm4684_vm8, %v4669_v51, %v9594_v10  ;;  %v4728_v43 = vsel %vm4718_vm10, %v4711_v55, %v9638_v45  ;;  %v10535_v21 = vld [vmem:[#allocation127_spill] sm:$0xff]  ;;  %v10536_v0 = vld [vmem:[#allocation128_spill] sm:$0xff] }
 0x397   : > { %4580 = vrot.lane.b32.xlu1 %v4247_v56, %s5414_s22  ;;  %v4703_v53 = vsel %vm4701_vm9, %v4686_v4, %v9618_v37  ;;  %v4745_v14 = vsel %vm4735_vm11, %v4728_v43, %v9661_v32  ;;  %v4251_v32 = vrot.slane %v4130_v63, 2 }
 0x398   : > { %4564 = vrot.lane.b32.xlu0 %v9346_v19, %s5414_s22  ;;  %v4720_v7 = vsel %vm4718_vm10, %v4703_v53, %v9640_v58  ;;  %v4762_v18 = vsel %vm4752_vm12, %v4745_v14, %v4573_v36 }
 0x399   : > { %v9787_v59 = vpop.permute.xlu1 %4478  ;;  %v9789_v16 = vpop.permute.xlu0 %4462  ;;  %v4737_v10 = vsel %vm4735_vm11, %v4720_v7, %v9663_v12  ;;  %v10538_v7 = vld [vmem:[#allocation130_spill] sm:$0xff] }
 0x39a   : > { %v4754_v37 = vsel %vm4752_vm12, %v4737_v10, %v4557_v9  ;;  %v4252_v9 = vsel %vm4199_vm5, %v4249_v47, %v4251_v32  ;;  %v4261_v47 = vrot.slane %v4131_v54, 2 }
 0x39b   : > { %4626 = vrot.lane.b32.xlu1 %v4250_v22, %s5415_s8 }
 0x39c   : > { %4610 = vrot.lane.b32.xlu0 %v9358_v50, %s5415_s8 }
 0x39d   : > { %v4621_v27 = vpop.permute.xlu1 %4620  ;;  %v4605_v45 = vpop.permute.xlu0 %4604 }
 0x39e   : > { %v4779_v57 = vsel %vm4769_vm13, %v4762_v18, %v4621_v27  ;;  %v4771_v58 = vsel %vm4769_vm13, %v4754_v37, %v4605_v45 }
 0x39f   : > { %4440 = vrot.lane.b32.xlu1 %v4247_v56, %s5411_s13  ;;  %5221 = vmatmul.mubr.msk.f32.vlgmr.msra.gmra.mrb[0].mxu1 %vm4802_vm14, %v4779_v57  ;;  %v4262_v56 = vrot.slane %v4132_v42, 2  ;;  %v4729_v57 = vsel %vm4718_vm10, %v9693_v52, %v9787_v59 }
 0x3a0   : > { %4424 = vrot.lane.b32.xlu0 %v9346_v19, %s5411_s13  ;;  %5209 = vmatmul.mubr.msk.f32.vlgmr.msra.gmra.mrb[0].mxu0 %vm4802_vm14, %v4771_v58  ;;  %v4655_v19 = vsel %vm4650_vm6, %v9442_v30, %v4275_v41  ;;  %v4721_v58 = vsel %vm4718_vm10, %v9696_v3, %v9789_v16 }
 0x3a1   : > { %v4293_v12 = vpop.permute.xlu1 %4292  ;;  %v4277_v36 = vpop.permute.xlu0 %4276  ;;  %v4263_v6 = vsel %vm4199_vm5, %v4261_v47, %v4262_v56 }
 0x3a2   : > { %v4664_v63 = vsel %vm4650_vm6, %v9452_v28, %v4293_v12  ;;  %v4656_v17 = vsel %vm4650_vm6, %v10534_v35, %v4277_v36 }
 0x3a3   : > { %4486 = vrot.lane.b32.xlu1 %v4250_v22, %s5412_s14  ;;  %v10537_v22 = vld [vmem:[#allocation129_spill] sm:$0xff] }
 0x3a4   : > { %4470 = vrot.lane.b32.xlu0 %v9358_v50, %s5412_s14 }
 0x3a5   : > { %v4339_v40 = vpop.permute.xlu1 %4338  ;;  %v4323_v46 = vpop.permute.xlu0 %4322 }
 0x3a6   : > { %v4680_v49 = vsel %vm4667_vm7, %v4663_v26, %v4339_v40  ;;  %v4672_v31 = vsel %vm4667_vm7, %v4655_v19, %v4323_v46 }
 0x3a7   : > { %4628 = vrot.lane.b32.xlu1 %v4252_v9, %s5415_s8 }
 0x3a8   : > { %4612 = vrot.lane.b32.xlu0 %v9365_v20, %s5415_s8 }
 0x3a9   : > { %v9828_v50 = vpop.permute.xlu1 %4480  ;;  %v9830_v38 = vpop.permute.xlu0 %4464 }
 0x3ab   : > { %4488 = vrot.lane.b32.xlu1 %v4252_v9, %s5412_s14 }
 0x3ac   : > { %4472 = vrot.lane.b32.xlu0 %v9365_v20, %s5412_s14  ;;  %v4133_v20 = vld [vmem:[%s9319_s10 + $0xe8] sm:$0x3] }
 0x3ad   : > { %v4527_v30 = vpop.permute.xlu1 %4526  ;;  %v4511_v8 = vpop.permute.xlu0 %4510  ;;  %v4259_v23 = vrot.slane %v4133_v20, 1  ;;  %v4264_v1 = vrot.slane %v4133_v20, 2 }
 0x3ae   : > { %v4746_v32 = vsel %vm4735_vm11, %v4729_v57, %v4527_v30  ;;  %v4738_v12 = vsel %vm4735_vm11, %v4721_v58, %v4511_v8  ;;  %v4730_v8 = vsel %vm4718_vm10, %v9764_v24, %v9828_v50  ;;  %v10539_v50 = vld [vmem:[#allocation132_spill] sm:$0xff] }
 0x3af   : > { %4534 = vrot.lane.b32.xlu1 %v4131_v54, %s5413_s15  ;;  %v4260_v60 = vsel %vm4158_vm4, %v4257_v29, %v4259_v23  ;;  %v4265_v39 = vsel %vm4199_vm5, %v4262_v56, %v4264_v1 }
 0x3b0   : > { %4518 = vrot.lane.b32.xlu0 %v9372_v61, %s5413_s15  ;;  %v4258_v61 = vsel %vm4158_vm4, %v4256_v48, %v4257_v29 }
 0x3b1   : > { %v4341_v13 = vpop.permute.xlu1 %4340  ;;  %v4325_v25 = vpop.permute.xlu0 %4324 }
 0x3b2   : > { %v4681_v41 = vsel %vm4667_vm7, %v4664_v63, %v4341_v13  ;;  %v4673_v2 = vsel %vm4667_vm7, %v4656_v17, %v4325_v25 }
 0x3b3   : > { %4536 = vrot.lane.b32.xlu1 %v4132_v42, %s5413_s15  ;;  %v4722_v42 = vsel %vm4718_vm10, %v9767_v15, %v9830_v38 }
 0x3b4   : > { %4520 = vrot.lane.b32.xlu0 %v9378_v5, %s5413_s15 }
 0x3b5   : > { %v4387_v44 = vpop.permute.xlu1 %4386  ;;  %v4371_v28 = vpop.permute.xlu0 %4370 }
 0x3b6   : > { %v4697_v33 = vsel %vm4684_vm8, %v4680_v49, %v4387_v44  ;;  %v4689_v34 = vsel %vm4684_vm8, %v4672_v31, %v4371_v28 }
 0x3b7   : > { %4582 = vrot.lane.b32.xlu1 %v4258_v61, %s5414_s22 }
 0x3b8   : > { %4566 = vrot.lane.b32.xlu0 %v10535_v21, %s5414_s22 }
 0x3b9   : > { %v4529_v11 = vpop.permute.xlu1 %4528  ;;  %v4513_v5 = vpop.permute.xlu0 %4512 }
 0x3ba   : > { %v4747_v48 = vsel %vm4735_vm11, %v4730_v8, %v4529_v11  ;;  %v4739_v29 = vsel %vm4735_vm11, %v4722_v42, %v4513_v5 }
 0x3bb   : > { %4584 = vrot.lane.b32.xlu1 %v4260_v60, %s5414_s22 }
 0x3bc   : > { %4568 = vrot.lane.b32.xlu0 %v10536_v0, %s5414_s22 }
 0x3bd   : > { %v4575_v62 = vpop.permute.xlu1 %4574  ;;  %v4559_v51 = vpop.permute.xlu0 %4558 }
 0x3be   : > { %v4763_v36 = vsel %vm4752_vm12, %v4746_v32, %v4575_v62  ;;  %v4755_v9 = vsel %vm4752_vm12, %v4738_v12, %v4559_v51 }
 0x3bf   : > { %4630 = vrot.lane.b32.xlu1 %v4263_v6, %s5415_s8 }
 0x3c0   : > { %4614 = vrot.lane.b32.xlu0 %v10537_v22, %s5415_s8 }
 0x3c1   : > { %v4389_v4 = vpop.permute.xlu1 %4388  ;;  %v4373_v55 = vpop.permute.xlu0 %4372 }
 0x3c2   : > { %v4698_v53 = vsel %vm4684_vm8, %v4681_v41, %v4389_v4  ;;  %v4690_v43 = vsel %vm4684_vm8, %v4673_v2, %v4373_v55  ;;  %v10540_v41 = vld [vmem:[#allocation133_spill] sm:$0xff] }
 0x3c3   : > { %4632 = vrot.lane.b32.xlu1 %v4265_v39, %s5415_s8 }
 0x3c4   : > { %4616 = vrot.lane.b32.xlu0 %v10538_v7, %s5415_s8 }
 0x3c5   : > { %v4435_v14 = vpop.permute.xlu1 %4434  ;;  %v4419_v10 = vpop.permute.xlu0 %4418 }
 0x3c6   : > { %v9871_v18 = vsel %vm4701_vm9, %v4697_v33, %v4435_v14  ;;  %v9874_v37 = vsel %vm4701_vm9, %v4689_v34, %v4419_v10 }
 0x3c9   : > { %v4577_v27 = vpop.permute.xlu1 %4576  ;;  %v4561_v45 = vpop.permute.xlu0 %4560 }
 0x3ca   : > { %v4764_v63 = vsel %vm4752_vm12, %v4747_v48, %v4577_v27  ;;  %v4756_v35 = vsel %vm4752_vm12, %v4739_v29, %v4561_v45 }
 0x3cd   : > { %v4623_v26 = vpop.permute.xlu1 %4622  ;;  %v4607_v19 = vpop.permute.xlu0 %4606 }
 0x3ce   : > { %v4780_v40 = vsel %vm4769_vm13, %v4763_v36, %v4623_v26  ;;  %v4772_v46 = vsel %vm4769_vm13, %v4755_v9, %v4607_v19 }
 0x3cf   : > { %5211 = vmatprep.mubr.msk.f32.mxu0 %vm4802_vm14, %v4772_v46  ;;  %5223 = vmatprep.mubr.msk.f32.mxu1 %vm4802_vm14, %v4780_v40 }
 0x3d1   : > { %v4295_v52 = vpop.permute.xlu1 %4294  ;;  %v4279_v3 = vpop.permute.xlu0 %4278 }
 0x3d2   : > { %v4665_v38 = vsel %vm4650_vm6, %v10539_v50, %v4295_v52  ;;  %v4657_v2 = vsel %vm4650_vm6, %v10540_v41, %v4279_v3 }
 0x3d5   : > { %v4437_v59 = vpop.permute.xlu1 %4436  ;;  %v4421_v16 = vpop.permute.xlu0 %4420 }
 0x3d6   : > { %v4715_v49 = vsel %vm4701_vm9, %v4698_v53, %v4437_v59  ;;  %v4707_v31 = vsel %vm4701_vm9, %v4690_v43, %v4421_v16 }
 0x3d9   : > { %v4483_v54 = vpop.permute.xlu1 %4482  ;;  %v4467_v30 = vpop.permute.xlu0 %4466 }
 0x3da   : > { %v4731_v43 = vsel %vm4718_vm10, %v9871_v18, %v4483_v54  ;;  %v4723_v7 = vsel %vm4718_vm10, %v9874_v37, %v4467_v30 }
 0x3dd   : > { %v4625_v17 = vpop.permute.xlu1 %4624  ;;  %v4609_v13 = vpop.permute.xlu0 %4608 }
 0x3de   : > { %v4781_v25 = vsel %vm4769_vm13, %v4764_v63, %v4625_v17  ;;  %v4773_v20 = vsel %vm4769_vm13, %v4756_v35, %v4609_v13 }
 0x3df   : > { %5212 = vmatmul.mubr.msk.f32.gmra.mrb[2].mxu0 %vm4802_vm14, %v4773_v20  ;;  %5224 = vmatmul.mubr.msk.f32.gmra.mrb[2].mxu1 %vm4802_vm14, %v4781_v25 }
 0x3e1   : > { %v9906_v24 = vpop.permute.xlu1 %4296  ;;  %v9908_v15 = vpop.permute.xlu0 %4280 }
 0x3e5   : > { %v4343_v61 = vpop.permute.xlu1 %4342  ;;  %v4327_v23 = vpop.permute.xlu0 %4326 }
 0x3e6   : > { %v4682_v44 = vsel %vm4667_vm7, %v4665_v38, %v4343_v61  ;;  %v4674_v28 = vsel %vm4667_vm7, %v4657_v2, %v4327_v23  ;;  %v10541_v38 = vld [vmem:[#allocation134_spill] sm:$0xff]  ;;  %v10542_v23 = vld [vmem:[#allocation135_spill] sm:$0xff] }
 0x3e7   : > { %v4666_v41 = vsel %vm4650_vm6, %v10541_v38, %v9906_v24 }
 0x3e9   : > { %v4485_v33 = vpop.permute.xlu1 %4484  ;;  %v4469_v34 = vpop.permute.xlu0 %4468 }
 0x3ea   : > { %v4732_v26 = vsel %vm4718_vm10, %v4715_v49, %v4485_v33  ;;  %v4724_v19 = vsel %vm4718_vm10, %v4707_v31, %v4469_v34  ;;  %v4658_v33 = vsel %vm4650_vm6, %v10542_v23, %v9908_v15 }
 0x3ed   : > { %v4531_v47 = vpop.permute.xlu1 %4530  ;;  %v4515_v56 = vpop.permute.xlu0 %4514 }
 0x3ee   : > { %v4748_v14 = vsel %vm4735_vm11, %v4731_v43, %v4531_v47  ;;  %v4740_v10 = vsel %vm4735_vm11, %v4723_v7, %v4515_v56 }
 0x3f1   : > { %v4345_v21 = vpop.permute.xlu1 %4344  ;;  %v4329_v60 = vpop.permute.xlu0 %4328 }
 0x3f2   : > { %v4675_v47 = vsel %vm4667_vm7, %v4658_v33, %v4329_v60 }
 0x3f5   : > { %v4391_v11 = vpop.permute.xlu1 %4390  ;;  %v4375_v5 = vpop.permute.xlu0 %4374 }
 0x3f6   : > { %v4699_v17 = vsel %vm4684_vm8, %v4682_v44, %v4391_v11  ;;  %v4691_v25 = vsel %vm4684_vm8, %v4674_v28, %v4375_v5  ;;  %v4683_v44 = vsel %vm4667_vm7, %v4666_v41, %v4345_v21 }
 0x3f9   : > { %v4533_v0 = vpop.permute.xlu1 %4532  ;;  %v4517_v6 = vpop.permute.xlu0 %4516 }
 0x3fa   : > { %v4749_v40 = vsel %vm4735_vm11, %v4732_v26, %v4533_v0  ;;  %v4741_v46 = vsel %vm4735_vm11, %v4724_v19, %v4517_v6 }
 0x3fd   : > { %v4579_v1 = vpop.permute.xlu1 %4578  ;;  %v4563_v62 = vpop.permute.xlu0 %4562 }
 0x3fe   : > { %v4765_v27 = vsel %vm4752_vm12, %v4748_v14, %v4579_v1  ;;  %v4757_v57 = vsel %vm4752_vm12, %v4740_v10, %v4563_v62 }
 0x401   : > { %v4393_v51 = vpop.permute.xlu1 %4392 }
 0x402   : > { %v4377_v22 = vpop.permute.xlu0 %4376  ;;  %v4700_v56 = vsel %vm4684_vm8, %v4683_v44, %v4393_v51 }
 0x403   : > { %v4692_v0 = vsel %vm4684_vm8, %v4675_v47, %v4377_v22 }
 0x405   : > { %v4439_v39 = vpop.permute.xlu1 %4438 }
 0x406   : > { %v4423_v4 = vpop.permute.xlu0 %4422  ;;  %v4716_v20 = vsel %vm4701_vm9, %v4699_v17, %v4439_v39 }
 0x407   : > { %v4708_v2 = vsel %vm4701_vm9, %v4691_v25, %v4423_v4 }
 0x409   : > { %v4581_v55 = vpop.permute.xlu1 %4580 }
 0x40a   : > { %v4565_v53 = vpop.permute.xlu0 %4564  ;;  %v4766_v52 = vsel %vm4752_vm12, %v4749_v40, %v4581_v55 }
 0x40b   : > { %v4758_v59 = vsel %vm4752_vm12, %v4741_v46, %v4565_v53 }
 0x40d   : > { %v4627_v45 = vpop.permute.xlu1 %4626 }
 0x40e   : > { %v4782_v58 = vsel %vm4769_vm13, %v4765_v27, %v4627_v45  ;;  %v4611_v32 = vpop.permute.xlu0 %4610  ;;  %v5144_v27 = vld [vmem:[%s10030_s6] ss:$0 sm:$0xff] }
 0x40f   : > { %v4774_v12 = vsel %vm4769_vm13, %v4757_v57, %v4611_v32  ;;  %5226 = vmatprep.mubr.msk.f32.mxu1 %vm4802_vm14, %v4782_v58 }
 0x410   : > { %5214 = vmatprep.mubr.msk.f32.mxu0 %vm4802_vm14, %v4774_v12 }
 0x411   : > { %v4441_v18 = vpop.permute.xlu1 %4440 }
 0x412   : > { %v4425_v37 = vpop.permute.xlu0 %4424  ;;  %v4717_v6 = vsel %vm4701_vm9, %v4700_v56, %v4441_v18 }
 0x413   : > { %v4709_v62 = vsel %vm4701_vm9, %v4692_v0, %v4425_v37 }
 0x415   : > { %v4487_v36 = vpop.permute.xlu1 %4486 }
 0x416   : > { %v4471_v9 = vpop.permute.xlu0 %4470  ;;  %v4733_v61 = vsel %vm4718_vm10, %v4716_v20, %v4487_v36 }
 0x417   : > { %v4725_v34 = vsel %vm4718_vm10, %v4708_v2, %v4471_v9 }
 0x419   : > { %v4629_v3 = vpop.permute.xlu1 %4628 }
 0x41a   : > { %v4783_v16 = vsel %vm4769_vm13, %v4766_v52, %v4629_v3  ;;  %v4613_v54 = vpop.permute.xlu0 %4612 }
 0x41b   : > { %v4775_v30 = vsel %vm4769_vm13, %v4758_v59, %v4613_v54  ;;  %5227 = vmatmul.mubr.msk.f32.gmra.mrb[4].mxu1 %vm4802_vm14, %v4783_v16 }
 0x41c   : > { %5215 = vmatmul.mubr.msk.f32.gmra.mrb[4].mxu0 %vm4802_vm14, %v4775_v30 }
 0x41d   : > { %v4489_v49 = vpop.permute.xlu1 %4488 }
 0x41e   : > { %v4473_v31 = vpop.permute.xlu0 %4472  ;;  %v4734_v60 = vsel %vm4718_vm10, %v4717_v6, %v4489_v49 }
 0x41f   : > { %v4726_v39 = vsel %vm4718_vm10, %v4709_v62, %v4473_v31 }
 0x421   : > { %v4535_v8 = vpop.permute.xlu1 %4534 }
 0x422   : > { %v4519_v42 = vpop.permute.xlu0 %4518  ;;  %v4750_v28 = vsel %vm4735_vm11, %v4733_v61, %v4535_v8 }
 0x423   : > { %v4742_v24 = vsel %vm4735_vm11, %v4725_v34, %v4519_v42 }
 0x425   : > { %v4537_v48 = vpop.permute.xlu1 %4536 }
 0x426   : > { %v4521_v29 = vpop.permute.xlu0 %4520  ;;  %v4751_v4 = vsel %vm4735_vm11, %v4734_v60, %v4537_v48 }
 0x427   : > { %v4743_v22 = vsel %vm4735_vm11, %v4726_v39, %v4521_v29 }
 0x429   : > { %v4583_v63 = vpop.permute.xlu1 %4582 }
 0x42a   : > { %v4567_v35 = vpop.permute.xlu0 %4566  ;;  %v4767_v11 = vsel %vm4752_vm12, %v4750_v28, %v4583_v63 }
 0x42b   : > { %v4759_v15 = vsel %vm4752_vm12, %v4742_v24, %v4567_v35 }
 0x42d   : > { %v4585_v13 = vpop.permute.xlu1 %4584 }
 0x42e   : > { %v4569_v50 = vpop.permute.xlu0 %4568  ;;  %v4768_v55 = vsel %vm4752_vm12, %v4751_v4, %v4585_v13 }
 0x42f   : > { %v4760_v43 = vsel %vm4752_vm12, %v4743_v22, %v4569_v50 }
 0x431   : > { %v4631_v5 = vpop.permute.xlu1 %4630 }
 0x432   : > { %v4784_v21 = vsel %vm4769_vm13, %v4767_v11, %v4631_v5  ;;  %v4615_v1 = vpop.permute.xlu0 %4614 }
 0x433   : > { %v4776_v51 = vsel %vm4769_vm13, %v4759_v15, %v4615_v1  ;;  %5229 = vmatprep.mubr.msk.f32.mxu1 %vm4802_vm14, %v4784_v21 }
 0x434   : > { %5217 = vmatprep.mubr.msk.f32.mxu0 %vm4802_vm14, %v4776_v51 }
 0x435   : > { %v4633_v53 = vpop.permute.xlu1 %4632 }
 0x436   : > { %v4785_v7 = vsel %vm4769_vm13, %v4768_v55, %v4633_v53  ;;  %v4617_v14 = vpop.permute.xlu0 %4616 }
 0x437   : > { %v4777_v10 = vsel %vm4769_vm13, %v4760_v43, %v4617_v14  ;;  %5230 = vmatmul.mubr.msk.f32.gmra.mrb[6].mxu1 %vm4802_vm14, %v4785_v7 }
 0x438   : > { %5218 = vmatmul.mubr.msk.f32.gmra.mrb[6].mxu0 %vm4802_vm14, %v4777_v10 }
 0x472   : > { %v5222_v45 = vpop.f32.mrb[0].mxu1 }
 0x473   : > { %v5210_v57 = vpop.f32.mrb[0].mxu0  ;;  %v4963_v58 = vadd.f32 %v5222_v45, %v5144_v27  ;;  %v4957_v32 = vpop.f32.mrb[1].mxu1 }
 0x474   : > { %v4923_v12 = vadd.f32 %v5210_v57, %v5144_v27  ;;  %v4917_v18 = vpop.f32.mrb[1].mxu0  ;;  %v4958_v37 = vadd.f32 %v5144_v27, %v4957_v32 }
 0x475   : > { %5005 = vst.msk [vmem:[%s5502_s21 + $0x48] sm:$0xff] %vm4650_vm6, %v4963_v58  ;;  %v4918_v36 = vadd.f32 %v5144_v27, %v4917_v18 }
 0x476   : > { %4997 = vst.msk [vmem:[%s5502_s21 + $0x8] sm:$0xff] %vm4650_vm6, %v4923_v12  ;;  %5004 = vst.msk [vmem:[%s5502_s21 + $0x40] sm:$0xff] %vm4650_vm6, %v4958_v37 }
 0x477   : > { %4996 = vst.msk [vmem:[%s5502_s21] sm:$0xff] %vm4650_vm6, %v4918_v36 }
 0x4b2   : > { %v5213_v9 = vpop.f32.mrb[2].mxu0  ;;  %v5225_v26 = vpop.f32.mrb[2].mxu1 }
 0x4b3   : > { %v4933_v19 = vadd.f32 %v5213_v9, %v5144_v27  ;;  %v4973_v40 = vadd.f32 %v5225_v26, %v5144_v27  ;;  %v4927_v46 = vpop.f32.mrb[3].mxu0  ;;  %v4967_v52 = vpop.f32.mrb[3].mxu1 }
 0x4b4   : > { %v4928_v3 = vadd.f32 %v5144_v27, %v4927_v46  ;;  %v4968_v59 = vadd.f32 %v5144_v27, %v4967_v52 }
 0x4b5   : > { %4999 = vst.msk [vmem:[%s5502_s21 + $0x18] sm:$0xff] %vm4650_vm6, %v4933_v19  ;;  %5007 = vst.msk [vmem:[%s5502_s21 + $0x58] sm:$0xff] %vm4650_vm6, %v4973_v40 }
 0x4b6   : > { %4998 = vst.msk [vmem:[%s5502_s21 + $0x10] sm:$0xff] %vm4650_vm6, %v4928_v3  ;;  %5006 = vst.msk [vmem:[%s5502_s21 + $0x50] sm:$0xff] %vm4650_vm6, %v4968_v59 }
 0x4ee   : > { %v5228_v16 = vpop.f32.mrb[4].mxu1 }
 0x4ef   : > { %v5216_v54 = vpop.f32.mrb[4].mxu0  ;;  %v4983_v30 = vadd.f32 %v5228_v16, %v5144_v27  ;;  %v4977_v49 = vpop.f32.mrb[5].mxu1 }
 0x4f0   : > { %v4943_v31 = vadd.f32 %v5216_v54, %v5144_v27  ;;  %v4937_v8 = vpop.f32.mrb[5].mxu0  ;;  %v4978_v42 = vadd.f32 %v5144_v27, %v4977_v49 }
 0x4f1   : > { %5009 = vst.msk [vmem:[%s5502_s21 + $0x68] sm:$0xff] %vm4650_vm6, %v4983_v30  ;;  %v4938_v48 = vadd.f32 %v5144_v27, %v4937_v8 }
 0x4f2   : > { %5001 = vst.msk [vmem:[%s5502_s21 + $0x28] sm:$0xff] %vm4650_vm6, %v4943_v31  ;;  %5008 = vst.msk [vmem:[%s5502_s21 + $0x60] sm:$0xff] %vm4650_vm6, %v4978_v42 }
 0x4f3   : > { %5000 = vst.msk [vmem:[%s5502_s21 + $0x20] sm:$0xff] %vm4650_vm6, %v4938_v48 }
 0x50a   : > { %v5231_v29 = vpop.f32.mrb[6].mxu1 }
 0x50b   : > { %v5219_v63 = vpop.f32.mrb[6].mxu0  ;;  %v4993_v35 = vadd.f32 %v5231_v29, %v5144_v27  ;;  %v4987_v17 = vpop.f32.mrb[7].mxu1 }
 0x50c   : > { %v4953_v13 = vadd.f32 %v5219_v63, %v5144_v27  ;;  %v4947_v25 = vpop.f32.mrb[7].mxu0  ;;  %v4988_v20 = vadd.f32 %v5144_v27, %v4987_v17 }
 0x50d   : > { %5011 = vst.msk [vmem:[%s5502_s21 + $0x78] sm:$0xff] %vm4650_vm6, %v4993_v35  ;;  %v4948_v50 = vadd.f32 %v5144_v27, %v4947_v25 }
 0x50e   : > { %5003 = vst.msk [vmem:[%s5502_s21 + $0x38] sm:$0xff] %vm4650_vm6, %v4953_v13  ;;  %5010 = vst.msk [vmem:[%s5502_s21 + $0x70] sm:$0xff] %vm4650_vm6, %v4988_v20 }
 0x50f   : > { %5002 = vst.msk [vmem:[%s5502_s21 + $0x30] sm:$0xff] %vm4650_vm6, %v4948_v50 }
 0x510 PF: > { %s17_s28 = sadd.s32 1, %s5405_s28   ;;  %s10543_s24 = smov %s5397_s26 }
 0x511   : > { %p14_p8 = scmp.ge.s32.totalorder %s17_s28, 6   ;;  %s10544_s25 = smov %s5401_s27 }
 0x512   : > { %s10545_s26 = smov %s10548_s29  ;;  %s10546_s27 = smov %s10552_s30 }
 0x513   :  { %16 = sbr.rel (!%p14_p8) target bundleno = 3 (0x3), region = 88 }

</bundles_post_ra>
